<compile_context>
chip_gen: v7x
topology: tpu7x:2x2x1
jax: 0.10.0
libtpu: 0.0.40
codegen_flags: <defaults>
</compile_context>

<pallas_src>
import math

import jax
import jax.numpy as jnp
from jax import lax
from jax.experimental import pallas as pl
from jax.experimental.pallas import tpu as pltpu

# ---- small, lane-aligned config mirroring vit_huge_patch14_224_clip_laion2b ----
IMG_SIZE  = 28                     # stands in for 224
PATCH     = 14                     # same patch size as ViT-Huge/14
IN_CHANS  = 3
EMBED_DIM = 256                    # stands in for 1280 (multiple of 128)
NUM_HEADS = 8                      # head_dim = 32
HEAD_DIM  = EMBED_DIM // NUM_HEADS
DEPTH     = 2                      # stands in for 32 blocks
MLP_RATIO = 4
HIDDEN    = MLP_RATIO * EMBED_DIM
EMB_SIZE  = 128                    # stands in for 1024 (multiple of 128)
LN_EPS    = 1e-6                   # timm ViT LayerNorm eps

GRID_H      = IMG_SIZE // PATCH
NUM_PATCHES = GRID_H * GRID_H
SEQ         = NUM_PATCHES + 1      # 5 real tokens (CLS + patches)
SEQ_PAD     = 8                    # sublane-aligned sequence length
PATCH_DIM   = IN_CHANS * PATCH * PATCH
ATTN_SCALE  = 1.0 / math.sqrt(HEAD_DIM)


# ------------------------------ in-kernel helpers ----------------------------
def _mxu(a, b):
    """bf16-operand MXU matmul with f32 accumulation."""
    return jnp.dot(a.astype(jnp.bfloat16), b.astype(jnp.bfloat16),
                   preferred_element_type=jnp.float32)


def _mxu_qk(q, k):
    """q @ k.T, contracting last dims (Mosaic lowers the transposed RHS)."""
    return lax.dot_general(
        q.astype(jnp.bfloat16), k.astype(jnp.bfloat16),
        (((1,), (1,)), ((), ())),
        preferred_element_type=jnp.float32)


def _layernorm(x, g, b):
    mu = jnp.mean(x, axis=-1, keepdims=True)
    xc = x - mu
    var = jnp.mean(xc * xc, axis=-1, keepdims=True)
    return xc * lax.rsqrt(var + LN_EPS) * g + b


def _gelu(x):                       # exact (erf) GELU, same as nn.GELU()
    return 0.5 * x * (1.0 + lax.erf(x * (1.0 / math.sqrt(2.0))))


# ------------------------------ fused encoder kernel -------------------------
def _encoder_kernel(patch_ref, pw_ref, add_ref, pre_g, pre_b,
                    ln1g, ln1b, qkvw, qkvb, projw, projb,
                    ln2g, ln2b, fc1w, fc1b, fc2w, fc2b,
                    ng, nb, poolw, poolb,
                    o_ref, tok_scr, qkv_scr):
    d = pl.program_id(1)

    # ---- patch-embed + cls/pos add + norm_pre (only at the first depth step)
    # 1/255 is folded into pw; cls/pos/patch_b are pre-folded into `add`.
    @pl.when(d == 0)
    def _():
        tok0 = _mxu(patch_ref[0], pw_ref[...]) + add_ref[0]
        tok_scr[...] = _layernorm(tok0, pre_g[...], pre_b[...])

    tok = tok_scr[...]                                          # (SEQ_PAD, D) f32

    # ---- transformer block d: LN1 + QKV + MHSA + proj + residual ----
    y = _layernorm(tok, ln1g[0], ln1b[0])
    qkv_scr[...] = (_mxu(y, qkvw[0]) + qkvb[0]).astype(jnp.bfloat16)

    # mask padded key columns (SEQ..SEQ_PAD-1) so padding never leaks
    kmask = lax.broadcasted_iota(jnp.int32, (SEQ_PAD, SEQ_PAD), 1) < SEQ

    head_outs = []
    for h in range(NUM_HEADS):                                  # static unrolled
        c = h * HEAD_DIM
        q = qkv_scr[:, c:c + HEAD_DIM]                          # scale folded into Wq
        k = qkv_scr[:, EMBED_DIM + c:EMBED_DIM + c + HEAD_DIM]
        v = qkv_scr[:, 2 * EMBED_DIM + c:2 * EMBED_DIM + c + HEAD_DIM]
        s = _mxu_qk(q, k)                                       # (SEQ_PAD, SEQ_PAD) f32
        s = jnp.where(kmask, s, -1e30)
        s = s - jnp.max(s, axis=-1, keepdims=True)
        p = jnp.exp(s)
        p = p * pl.reciprocal(jnp.sum(p, axis=-1, keepdims=True), approx=True)
        head_outs.append(_mxu(p, v))                            # (SEQ_PAD, HEAD_DIM)

    attn = jnp.concatenate(head_outs, axis=-1)                  # (SEQ_PAD, D)
    tok = tok + _mxu(attn, projw[0]) + projb[0]                 # one K=256 proj matmul

    # ---- MLP: LN2 + fc1 + GELU + fc2 + residual ----
    y = _layernorm(tok, ln2g[0], ln2b[0])
    h1 = _gelu(_mxu(y, fc1w[0]) + fc1b[0])
    tok = tok + _mxu(h1, fc2w[0]) + fc2b[0]
    tok_scr[...] = tok

    # ---- head (only at the last depth step): LN on the CLS row + pool matmul
    @pl.when(d == DEPTH - 1)
    def _():
        cls = tok[0:1, :]                                       # (1, D)
        yh = _layernorm(cls, ng[...], nb[...])
        o_ref[0] = _mxu(yh, poolw[...]) + poolb[...]            # (1, EMB_SIZE)


# ----------------------------- Pallas wrapper --------------------------------
def _const_spec(shape):
    n = len(shape)
    return pl.BlockSpec(shape, lambda b, d, n=n: (0,) * n)


def _depth_spec(shape):
    n = len(shape)
    return pl.BlockSpec((1,) + tuple(shape[1:]),
                        lambda b, d, n=n: (d,) + (0,) * (n - 1))


def pallas_encoder(patches, add, params):
    B = patches.shape[0]
    args = (
        patches, params["patch_w"], add, params["pre_g"], params["pre_b"],
        params["ln1_g"], params["ln1_b"], params["qkv_w"], params["qkv_b"],
        params["proj_w"], params["proj_b"], params["ln2_g"], params["ln2_b"],
        params["fc1_w"], params["fc1_b"], params["fc2_w"], params["fc2_b"],
        params["norm_g"], params["norm_b"], params["pool_w"], params["pool_b"],
    )
    in_specs = [pl.BlockSpec((1, SEQ_PAD, PATCH_DIM), lambda b, d: (b, 0, 0))]
    in_specs += [_const_spec(a.shape) for a in args[1:5]]       # embed weights
    in_specs += [_depth_spec(a.shape) for a in args[5:17]]      # stacked block weights
    in_specs += [_const_spec(a.shape) for a in args[17:]]       # head weights

    out = pl.pallas_call(
        _encoder_kernel,
        out_shape=jax.ShapeDtypeStruct((B, 1, EMB_SIZE), jnp.float32),
        grid=(B, DEPTH),
        in_specs=in_specs,
        out_specs=pl.BlockSpec((1, 1, EMB_SIZE), lambda b, d: (b, 0, 0)),
        scratch_shapes=[
            pltpu.VMEM((SEQ_PAD, EMBED_DIM), jnp.float32),        # resident tokens
            pltpu.VMEM((SEQ_PAD, 3 * EMBED_DIM), jnp.bfloat16),   # qkv
        ],
        compiler_params=pltpu.CompilerParams(
            dimension_semantics=("parallel", "arbitrary")),
    )(*args)
    return out.reshape(B, EMB_SIZE)


# ------------------------------- parameters ----------------------------------
def adaptive_pool_matrix(L, out):
    """Matrix P (L, out) such that x @ P == nn.AdaptiveAvgPool1d(out)(x)."""
    P = [[0.0] * out for _ in range(L)]
    for i in range(out):
        s = (i * L) // out
        e = -((-(i + 1) * L) // out)          # ceil((i+1)*L/out)
        w = 1.0 / (e - s)
        for j in range(s, e):
            P[j][i] = w
    return jnp.asarray(P, jnp.float32)


def init_params(key):
    keys = iter(jax.random.split(key, 4 + 4 * DEPTH))

    def nrm(shape, std=0.02):
        return std * jax.random.normal(next(keys), shape, jnp.float32)

    # fold 1/sqrt(head_dim) into the Q output columns of the QKV weight
    # (if real checkpoint weights are loaded, the Q bias must be scaled too).
    qkv_scale = jnp.concatenate(
        [jnp.full((EMBED_DIM,), ATTN_SCALE, jnp.float32),
         jnp.ones((2 * EMBED_DIM,), jnp.float32)])

    p = {
        # 1/255 input scale folded into the patch-embed weight
        "patch_w": (nrm((PATCH_DIM, EMBED_DIM)) * (1.0 / 255.0)).astype(jnp.bfloat16),
        "patch_b": jnp.zeros((1, EMBED_DIM), jnp.float32),
        "cls":     nrm((1, 1, EMBED_DIM)),
        "pos":     nrm((1, SEQ, EMBED_DIM)),
        "pre_g":   jnp.ones((1, EMBED_DIM), jnp.float32),       # norm_pre (CLIP ViT)
        "pre_b":   jnp.zeros((1, EMBED_DIM), jnp.float32),
        "norm_g":  jnp.ones((1, EMBED_DIM), jnp.float32),
        "norm_b":  jnp.zeros((1, EMBED_DIM), jnp.float32),
        "pool_w":  adaptive_pool_matrix(EMBED_DIM, EMB_SIZE).astype(jnp.bfloat16),
        "pool_b":  jnp.zeros((1, EMB_SIZE), jnp.float32),
    }

    # depth-stacked block parameters (leading axis indexed by grid axis 1)
    p.update(
        ln1_g=jnp.ones((DEPTH, 1, EMBED_DIM), jnp.float32),
        ln1_b=jnp.zeros((DEPTH, 1, EMBED_DIM), jnp.float32),
        qkv_w=jnp.stack([nrm((EMBED_DIM, 3 * EMBED_DIM)) * qkv_scale[None, :]
                         for _ in range(DEPTH)]).astype(jnp.bfloat16),
        qkv_b=jnp.zeros((DEPTH, 1, 3 * EMBED_DIM), jnp.float32),
        proj_w=jnp.stack([nrm((EMBED_DIM, EMBED_DIM))
                          for _ in range(DEPTH)]).astype(jnp.bfloat16),
        proj_b=jnp.zeros((DEPTH, 1, EMBED_DIM), jnp.float32),
        ln2_g=jnp.ones((DEPTH, 1, EMBED_DIM), jnp.float32),
        ln2_b=jnp.zeros((DEPTH, 1, EMBED_DIM), jnp.float32),
        fc1_w=jnp.stack([nrm((EMBED_DIM, HIDDEN))
                         for _ in range(DEPTH)]).astype(jnp.bfloat16),
        fc1_b=jnp.zeros((DEPTH, 1, HIDDEN), jnp.float32),
        fc2_w=jnp.stack([nrm((HIDDEN, EMBED_DIM))
                         for _ in range(DEPTH)]).astype(jnp.bfloat16),
        fc2_b=jnp.zeros((DEPTH, 1, EMBED_DIM), jnp.float32),
    )
    return p


# -------------------------------- forward ------------------------------------
def encoder_forward(params, x):
    B = x.shape[0]

    # --- preprocessing glue (no clean Pallas equivalent for bilinear resize) ---
    # TODO(synk): jax.image.resize(antialias=False) may differ slightly from
    #             torchvision resize; no CLIP mean/std normalization (matches module).
    x = jax.image.resize(x, (B, IN_CHANS, IMG_SIZE, IMG_SIZE),
                         method="bilinear", antialias=False).astype(jnp.float32)

    # --- patch extraction (pure layout glue, done in XLA) ---
    p = x.reshape(B, IN_CHANS, GRID_H, PATCH, GRID_H, PATCH)
    p = p.transpose(0, 2, 4, 1, 3, 5).reshape(B, NUM_PATCHES, PATCH_DIM)
    # prepend a zero row for the CLS slot + pad the sequence to SEQ_PAD rows
    # (padded rows are masked out of attention inside the kernel)
    p = jnp.pad(p, ((0, 0), (1, SEQ_PAD - SEQ), (0, 0)))

    add = jnp.concatenate(
        [params["cls"] + params["pos"][:, :1],
         params["pos"][:, 1:] + params["patch_b"][None]], axis=1)   # (1, SEQ, D)
    add = jnp.pad(add, ((0, 0), (0, SEQ_PAD - SEQ), (0, 0)))        # (1, SEQ_PAD, D)

    # one fused pallas_call: embed + all blocks + final LN(CLS) + adaptive pool
    return pallas_encoder(p, add, params)                           # (B, EMB_SIZE)


if __name__ == "__main__":
    key = jax.random.PRNGKey(0)
    pkey, xkey = jax.random.split(key)
    params = init_params(pkey)
    # small NCHW uint8-range image batch, like a PyTorch 0..255 tensor
    x = jax.random.uniform(xkey, (2, 3, 32, 32), jnp.float32, 0.0, 255.0)
    emb = jax.jit(encoder_forward)(params, x)
    emb = jax.block_until_ready(emb)
    assert emb.shape == (2, EMB_SIZE) and emb.dtype == jnp.float32
    assert bool(jnp.all(jnp.isfinite(emb)))
    print("KERNEL_OK")
</pallas_src>

<mosaic_0001>
module attributes {stable_mosaic.version = 11 : i64} {
  func.func @_encoder_kernel(%arg0: i32, %arg1: i32, %arg2: memref<1x8x588xf32, #tpu.memory_space<vmem>>, %arg3: memref<588x256xbf16, #tpu.memory_space<vmem>>, %arg4: memref<1x8x256xf32, #tpu.memory_space<vmem>>, %arg5: memref<1x256xf32, #tpu.memory_space<vmem>>, %arg6: memref<1x256xf32, #tpu.memory_space<vmem>>, %arg7: memref<1x1x256xf32, #tpu.memory_space<vmem>>, %arg8: memref<1x1x256xf32, #tpu.memory_space<vmem>>, %arg9: memref<1x256x768xbf16, #tpu.memory_space<vmem>>, %arg10: memref<1x1x768xf32, #tpu.memory_space<vmem>>, %arg11: memref<1x256x256xbf16, #tpu.memory_space<vmem>>, %arg12: memref<1x1x256xf32, #tpu.memory_space<vmem>>, %arg13: memref<1x1x256xf32, #tpu.memory_space<vmem>>, %arg14: memref<1x1x256xf32, #tpu.memory_space<vmem>>, %arg15: memref<1x256x1024xbf16, #tpu.memory_space<vmem>>, %arg16: memref<1x1x1024xf32, #tpu.memory_space<vmem>>, %arg17: memref<1x1024x256xbf16, #tpu.memory_space<vmem>>, %arg18: memref<1x1x256xf32, #tpu.memory_space<vmem>>, %arg19: memref<1x256xf32, #tpu.memory_space<vmem>>, %arg20: memref<1x256xf32, #tpu.memory_space<vmem>>, %arg21: memref<256x128xbf16, #tpu.memory_space<vmem>>, %arg22: memref<1x128xf32, #tpu.memory_space<vmem>>, %arg23: memref<1x1x128xf32, #tpu.memory_space<vmem>>, %arg24: memref<8x256xf32, #tpu.memory_space<vmem>>, %arg25: memref<8x768xbf16, #tpu.memory_space<vmem>>) attributes {dimension_semantics = [#tpu.dimension_semantics<parallel>, #tpu.dimension_semantics<arbitrary>], iteration_bounds = array<i64: 2, 2>, scalar_prefetch = 0 : i64, scratch_operands = 2 : i64, tpu.core_type = #tpu.core_type<tc>, window_params = [{transform_indices = @transform_0, window_bounds = array<i64: 1, 8, 588>}, {pipeline_mode = #tpu.pipeline_mode<synchronous>, transform_indices = @transform_1, window_bounds = array<i64: 588, 256>}, {pipeline_mode = #tpu.pipeline_mode<synchronous>, transform_indices = @transform_2, window_bounds = array<i64: 1, 8, 256>}, {pipeline_mode = #tpu.pipeline_mode<synchronous>, transform_indices = @transform_3, window_bounds = array<i64: 1, 256>}, {pipeline_mode = #tpu.pipeline_mode<synchronous>, transform_indices = @transform_4, window_bounds = array<i64: 1, 256>}, {transform_indices = @transform_5, window_bounds = array<i64: 1, 1, 256>}, {transform_indices = @transform_6, window_bounds = array<i64: 1, 1, 256>}, {transform_indices = @transform_7, window_bounds = array<i64: 1, 256, 768>}, {transform_indices = @transform_8, window_bounds = array<i64: 1, 1, 768>}, {transform_indices = @transform_9, window_bounds = array<i64: 1, 256, 256>}, {transform_indices = @transform_10, window_bounds = array<i64: 1, 1, 256>}, {transform_indices = @transform_11, window_bounds = array<i64: 1, 1, 256>}, {transform_indices = @transform_12, window_bounds = array<i64: 1, 1, 256>}, {transform_indices = @transform_13, window_bounds = array<i64: 1, 256, 1024>}, {transform_indices = @transform_14, window_bounds = array<i64: 1, 1, 1024>}, {transform_indices = @transform_15, window_bounds = array<i64: 1, 1024, 256>}, {transform_indices = @transform_16, window_bounds = array<i64: 1, 1, 256>}, {pipeline_mode = #tpu.pipeline_mode<synchronous>, transform_indices = @transform_17, window_bounds = array<i64: 1, 256>}, {pipeline_mode = #tpu.pipeline_mode<synchronous>, transform_indices = @transform_18, window_bounds = array<i64: 1, 256>}, {pipeline_mode = #tpu.pipeline_mode<synchronous>, transform_indices = @transform_19, window_bounds = array<i64: 256, 128>}, {pipeline_mode = #tpu.pipeline_mode<synchronous>, transform_indices = @transform_20, window_bounds = array<i64: 1, 128>}, {transform_indices = @transform_21, window_bounds = array<i64: 1, 1, 128>}]} {
    %c0_i32 = arith.constant 0 : i32
    %0 = arith.cmpi eq, %arg1, %c0_i32 : i32
    %1 = arith.extui %0 : i1 to i32
    %c0_i32_0 = arith.constant 0 : i32
    %2 = arith.cmpi ne, %1, %c0_i32_0 : i32
    scf.if %2 {
      %c0_124 = arith.constant 0 : index
      %c0_125 = arith.constant 0 : index
      %c0_126 = arith.constant 0 : index
      %248 = vector.load %arg2[%c0_124, %c0_125, %c0_126] : memref<1x8x588xf32, #tpu.memory_space<vmem>>, vector<1x8x588xf32>
      %249 = vector.shape_cast %248 : vector<1x8x588xf32> to vector<8x588xf32>
      %c0_127 = arith.constant 0 : index
      %c0_128 = arith.constant 0 : index
      %250 = vector.load %arg3[%c0_127, %c0_128] : memref<588x256xbf16, #tpu.memory_space<vmem>>, vector<588x256xbf16>
      %251 = arith.truncf %249 : vector<8x588xf32> to vector<8x588xbf16>
      %cst_129 = arith.constant dense<0.000000e+00> : vector<8x256xf32>
      %252 = tpu.matmul %251, %250, %cst_129 {dimension_numbers = #tpu.dot_dimension_numbers<[1], [0], [0], [1], [0, 0, 1, 1], [], []>} : vector<8x588xbf16>, vector<588x256xbf16>, vector<8x256xf32> -> vector<8x256xf32>
      %c0_130 = arith.constant 0 : index
      %c0_131 = arith.constant 0 : index
      %c0_132 = arith.constant 0 : index
      %253 = vector.load %arg4[%c0_130, %c0_131, %c0_132] : memref<1x8x256xf32, #tpu.memory_space<vmem>>, vector<1x8x256xf32>
      %254 = vector.shape_cast %253 : vector<1x8x256xf32> to vector<8x256xf32>
      %255 = arith.addf %252, %254 : vector<8x256xf32>
      %c0_133 = arith.constant 0 : index
      %c0_134 = arith.constant 0 : index
      %256 = vector.load %arg5[%c0_133, %c0_134] : memref<1x256xf32, #tpu.memory_space<vmem>>, vector<1x256xf32>
      %c0_135 = arith.constant 0 : index
      %c0_136 = arith.constant 0 : index
      %257 = vector.load %arg6[%c0_135, %c0_136] : memref<1x256xf32, #tpu.memory_space<vmem>>, vector<1x256xf32>
      %cst_137 = arith.constant dense<0.000000e+00> : vector<8xf32>
      %258 = vector.multi_reduction <add>, %255, %cst_137 [1] : vector<8x256xf32> to vector<8xf32>
      %259 = vector.shape_cast %258 : vector<8xf32> to vector<8x1xf32>
      %cst_138 = arith.constant 2.560000e+02 : f32
      %260 = vector.broadcast %cst_138 : f32 to vector<8x1xf32>
      %261 = arith.divf %259, %260 : vector<8x1xf32>
      %262 = vector.broadcast %261 : vector<8x1xf32> to vector<8x256xf32>
      %263 = arith.subf %255, %262 : vector<8x256xf32>
      %264 = arith.mulf %263, %263 : vector<8x256xf32>
      %cst_139 = arith.constant dense<0.000000e+00> : vector<8xf32>
      %265 = vector.multi_reduction <add>, %264, %cst_139 [1] : vector<8x256xf32> to vector<8xf32>
      %266 = vector.shape_cast %265 : vector<8xf32> to vector<8x1xf32>
      %cst_140 = arith.constant 2.560000e+02 : f32
      %267 = vector.broadcast %cst_140 : f32 to vector<8x1xf32>
      %268 = arith.divf %266, %267 : vector<8x1xf32>
      %cst_141 = arith.constant 9.99999997E-7 : f32
      %269 = vector.broadcast %cst_141 : f32 to vector<8x1xf32>
      %270 = arith.addf %268, %269 : vector<8x1xf32>
      %271 = math.rsqrt %270 : vector<8x1xf32>
      %272 = vector.broadcast %271 : vector<8x1xf32> to vector<8x256xf32>
      %273 = arith.mulf %263, %272 : vector<8x256xf32>
      %274 = vector.broadcast %256 : vector<1x256xf32> to vector<8x256xf32>
      %275 = arith.mulf %273, %274 : vector<8x256xf32>
      %276 = vector.broadcast %257 : vector<1x256xf32> to vector<8x256xf32>
      %277 = arith.addf %275, %276 : vector<8x256xf32>
      %c0_142 = arith.constant 0 : index
      %c0_143 = arith.constant 0 : index
      %278 = vector.load %arg24[%c0_142, %c0_143] : memref<8x256xf32, #tpu.memory_space<vmem>>, vector<8x256xf32>
      tpu.vector_store %arg24[%c0_142, %c0_143], %277 {strides = array<i32>} : memref<8x256xf32, #tpu.memory_space<vmem>>, vector<8x256xf32>,
    } else {
    }
    %c0 = arith.constant 0 : index
    %c0_1 = arith.constant 0 : index
    %3 = vector.load %arg24[%c0, %c0_1] : memref<8x256xf32, #tpu.memory_space<vmem>>, vector<8x256xf32>
    %c0_2 = arith.constant 0 : index
    %c0_3 = arith.constant 0 : index
    %c0_4 = arith.constant 0 : index
    %4 = vector.load %arg7[%c0_2, %c0_3, %c0_4] : memref<1x1x256xf32, #tpu.memory_space<vmem>>, vector<1x1x256xf32>
    %5 = vector.shape_cast %4 : vector<1x1x256xf32> to vector<1x256xf32>
    %c0_5 = arith.constant 0 : index
    %c0_6 = arith.constant 0 : index
    %c0_7 = arith.constant 0 : index
    %6 = vector.load %arg8[%c0_5, %c0_6, %c0_7] : memref<1x1x256xf32, #tpu.memory_space<vmem>>, vector<1x1x256xf32>
    %7 = vector.shape_cast %6 : vector<1x1x256xf32> to vector<1x256xf32>
    %cst = arith.constant dense<0.000000e+00> : vector<8xf32>
    %8 = vector.multi_reduction <add>, %3, %cst [1] : vector<8x256xf32> to vector<8xf32>
    %9 = vector.shape_cast %8 : vector<8xf32> to vector<8x1xf32>
    %cst_8 = arith.constant 2.560000e+02 : f32
    %10 = vector.broadcast %cst_8 : f32 to vector<8x1xf32>
    %11 = arith.divf %9, %10 : vector<8x1xf32>
    %12 = vector.broadcast %11 : vector<8x1xf32> to vector<8x256xf32>
    %13 = arith.subf %3, %12 : vector<8x256xf32>
    %14 = arith.mulf %13, %13 : vector<8x256xf32>
    %cst_9 = arith.constant dense<0.000000e+00> : vector<8xf32>
    %15 = vector.multi_reduction <add>, %14, %cst_9 [1] : vector<8x256xf32> to vector<8xf32>
    %16 = vector.shape_cast %15 : vector<8xf32> to vector<8x1xf32>
    %cst_10 = arith.constant 2.560000e+02 : f32
    %17 = vector.broadcast %cst_10 : f32 to vector<8x1xf32>
    %18 = arith.divf %16, %17 : vector<8x1xf32>
    %cst_11 = arith.constant 9.99999997E-7 : f32
    %19 = vector.broadcast %cst_11 : f32 to vector<8x1xf32>
    %20 = arith.addf %18, %19 : vector<8x1xf32>
    %21 = math.rsqrt %20 : vector<8x1xf32>
    %22 = vector.broadcast %21 : vector<8x1xf32> to vector<8x256xf32>
    %23 = arith.mulf %13, %22 : vector<8x256xf32>
    %24 = vector.broadcast %5 : vector<1x256xf32> to vector<8x256xf32>
    %25 = arith.mulf %23, %24 : vector<8x256xf32>
    %26 = vector.broadcast %7 : vector<1x256xf32> to vector<8x256xf32>
    %27 = arith.addf %25, %26 : vector<8x256xf32>
    %c0_12 = arith.constant 0 : index
    %c0_13 = arith.constant 0 : index
    %c0_14 = arith.constant 0 : index
    %28 = vector.load %arg9[%c0_12, %c0_13, %c0_14] : memref<1x256x768xbf16, #tpu.memory_space<vmem>>, vector<1x256x768xbf16>
    %29 = vector.shape_cast %28 : vector<1x256x768xbf16> to vector<256x768xbf16>
    %30 = arith.truncf %27 : vector<8x256xf32> to vector<8x256xbf16>
    %cst_15 = arith.constant dense<0.000000e+00> : vector<8x768xf32>
    %31 = tpu.matmul %30, %29, %cst_15 {dimension_numbers = #tpu.dot_dimension_numbers<[1], [0], [0], [1], [0, 0, 1, 1], [], []>} : vector<8x256xbf16>, vector<256x768xbf16>, vector<8x768xf32> -> vector<8x768xf32>
    %c0_16 = arith.constant 0 : index
    %c0_17 = arith.constant 0 : index
    %c0_18 = arith.constant 0 : index
    %32 = vector.load %arg10[%c0_16, %c0_17, %c0_18] : memref<1x1x768xf32, #tpu.memory_space<vmem>>, vector<1x1x768xf32>
    %33 = vector.shape_cast %32 : vector<1x1x768xf32> to vector<1x768xf32>
    %34 = vector.broadcast %33 : vector<1x768xf32> to vector<8x768xf32>
    %35 = arith.addf %31, %34 : vector<8x768xf32>
    %36 = arith.truncf %35 : vector<8x768xf32> to vector<8x768xbf16>
    %c0_19 = arith.constant 0 : index
    %c0_20 = arith.constant 0 : index
    %37 = vector.load %arg25[%c0_19, %c0_20] : memref<8x768xbf16, #tpu.memory_space<vmem>>, vector<8x768xbf16>
    tpu.vector_store %arg25[%c0_19, %c0_20], %36 {strides = array<i32>} : memref<8x768xbf16, #tpu.memory_space<vmem>>, vector<8x768xbf16>,
    %38 = tpu.iota {dimensions = array<i32: 1>} : vector<8x8xi32>
    %c5_i32 = arith.constant 5 : i32
    %39 = vector.broadcast %c5_i32 : i32 to vector<8x8xi32>
    %40 = arith.cmpi slt, %38, %39 : vector<8x8xi32>
    %c0_21 = arith.constant 0 : index
    %c0_22 = arith.constant 0 : index
    %41 = vector.load %arg25[%c0_21, %c0_22] : memref<8x768xbf16, #tpu.memory_space<vmem>>, vector<8x32xbf16>
    %c0_23 = arith.constant 0 : index
    %c256 = arith.constant 256 : index
    %42 = vector.load %arg25[%c0_23, %c256] : memref<8x768xbf16, #tpu.memory_space<vmem>>, vector<8x32xbf16>
    %c0_24 = arith.constant 0 : index
    %c512 = arith.constant 512 : index
    %43 = vector.load %arg25[%c0_24, %c512] : memref<8x768xbf16, #tpu.memory_space<vmem>>, vector<8x32xbf16>
    %cst_25 = arith.constant dense<0.000000e+00> : vector<8x8xf32>
    %44 = tpu.matmul %41, %42, %cst_25 {dimension_numbers = #tpu.dot_dimension_numbers<[1], [1], [0], [0], [0, 0, 1, 0], [], []>} : vector<8x32xbf16>, vector<8x32xbf16>, vector<8x8xf32> -> vector<8x8xf32>
    %cst_26 = arith.constant -1.000000e+30 : f32
    %45 = vector.broadcast %cst_26 : f32 to vector<8x8xf32>
    %46 = arith.select %40, %44, %45 : vector<8x8xi1>, vector<8x8xf32>
    %cst_27 = arith.constant dense<0xFF800000> : vector<8xf32>
    %47 = vector.multi_reduction <maximumf>, %46, %cst_27 [1] : vector<8x8xf32> to vector<8xf32>
    %48 = vector.shape_cast %47 : vector<8xf32> to vector<8x1xf32>
    %49 = vector.broadcast %48 : vector<8x1xf32> to vector<8x8xf32>
    %50 = arith.subf %46, %49 : vector<8x8xf32>
    %51 = math.exp %50 : vector<8x8xf32>
    %cst_28 = arith.constant dense<0.000000e+00> : vector<8xf32>
    %52 = vector.multi_reduction <add>, %51, %cst_28 [1] : vector<8x8xf32> to vector<8xf32>
    %53 = vector.shape_cast %52 : vector<8xf32> to vector<8x1xf32>
    %54 = tpu.reciprocal %53 {approx = true} : vector<8x1xf32> -> vector<8x1xf32>
    %55 = vector.broadcast %54 : vector<8x1xf32> to vector<8x8xf32>
    %56 = arith.mulf %51, %55 : vector<8x8xf32>
    %57 = arith.truncf %56 : vector<8x8xf32> to vector<8x8xbf16>
    %cst_29 = arith.constant dense<0.000000e+00> : vector<8x32xf32>
    %58 = tpu.matmul %57, %43, %cst_29 {dimension_numbers = #tpu.dot_dimension_numbers<[1], [0], [0], [1], [0, 0, 1, 1], [], []>} : vector<8x8xbf16>, vector<8x32xbf16>, vector<8x32xf32> -> vector<8x32xf32>
    %c0_30 = arith.constant 0 : index
    %c32 = arith.constant 32 : index
    %59 = vector.load %arg25[%c0_30, %c32] : memref<8x768xbf16, #tpu.memory_space<vmem>>, vector<8x32xbf16>
    %c0_31 = arith.constant 0 : index
    %c288 = arith.constant 288 : index
    %60 = vector.load %arg25[%c0_31, %c288] : memref<8x768xbf16, #tpu.memory_space<vmem>>, vector<8x32xbf16>
    %c0_32 = arith.constant 0 : index
    %c544 = arith.constant 544 : index
    %61 = vector.load %arg25[%c0_32, %c544] : memref<8x768xbf16, #tpu.memory_space<vmem>>, vector<8x32xbf16>
    %cst_33 = arith.constant dense<0.000000e+00> : vector<8x8xf32>
    %62 = tpu.matmul %59, %60, %cst_33 {dimension_numbers = #tpu.dot_dimension_numbers<[1], [1], [0], [0], [0, 0, 1, 0], [], []>} : vector<8x32xbf16>, vector<8x32xbf16>, vector<8x8xf32> -> vector<8x8xf32>
    %cst_34 = arith.constant -1.000000e+30 : f32
    %63 = vector.broadcast %cst_34 : f32 to vector<8x8xf32>
    %64 = arith.select %40, %62, %63 : vector<8x8xi1>, vector<8x8xf32>
    %cst_35 = arith.constant dense<0xFF800000> : vector<8xf32>
    %65 = vector.multi_reduction <maximumf>, %64, %cst_35 [1] : vector<8x8xf32> to vector<8xf32>
    %66 = vector.shape_cast %65 : vector<8xf32> to vector<8x1xf32>
    %67 = vector.broadcast %66 : vector<8x1xf32> to vector<8x8xf32>
    %68 = arith.subf %64, %67 : vector<8x8xf32>
    %69 = math.exp %68 : vector<8x8xf32>
    %cst_36 = arith.constant dense<0.000000e+00> : vector<8xf32>
    %70 = vector.multi_reduction <add>, %69, %cst_36 [1] : vector<8x8xf32> to vector<8xf32>
    %71 = vector.shape_cast %70 : vector<8xf32> to vector<8x1xf32>
    %72 = tpu.reciprocal %71 {approx = true} : vector<8x1xf32> -> vector<8x1xf32>
    %73 = vector.broadcast %72 : vector<8x1xf32> to vector<8x8xf32>
    %74 = arith.mulf %69, %73 : vector<8x8xf32>
    %75 = arith.truncf %74 : vector<8x8xf32> to vector<8x8xbf16>
    %cst_37 = arith.constant dense<0.000000e+00> : vector<8x32xf32>
    %76 = tpu.matmul %75, %61, %cst_37 {dimension_numbers = #tpu.dot_dimension_numbers<[1], [0], [0], [1], [0, 0, 1, 1], [], []>} : vector<8x8xbf16>, vector<8x32xbf16>, vector<8x32xf32> -> vector<8x32xf32>
    %c0_38 = arith.constant 0 : index
    %c64 = arith.constant 64 : index
    %77 = vector.load %arg25[%c0_38, %c64] : memref<8x768xbf16, #tpu.memory_space<vmem>>, vector<8x32xbf16>
    %c0_39 = arith.constant 0 : index
    %c320 = arith.constant 320 : index
    %78 = vector.load %arg25[%c0_39, %c320] : memref<8x768xbf16, #tpu.memory_space<vmem>>, vector<8x32xbf16>
    %c0_40 = arith.constant 0 : index
    %c576 = arith.constant 576 : index
    %79 = vector.load %arg25[%c0_40, %c576] : memref<8x768xbf16, #tpu.memory_space<vmem>>, vector<8x32xbf16>
    %cst_41 = arith.constant dense<0.000000e+00> : vector<8x8xf32>
    %80 = tpu.matmul %77, %78, %cst_41 {dimension_numbers = #tpu.dot_dimension_numbers<[1], [1], [0], [0], [0, 0, 1, 0], [], []>} : vector<8x32xbf16>, vector<8x32xbf16>, vector<8x8xf32> -> vector<8x8xf32>
    %cst_42 = arith.constant -1.000000e+30 : f32
    %81 = vector.broadcast %cst_42 : f32 to vector<8x8xf32>
    %82 = arith.select %40, %80, %81 : vector<8x8xi1>, vector<8x8xf32>
    %cst_43 = arith.constant dense<0xFF800000> : vector<8xf32>
    %83 = vector.multi_reduction <maximumf>, %82, %cst_43 [1] : vector<8x8xf32> to vector<8xf32>
    %84 = vector.shape_cast %83 : vector<8xf32> to vector<8x1xf32>
    %85 = vector.broadcast %84 : vector<8x1xf32> to vector<8x8xf32>
    %86 = arith.subf %82, %85 : vector<8x8xf32>
    %87 = math.exp %86 : vector<8x8xf32>
    %cst_44 = arith.constant dense<0.000000e+00> : vector<8xf32>
    %88 = vector.multi_reduction <add>, %87, %cst_44 [1] : vector<8x8xf32> to vector<8xf32>
    %89 = vector.shape_cast %88 : vector<8xf32> to vector<8x1xf32>
    %90 = tpu.reciprocal %89 {approx = true} : vector<8x1xf32> -> vector<8x1xf32>
    %91 = vector.broadcast %90 : vector<8x1xf32> to vector<8x8xf32>
    %92 = arith.mulf %87, %91 : vector<8x8xf32>
    %93 = arith.truncf %92 : vector<8x8xf32> to vector<8x8xbf16>
    %cst_45 = arith.constant dense<0.000000e+00> : vector<8x32xf32>
    %94 = tpu.matmul %93, %79, %cst_45 {dimension_numbers = #tpu.dot_dimension_numbers<[1], [0], [0], [1], [0, 0, 1, 1], [], []>} : vector<8x8xbf16>, vector<8x32xbf16>, vector<8x32xf32> -> vector<8x32xf32>
    %c0_46 = arith.constant 0 : index
    %c96 = arith.constant 96 : index
    %95 = vector.load %arg25[%c0_46, %c96] : memref<8x768xbf16, #tpu.memory_space<vmem>>, vector<8x32xbf16>
    %c0_47 = arith.constant 0 : index
    %c352 = arith.constant 352 : index
    %96 = vector.load %arg25[%c0_47, %c352] : memref<8x768xbf16, #tpu.memory_space<vmem>>, vector<8x32xbf16>
    %c0_48 = arith.constant 0 : index
    %c608 = arith.constant 608 : index
    %97 = vector.load %arg25[%c0_48, %c608] : memref<8x768xbf16, #tpu.memory_space<vmem>>, vector<8x32xbf16>
    %cst_49 = arith.constant dense<0.000000e+00> : vector<8x8xf32>
    %98 = tpu.matmul %95, %96, %cst_49 {dimension_numbers = #tpu.dot_dimension_numbers<[1], [1], [0], [0], [0, 0, 1, 0], [], []>} : vector<8x32xbf16>, vector<8x32xbf16>, vector<8x8xf32> -> vector<8x8xf32>
    %cst_50 = arith.constant -1.000000e+30 : f32
    %99 = vector.broadcast %cst_50 : f32 to vector<8x8xf32>
    %100 = arith.select %40, %98, %99 : vector<8x8xi1>, vector<8x8xf32>
    %cst_51 = arith.constant dense<0xFF800000> : vector<8xf32>
    %101 = vector.multi_reduction <maximumf>, %100, %cst_51 [1] : vector<8x8xf32> to vector<8xf32>
    %102 = vector.shape_cast %101 : vector<8xf32> to vector<8x1xf32>
    %103 = vector.broadcast %102 : vector<8x1xf32> to vector<8x8xf32>
    %104 = arith.subf %100, %103 : vector<8x8xf32>
    %105 = math.exp %104 : vector<8x8xf32>
    %cst_52 = arith.constant dense<0.000000e+00> : vector<8xf32>
    %106 = vector.multi_reduction <add>, %105, %cst_52 [1] : vector<8x8xf32> to vector<8xf32>
    %107 = vector.shape_cast %106 : vector<8xf32> to vector<8x1xf32>
    %108 = tpu.reciprocal %107 {approx = true} : vector<8x1xf32> -> vector<8x1xf32>
    %109 = vector.broadcast %108 : vector<8x1xf32> to vector<8x8xf32>
    %110 = arith.mulf %105, %109 : vector<8x8xf32>
    %111 = arith.truncf %110 : vector<8x8xf32> to vector<8x8xbf16>
    %cst_53 = arith.constant dense<0.000000e+00> : vector<8x32xf32>
    %112 = tpu.matmul %111, %97, %cst_53 {dimension_numbers = #tpu.dot_dimension_numbers<[1], [0], [0], [1], [0, 0, 1, 1], [], []>} : vector<8x8xbf16>, vector<8x32xbf16>, vector<8x32xf32> -> vector<8x32xf32>
    %c0_54 = arith.constant 0 : index
    %c128 = arith.constant 128 : index
    %113 = vector.load %arg25[%c0_54, %c128] : memref<8x768xbf16, #tpu.memory_space<vmem>>, vector<8x32xbf16>
    %c0_55 = arith.constant 0 : index
    %c384 = arith.constant 384 : index
    %114 = vector.load %arg25[%c0_55, %c384] : memref<8x768xbf16, #tpu.memory_space<vmem>>, vector<8x32xbf16>
    %c0_56 = arith.constant 0 : index
    %c640 = arith.constant 640 : index
    %115 = vector.load %arg25[%c0_56, %c640] : memref<8x768xbf16, #tpu.memory_space<vmem>>, vector<8x32xbf16>
    %cst_57 = arith.constant dense<0.000000e+00> : vector<8x8xf32>
    %116 = tpu.matmul %113, %114, %cst_57 {dimension_numbers = #tpu.dot_dimension_numbers<[1], [1], [0], [0], [0, 0, 1, 0], [], []>} : vector<8x32xbf16>, vector<8x32xbf16>, vector<8x8xf32> -> vector<8x8xf32>
    %cst_58 = arith.constant -1.000000e+30 : f32
    %117 = vector.broadcast %cst_58 : f32 to vector<8x8xf32>
    %118 = arith.select %40, %116, %117 : vector<8x8xi1>, vector<8x8xf32>
    %cst_59 = arith.constant dense<0xFF800000> : vector<8xf32>
    %119 = vector.multi_reduction <maximumf>, %118, %cst_59 [1] : vector<8x8xf32> to vector<8xf32>
    %120 = vector.shape_cast %119 : vector<8xf32> to vector<8x1xf32>
    %121 = vector.broadcast %120 : vector<8x1xf32> to vector<8x8xf32>
    %122 = arith.subf %118, %121 : vector<8x8xf32>
    %123 = math.exp %122 : vector<8x8xf32>
    %cst_60 = arith.constant dense<0.000000e+00> : vector<8xf32>
    %124 = vector.multi_reduction <add>, %123, %cst_60 [1] : vector<8x8xf32> to vector<8xf32>
    %125 = vector.shape_cast %124 : vector<8xf32> to vector<8x1xf32>
    %126 = tpu.reciprocal %125 {approx = true} : vector<8x1xf32> -> vector<8x1xf32>
    %127 = vector.broadcast %126 : vector<8x1xf32> to vector<8x8xf32>
    %128 = arith.mulf %123, %127 : vector<8x8xf32>
    %129 = arith.truncf %128 : vector<8x8xf32> to vector<8x8xbf16>
    %cst_61 = arith.constant dense<0.000000e+00> : vector<8x32xf32>
    %130 = tpu.matmul %129, %115, %cst_61 {dimension_numbers = #tpu.dot_dimension_numbers<[1], [0], [0], [1], [0, 0, 1, 1], [], []>} : vector<8x8xbf16>, vector<8x32xbf16>, vector<8x32xf32> -> vector<8x32xf32>
    %c0_62 = arith.constant 0 : index
    %c160 = arith.constant 160 : index
    %131 = vector.load %arg25[%c0_62, %c160] : memref<8x768xbf16, #tpu.memory_space<vmem>>, vector<8x32xbf16>
    %c0_63 = arith.constant 0 : index
    %c416 = arith.constant 416 : index
    %132 = vector.load %arg25[%c0_63, %c416] : memref<8x768xbf16, #tpu.memory_space<vmem>>, vector<8x32xbf16>
    %c0_64 = arith.constant 0 : index
    %c672 = arith.constant 672 : index
    %133 = vector.load %arg25[%c0_64, %c672] : memref<8x768xbf16, #tpu.memory_space<vmem>>, vector<8x32xbf16>
    %cst_65 = arith.constant dense<0.000000e+00> : vector<8x8xf32>
    %134 = tpu.matmul %131, %132, %cst_65 {dimension_numbers = #tpu.dot_dimension_numbers<[1], [1], [0], [0], [0, 0, 1, 0], [], []>} : vector<8x32xbf16>, vector<8x32xbf16>, vector<8x8xf32> -> vector<8x8xf32>
    %cst_66 = arith.constant -1.000000e+30 : f32
    %135 = vector.broadcast %cst_66 : f32 to vector<8x8xf32>
    %136 = arith.select %40, %134, %135 : vector<8x8xi1>, vector<8x8xf32>
    %cst_67 = arith.constant dense<0xFF800000> : vector<8xf32>
    %137 = vector.multi_reduction <maximumf>, %136, %cst_67 [1] : vector<8x8xf32> to vector<8xf32>
    %138 = vector.shape_cast %137 : vector<8xf32> to vector<8x1xf32>
    %139 = vector.broadcast %138 : vector<8x1xf32> to vector<8x8xf32>
    %140 = arith.subf %136, %139 : vector<8x8xf32>
    %141 = math.exp %140 : vector<8x8xf32>
    %cst_68 = arith.constant dense<0.000000e+00> : vector<8xf32>
    %142 = vector.multi_reduction <add>, %141, %cst_68 [1] : vector<8x8xf32> to vector<8xf32>
    %143 = vector.shape_cast %142 : vector<8xf32> to vector<8x1xf32>
    %144 = tpu.reciprocal %143 {approx = true} : vector<8x1xf32> -> vector<8x1xf32>
    %145 = vector.broadcast %144 : vector<8x1xf32> to vector<8x8xf32>
    %146 = arith.mulf %141, %145 : vector<8x8xf32>
    %147 = arith.truncf %146 : vector<8x8xf32> to vector<8x8xbf16>
    %cst_69 = arith.constant dense<0.000000e+00> : vector<8x32xf32>
    %148 = tpu.matmul %147, %133, %cst_69 {dimension_numbers = #tpu.dot_dimension_numbers<[1], [0], [0], [1], [0, 0, 1, 1], [], []>} : vector<8x8xbf16>, vector<8x32xbf16>, vector<8x32xf32> -> vector<8x32xf32>
    %c0_70 = arith.constant 0 : index
    %c192 = arith.constant 192 : index
    %149 = vector.load %arg25[%c0_70, %c192] : memref<8x768xbf16, #tpu.memory_space<vmem>>, vector<8x32xbf16>
    %c0_71 = arith.constant 0 : index
    %c448 = arith.constant 448 : index
    %150 = vector.load %arg25[%c0_71, %c448] : memref<8x768xbf16, #tpu.memory_space<vmem>>, vector<8x32xbf16>
    %c0_72 = arith.constant 0 : index
    %c704 = arith.constant 704 : index
    %151 = vector.load %arg25[%c0_72, %c704] : memref<8x768xbf16, #tpu.memory_space<vmem>>, vector<8x32xbf16>
    %cst_73 = arith.constant dense<0.000000e+00> : vector<8x8xf32>
    %152 = tpu.matmul %149, %150, %cst_73 {dimension_numbers = #tpu.dot_dimension_numbers<[1], [1], [0], [0], [0, 0, 1, 0], [], []>} : vector<8x32xbf16>, vector<8x32xbf16>, vector<8x8xf32> -> vector<8x8xf32>
    %cst_74 = arith.constant -1.000000e+30 : f32
    %153 = vector.broadcast %cst_74 : f32 to vector<8x8xf32>
    %154 = arith.select %40, %152, %153 : vector<8x8xi1>, vector<8x8xf32>
    %cst_75 = arith.constant dense<0xFF800000> : vector<8xf32>
    %155 = vector.multi_reduction <maximumf>, %154, %cst_75 [1] : vector<8x8xf32> to vector<8xf32>
    %156 = vector.shape_cast %155 : vector<8xf32> to vector<8x1xf32>
    %157 = vector.broadcast %156 : vector<8x1xf32> to vector<8x8xf32>
    %158 = arith.subf %154, %157 : vector<8x8xf32>
    %159 = math.exp %158 : vector<8x8xf32>
    %cst_76 = arith.constant dense<0.000000e+00> : vector<8xf32>
    %160 = vector.multi_reduction <add>, %159, %cst_76 [1] : vector<8x8xf32> to vector<8xf32>
    %161 = vector.shape_cast %160 : vector<8xf32> to vector<8x1xf32>
    %162 = tpu.reciprocal %161 {approx = true} : vector<8x1xf32> -> vector<8x1xf32>
    %163 = vector.broadcast %162 : vector<8x1xf32> to vector<8x8xf32>
    %164 = arith.mulf %159, %163 : vector<8x8xf32>
    %165 = arith.truncf %164 : vector<8x8xf32> to vector<8x8xbf16>
    %cst_77 = arith.constant dense<0.000000e+00> : vector<8x32xf32>
    %166 = tpu.matmul %165, %151, %cst_77 {dimension_numbers = #tpu.dot_dimension_numbers<[1], [0], [0], [1], [0, 0, 1, 1], [], []>} : vector<8x8xbf16>, vector<8x32xbf16>, vector<8x32xf32> -> vector<8x32xf32>
    %c0_78 = arith.constant 0 : index
    %c224 = arith.constant 224 : index
    %167 = vector.load %arg25[%c0_78, %c224] : memref<8x768xbf16, #tpu.memory_space<vmem>>, vector<8x32xbf16>
    %c0_79 = arith.constant 0 : index
    %c480 = arith.constant 480 : index
    %168 = vector.load %arg25[%c0_79, %c480] : memref<8x768xbf16, #tpu.memory_space<vmem>>, vector<8x32xbf16>
    %c0_80 = arith.constant 0 : index
    %c736 = arith.constant 736 : index
    %169 = vector.load %arg25[%c0_80, %c736] : memref<8x768xbf16, #tpu.memory_space<vmem>>, vector<8x32xbf16>
    %cst_81 = arith.constant dense<0.000000e+00> : vector<8x8xf32>
    %170 = tpu.matmul %167, %168, %cst_81 {dimension_numbers = #tpu.dot_dimension_numbers<[1], [1], [0], [0], [0, 0, 1, 0], [], []>} : vector<8x32xbf16>, vector<8x32xbf16>, vector<8x8xf32> -> vector<8x8xf32>
    %cst_82 = arith.constant -1.000000e+30 : f32
    %171 = vector.broadcast %cst_82 : f32 to vector<8x8xf32>
    %172 = arith.select %40, %170, %171 : vector<8x8xi1>, vector<8x8xf32>
    %cst_83 = arith.constant dense<0xFF800000> : vector<8xf32>
    %173 = vector.multi_reduction <maximumf>, %172, %cst_83 [1] : vector<8x8xf32> to vector<8xf32>
    %174 = vector.shape_cast %173 : vector<8xf32> to vector<8x1xf32>
    %175 = vector.broadcast %174 : vector<8x1xf32> to vector<8x8xf32>
    %176 = arith.subf %172, %175 : vector<8x8xf32>
    %177 = math.exp %176 : vector<8x8xf32>
    %cst_84 = arith.constant dense<0.000000e+00> : vector<8xf32>
    %178 = vector.multi_reduction <add>, %177, %cst_84 [1] : vector<8x8xf32> to vector<8xf32>
    %179 = vector.shape_cast %178 : vector<8xf32> to vector<8x1xf32>
    %180 = tpu.reciprocal %179 {approx = true} : vector<8x1xf32> -> vector<8x1xf32>
    %181 = vector.broadcast %180 : vector<8x1xf32> to vector<8x8xf32>
    %182 = arith.mulf %177, %181 : vector<8x8xf32>
    %183 = arith.truncf %182 : vector<8x8xf32> to vector<8x8xbf16>
    %cst_85 = arith.constant dense<0.000000e+00> : vector<8x32xf32>
    %184 = tpu.matmul %183, %169, %cst_85 {dimension_numbers = #tpu.dot_dimension_numbers<[1], [0], [0], [1], [0, 0, 1, 1], [], []>} : vector<8x8xbf16>, vector<8x32xbf16>, vector<8x32xf32> -> vector<8x32xf32>
    %185 = tpu.concatenate %58, %76, %94, %112, %130, %148, %166, %184 in 1 : vector<8x32xf32>, vector<8x32xf32>, vector<8x32xf32>, vector<8x32xf32>, vector<8x32xf32>, vector<8x32xf32>, vector<8x32xf32>, vector<8x32xf32> -> vector<8x256xf32>
    %c0_86 = arith.constant 0 : index
    %c0_87 = arith.constant 0 : index
    %c0_88 = arith.constant 0 : index
    %186 = vector.load %arg11[%c0_86, %c0_87, %c0_88] : memref<1x256x256xbf16, #tpu.memory_space<vmem>>, vector<1x256x256xbf16>
    %187 = vector.shape_cast %186 : vector<1x256x256xbf16> to vector<256x256xbf16>
    %188 = arith.truncf %185 : vector<8x256xf32> to vector<8x256xbf16>
    %cst_89 = arith.constant dense<0.000000e+00> : vector<8x256xf32>
    %189 = tpu.matmul %188, %187, %cst_89 {dimension_numbers = #tpu.dot_dimension_numbers<[1], [0], [0], [1], [0, 0, 1, 1], [], []>} : vector<8x256xbf16>, vector<256x256xbf16>, vector<8x256xf32> -> vector<8x256xf32>
    %190 = arith.addf %3, %189 : vector<8x256xf32>
    %c0_90 = arith.constant 0 : index
    %c0_91 = arith.constant 0 : index
    %c0_92 = arith.constant 0 : index
    %191 = vector.load %arg12[%c0_90, %c0_91, %c0_92] : memref<1x1x256xf32, #tpu.memory_space<vmem>>, vector<1x1x256xf32>
    %192 = vector.shape_cast %191 : vector<1x1x256xf32> to vector<1x256xf32>
    %193 = vector.broadcast %192 : vector<1x256xf32> to vector<8x256xf32>
    %194 = arith.addf %190, %193 : vector<8x256xf32>
    %c0_93 = arith.constant 0 : index
    %c0_94 = arith.constant 0 : index
    %c0_95 = arith.constant 0 : index
    %195 = vector.load %arg13[%c0_93, %c0_94, %c0_95] : memref<1x1x256xf32, #tpu.memory_space<vmem>>, vector<1x1x256xf32>
    %196 = vector.shape_cast %195 : vector<1x1x256xf32> to vector<1x256xf32>
    %c0_96 = arith.constant 0 : index
    %c0_97 = arith.constant 0 : index
    %c0_98 = arith.constant 0 : index
    %197 = vector.load %arg14[%c0_96, %c0_97, %c0_98] : memref<1x1x256xf32, #tpu.memory_space<vmem>>, vector<1x1x256xf32>
    %198 = vector.shape_cast %197 : vector<1x1x256xf32> to vector<1x256xf32>
    %cst_99 = arith.constant dense<0.000000e+00> : vector<8xf32>
    %199 = vector.multi_reduction <add>, %194, %cst_99 [1] : vector<8x256xf32> to vector<8xf32>
    %200 = vector.shape_cast %199 : vector<8xf32> to vector<8x1xf32>
    %cst_100 = arith.constant 2.560000e+02 : f32
    %201 = vector.broadcast %cst_100 : f32 to vector<8x1xf32>
    %202 = arith.divf %200, %201 : vector<8x1xf32>
    %203 = vector.broadcast %202 : vector<8x1xf32> to vector<8x256xf32>
    %204 = arith.subf %194, %203 : vector<8x256xf32>
    %205 = arith.mulf %204, %204 : vector<8x256xf32>
    %cst_101 = arith.constant dense<0.000000e+00> : vector<8xf32>
    %206 = vector.multi_reduction <add>, %205, %cst_101 [1] : vector<8x256xf32> to vector<8xf32>
    %207 = vector.shape_cast %206 : vector<8xf32> to vector<8x1xf32>
    %cst_102 = arith.constant 2.560000e+02 : f32
    %208 = vector.broadcast %cst_102 : f32 to vector<8x1xf32>
    %209 = arith.divf %207, %208 : vector<8x1xf32>
    %cst_103 = arith.constant 9.99999997E-7 : f32
    %210 = vector.broadcast %cst_103 : f32 to vector<8x1xf32>
    %211 = arith.addf %209, %210 : vector<8x1xf32>
    %212 = math.rsqrt %211 : vector<8x1xf32>
    %213 = vector.broadcast %212 : vector<8x1xf32> to vector<8x256xf32>
    %214 = arith.mulf %204, %213 : vector<8x256xf32>
    %215 = vector.broadcast %196 : vector<1x256xf32> to vector<8x256xf32>
    %216 = arith.mulf %214, %215 : vector<8x256xf32>
    %217 = vector.broadcast %198 : vector<1x256xf32> to vector<8x256xf32>
    %218 = arith.addf %216, %217 : vector<8x256xf32>
    %c0_104 = arith.constant 0 : index
    %c0_105 = arith.constant 0 : index
    %c0_106 = arith.constant 0 : index
    %219 = vector.load %arg15[%c0_104, %c0_105, %c0_106] : memref<1x256x1024xbf16, #tpu.memory_space<vmem>>, vector<1x256x1024xbf16>
    %220 = vector.shape_cast %219 : vector<1x256x1024xbf16> to vector<256x1024xbf16>
    %221 = arith.truncf %218 : vector<8x256xf32> to vector<8x256xbf16>
    %cst_107 = arith.constant dense<0.000000e+00> : vector<8x1024xf32>
    %222 = tpu.matmul %221, %220, %cst_107 {dimension_numbers = #tpu.dot_dimension_numbers<[1], [0], [0], [1], [0, 0, 1, 1], [], []>} : vector<8x256xbf16>, vector<256x1024xbf16>, vector<8x1024xf32> -> vector<8x1024xf32>
    %c0_108 = arith.constant 0 : index
    %c0_109 = arith.constant 0 : index
    %c0_110 = arith.constant 0 : index
    %223 = vector.load %arg16[%c0_108, %c0_109, %c0_110] : memref<1x1x1024xf32, #tpu.memory_space<vmem>>, vector<1x1x1024xf32>
    %224 = vector.shape_cast %223 : vector<1x1x1024xf32> to vector<1x1024xf32>
    %225 = vector.broadcast %224 : vector<1x1024xf32> to vector<8x1024xf32>
    %226 = arith.addf %222, %225 : vector<8x1024xf32>
    %cst_111 = arith.constant 5.000000e-01 : f32
    %227 = vector.broadcast %cst_111 : f32 to vector<8x1024xf32>
    %228 = arith.mulf %227, %226 : vector<8x1024xf32>
    %cst_112 = arith.constant 0.707106769 : f32
    %229 = vector.broadcast %cst_112 : f32 to vector<8x1024xf32>
    %230 = arith.mulf %226, %229 : vector<8x1024xf32>
    %231 = math.erf %230 : vector<8x1024xf32>
    %cst_113 = arith.constant 1.000000e+00 : f32
    %232 = vector.broadcast %cst_113 : f32 to vector<8x1024xf32>
    %233 = arith.addf %232, %231 : vector<8x1024xf32>
    %234 = arith.mulf %228, %233 : vector<8x1024xf32>
    %c0_114 = arith.constant 0 : index
    %c0_115 = arith.constant 0 : index
    %c0_116 = arith.constant 0 : index
    %235 = vector.load %arg17[%c0_114, %c0_115, %c0_116] : memref<1x1024x256xbf16, #tpu.memory_space<vmem>>, vector<1x1024x256xbf16>
    %236 = vector.shape_cast %235 : vector<1x1024x256xbf16> to vector<1024x256xbf16>
    %237 = arith.truncf %234 : vector<8x1024xf32> to vector<8x1024xbf16>
    %cst_117 = arith.constant dense<0.000000e+00> : vector<8x256xf32>
    %238 = tpu.matmul %237, %236, %cst_117 {dimension_numbers = #tpu.dot_dimension_numbers<[1], [0], [0], [1], [0, 0, 1, 1], [], []>} : vector<8x1024xbf16>, vector<1024x256xbf16>, vector<8x256xf32> -> vector<8x256xf32>
    %239 = arith.addf %194, %238 : vector<8x256xf32>
    %c0_118 = arith.constant 0 : index
    %c0_119 = arith.constant 0 : index
    %c0_120 = arith.constant 0 : index
    %240 = vector.load %arg18[%c0_118, %c0_119, %c0_120] : memref<1x1x256xf32, #tpu.memory_space<vmem>>, vector<1x1x256xf32>
    %241 = vector.shape_cast %240 : vector<1x1x256xf32> to vector<1x256xf32>
    %242 = vector.broadcast %241 : vector<1x256xf32> to vector<8x256xf32>
    %243 = arith.addf %239, %242 : vector<8x256xf32>
    %c0_121 = arith.constant 0 : index
    %c0_122 = arith.constant 0 : index
    %244 = vector.load %arg24[%c0_121, %c0_122] : memref<8x256xf32, #tpu.memory_space<vmem>>, vector<8x256xf32>
    tpu.vector_store %arg24[%c0_121, %c0_122], %243 {strides = array<i32>} : memref<8x256xf32, #tpu.memory_space<vmem>>, vector<8x256xf32>,
    %c1_i32 = arith.constant 1 : i32
    %245 = arith.cmpi eq, %arg1, %c1_i32 : i32
    %246 = arith.extui %245 : i1 to i32
    %c0_i32_123 = arith.constant 0 : i32
    %247 = arith.cmpi ne, %246, %c0_i32_123 : i32
    scf.if %247 {
      %248 = vector.extract_strided_slice %243 {offsets = [0, 0], sizes = [1, 256], strides = [1, 1]} : vector<8x256xf32> to vector<1x256xf32>
      %c0_124 = arith.constant 0 : index
      %c0_125 = arith.constant 0 : index
      %249 = vector.load %arg19[%c0_124, %c0_125] : memref<1x256xf32, #tpu.memory_space<vmem>>, vector<1x256xf32>
      %c0_126 = arith.constant 0 : index
      %c0_127 = arith.constant 0 : index
      %250 = vector.load %arg20[%c0_126, %c0_127] : memref<1x256xf32, #tpu.memory_space<vmem>>, vector<1x256xf32>
      %cst_128 = arith.constant dense<0.000000e+00> : vector<1xf32>
      %251 = vector.multi_reduction <add>, %248, %cst_128 [1] : vector<1x256xf32> to vector<1xf32>
      %252 = vector.shape_cast %251 : vector<1xf32> to vector<1x1xf32>
      %cst_129 = arith.constant 2.560000e+02 : f32
      %253 = vector.broadcast %cst_129 : f32 to vector<1x1xf32>
      %254 = arith.divf %252, %253 : vector<1x1xf32>
      %255 = vector.broadcast %254 : vector<1x1xf32> to vector<1x256xf32>
      %256 = arith.subf %248, %255 : vector<1x256xf32>
      %257 = arith.mulf %256, %256 : vector<1x256xf32>
      %cst_130 = arith.constant dense<0.000000e+00> : vector<1xf32>
      %258 = vector.multi_reduction <add>, %257, %cst_130 [1] : vector<1x256xf32> to vector<1xf32>
      %259 = vector.shape_cast %258 : vector<1xf32> to vector<1x1xf32>
      %cst_131 = arith.constant 2.560000e+02 : f32
      %260 = vector.broadcast %cst_131 : f32 to vector<1x1xf32>
      %261 = arith.divf %259, %260 : vector<1x1xf32>
      %cst_132 = arith.constant 9.99999997E-7 : f32
      %262 = vector.broadcast %cst_132 : f32 to vector<1x1xf32>
      %263 = arith.addf %261, %262 : vector<1x1xf32>
      %264 = math.rsqrt %263 : vector<1x1xf32>
      %265 = vector.broadcast %264 : vector<1x1xf32> to vector<1x256xf32>
      %266 = arith.mulf %256, %265 : vector<1x256xf32>
      %267 = arith.mulf %266, %249 : vector<1x256xf32>
      %268 = arith.addf %267, %250 : vector<1x256xf32>
      %c0_133 = arith.constant 0 : index
      %c0_134 = arith.constant 0 : index
      %269 = vector.load %arg21[%c0_133, %c0_134] : memref<256x128xbf16, #tpu.memory_space<vmem>>, vector<256x128xbf16>
      %270 = arith.truncf %268 : vector<1x256xf32> to vector<1x256xbf16>
      %cst_135 = arith.constant dense<0.000000e+00> : vector<1x128xf32>
      %271 = tpu.matmul %270, %269, %cst_135 {dimension_numbers = #tpu.dot_dimension_numbers<[1], [0], [0], [1], [0, 0, 1, 1], [], []>} : vector<1x256xbf16>, vector<256x128xbf16>, vector<1x128xf32> -> vector<1x128xf32>
      %c0_136 = arith.constant 0 : index
      %c0_137 = arith.constant 0 : index
      %272 = vector.load %arg22[%c0_136, %c0_137] : memref<1x128xf32, #tpu.memory_space<vmem>>, vector<1x128xf32>
      %273 = arith.addf %271, %272 : vector<1x128xf32>
      %c0_138 = arith.constant 0 : index
      %c0_139 = arith.constant 0 : index
      %c0_140 = arith.constant 0 : index
      %274 = vector.load %arg23[%c0_138, %c0_139, %c0_140] : memref<1x1x128xf32, #tpu.memory_space<vmem>>, vector<1x1x128xf32>
      %275 = vector.shape_cast %274 : vector<1x1x128xf32> to vector<1x128xf32>
      %276 = vector.shape_cast %273 : vector<1x128xf32> to vector<1x1x128xf32>
      tpu.vector_store %arg23[%c0_138, %c0_139, %c0_140], %276 {strides = array<i32>} : memref<1x1x128xf32, #tpu.memory_space<vmem>>, vector<1x1x128xf32>,
    } else {
    }
    return
  }
  func.func @transform_0(%arg0: i32, %arg1: i32) -> (i32, i32, i32) {
    %c0_i32 = arith.constant 0 : i32
    %c0_i32_0 = arith.constant 0 : i32
    %c0_i32_1 = arith.constant 0 : i32
    return %arg0, %c0_i32, %c0_i32_0 : i32, i32, i32
  }
  func.func @transform_1(%arg0: i32, %arg1: i32) -> (i32, i32) {
    %c0_i32 = arith.constant 0 : i32
    %c0_i32_0 = arith.constant 0 : i32
    %c0_i32_1 = arith.constant 0 : i32
    return %c0_i32, %c0_i32_0 : i32, i32
  }
  func.func @transform_2(%arg0: i32, %arg1: i32) -> (i32, i32, i32) {
    %c0_i32 = arith.constant 0 : i32
    %c0_i32_0 = arith.constant 0 : i32
    %c0_i32_1 = arith.constant 0 : i32
    %c0_i32_2 = arith.constant 0 : i32
    return %c0_i32, %c0_i32_0, %c0_i32_1 : i32, i32, i32
  }
  func.func @transform_3(%arg0: i32, %arg1: i32) -> (i32, i32) {
    %c0_i32 = arith.constant 0 : i32
    %c0_i32_0 = arith.constant 0 : i32
    %c0_i32_1 = arith.constant 0 : i32
    return %c0_i32, %c0_i32_0 : i32, i32
  }
  func.func @transform_4(%arg0: i32, %arg1: i32) -> (i32, i32) {
    %c0_i32 = arith.constant 0 : i32
    %c0_i32_0 = arith.constant 0 : i32
    %c0_i32_1 = arith.constant 0 : i32
    return %c0_i32, %c0_i32_0 : i32, i32
  }
  func.func @transform_5(%arg0: i32, %arg1: i32) -> (i32, i32, i32) {
    %c0_i32 = arith.constant 0 : i32
    %c0_i32_0 = arith.constant 0 : i32
    %c0_i32_1 = arith.constant 0 : i32
    return %arg1, %c0_i32, %c0_i32_0 : i32, i32, i32
  }
  func.func @transform_6(%arg0: i32, %arg1: i32) -> (i32, i32, i32) {
    %c0_i32 = arith.constant 0 : i32
    %c0_i32_0 = arith.constant 0 : i32
    %c0_i32_1 = arith.constant 0 : i32
    return %arg1, %c0_i32, %c0_i32_0 : i32, i32, i32
  }
  func.func @transform_7(%arg0: i32, %arg1: i32) -> (i32, i32, i32) {
    %c0_i32 = arith.constant 0 : i32
    %c0_i32_0 = arith.constant 0 : i32
    %c0_i32_1 = arith.constant 0 : i32
    return %arg1, %c0_i32, %c0_i32_0 : i32, i32, i32
  }
  func.func @transform_8(%arg0: i32, %arg1: i32) -> (i32, i32, i32) {
    %c0_i32 = arith.constant 0 : i32
    %c0_i32_0 = arith.constant 0 : i32
    %c0_i32_1 = arith.constant 0 : i32
    return %arg1, %c0_i32, %c0_i32_0 : i32, i32, i32
  }
  func.func @transform_9(%arg0: i32, %arg1: i32) -> (i32, i32, i32) {
    %c0_i32 = arith.constant 0 : i32
    %c0_i32_0 = arith.constant 0 : i32
    %c0_i32_1 = arith.constant 0 : i32
    return %arg1, %c0_i32, %c0_i32_0 : i32, i32, i32
  }
  func.func @transform_10(%arg0: i32, %arg1: i32) -> (i32, i32, i32) {
    %c0_i32 = arith.constant 0 : i32
    %c0_i32_0 = arith.constant 0 : i32
    %c0_i32_1 = arith.constant 0 : i32
    return %arg1, %c0_i32, %c0_i32_0 : i32, i32, i32
  }
  func.func @transform_11(%arg0: i32, %arg1: i32) -> (i32, i32, i32) {
    %c0_i32 = arith.constant 0 : i32
    %c0_i32_0 = arith.constant 0 : i32
    %c0_i32_1 = arith.constant 0 : i32
    return %arg1, %c0_i32, %c0_i32_0 : i32, i32, i32
  }
  func.func @transform_12(%arg0: i32, %arg1: i32) -> (i32, i32, i32) {
    %c0_i32 = arith.constant 0 : i32
    %c0_i32_0 = arith.constant 0 : i32
    %c0_i32_1 = arith.constant 0 : i32
    return %arg1, %c0_i32, %c0_i32_0 : i32, i32, i32
  }
  func.func @transform_13(%arg0: i32, %arg1: i32) -> (i32, i32, i32) {
    %c0_i32 = arith.constant 0 : i32
    %c0_i32_0 = arith.constant 0 : i32
    %c0_i32_1 = arith.constant 0 : i32
    return %arg1, %c0_i32, %c0_i32_0 : i32, i32, i32
  }
  func.func @transform_14(%arg0: i32, %arg1: i32) -> (i32, i32, i32) {
    %c0_i32 = arith.constant 0 : i32
    %c0_i32_0 = arith.constant 0 : i32
    %c0_i32_1 = arith.constant 0 : i32
    return %arg1, %c0_i32, %c0_i32_0 : i32, i32, i32
  }
  func.func @transform_15(%arg0: i32, %arg1: i32) -> (i32, i32, i32) {
    %c0_i32 = arith.constant 0 : i32
    %c0_i32_0 = arith.constant 0 : i32
    %c0_i32_1 = arith.constant 0 : i32
    return %arg1, %c0_i32, %c0_i32_0 : i32, i32, i32
  }
  func.func @transform_16(%arg0: i32, %arg1: i32) -> (i32, i32, i32) {
    %c0_i32 = arith.constant 0 : i32
    %c0_i32_0 = arith.constant 0 : i32
    %c0_i32_1 = arith.constant 0 : i32
    return %arg1, %c0_i32, %c0_i32_0 : i32, i32, i32
  }
  func.func @transform_17(%arg0: i32, %arg1: i32) -> (i32, i32) {
    %c0_i32 = arith.constant 0 : i32
    %c0_i32_0 = arith.constant 0 : i32
    %c0_i32_1 = arith.constant 0 : i32
    return %c0_i32, %c0_i32_0 : i32, i32
  }
  func.func @transform_18(%arg0: i32, %arg1: i32) -> (i32, i32) {
    %c0_i32 = arith.constant 0 : i32
    %c0_i32_0 = arith.constant 0 : i32
    %c0_i32_1 = arith.constant 0 : i32
    return %c0_i32, %c0_i32_0 : i32, i32
  }
  func.func @transform_19(%arg0: i32, %arg1: i32) -> (i32, i32) {
    %c0_i32 = arith.constant 0 : i32
    %c0_i32_0 = arith.constant 0 : i32
    %c0_i32_1 = arith.constant 0 : i32
    return %c0_i32, %c0_i32_0 : i32, i32
  }
  func.func @transform_20(%arg0: i32, %arg1: i32) -> (i32, i32) {
    %c0_i32 = arith.constant 0 : i32
    %c0_i32_0 = arith.constant 0 : i32
    %c0_i32_1 = arith.constant 0 : i32
    return %c0_i32, %c0_i32_0 : i32, i32
  }
  func.func @transform_21(%arg0: i32, %arg1: i32) -> (i32, i32, i32) {
    %c0_i32 = arith.constant 0 : i32
    %c0_i32_0 = arith.constant 0 : i32
    %c0_i32_1 = arith.constant 0 : i32
    return %arg0, %c0_i32, %c0_i32_0 : i32, i32, i32
  }
}

</mosaic_0001>

<bundles_post_ra>
// kernel: encoder_forward.1
= control target key start
LH: loop header
LB: loop body
LE: loop exit
PB: predicated region body
PF: predicated region fallthrough
CT: control target
= control target key end

     0   :  { %s9211_s0 = inlined_call_operand.vmem [shape: f32[2,8,588], index: 0, kind: input, shape index: {}]   ;;  %s9212_s1 = inlined_call_operand.vmem [shape: bf16[588,256], index: 1, kind: input, shape index: {}]   ;;  %s9213_s2 = inlined_call_operand.vmem [shape: f32[1,8,256], index: 2, kind: input, shape index: {}]   ;;  %s9214_s3 = inlined_call_operand.vmem [shape: f32[1,256], index: 3, kind: input, shape index: {}]   ;;  %s9215_s4 = inlined_call_operand.vmem [shape: f32[1,256], index: 4, kind: input, shape index: {}]   ;;  %s9216_s5 = inlined_call_operand.vmem [shape: f32[2,1,256], index: 5, kind: input, shape index: {}]   ;;  %s9217_s6 = inlined_call_operand.vmem [shape: f32[2,1,256], index: 6, kind: input, shape index: {}]   ;;  %s9218_s7 = inlined_call_operand.hbm [shape: bf16[2,256,768], index: 7, kind: input, shape index: {}]   ;;  %s9219_s8 = inlined_call_operand.vmem [shape: f32[2,1,768], index: 8, kind: input, shape index: {}]   ;;  %s9220_s9 = inlined_call_operand.hbm [shape: bf16[2,256,256], index: 9, kind: input, shape index: {}]   ;;  %s9221_s10 = inlined_call_operand.vmem [shape: f32[2,1,256], index: 10, kind: input, shape index: {}]   ;;  %s9222_s11 = inlined_call_operand.vmem [shape: f32[2,1,256], index: 11, kind: input, shape index: {}]   ;;  %s9223_s12 = inlined_call_operand.vmem [shape: f32[2,1,256], index: 12, kind: input, shape index: {}]   ;;  %s9224_s13 = inlined_call_operand.vmem [shape: bf16[2,256,1024], index: 13, kind: input, shape index: {}]   ;;  %s9225_s14 = inlined_call_operand.vmem [shape: f32[2,1,1024], index: 14, kind: input, shape index: {}]   ;;  %s9226_s15 = inlined_call_operand.hbm [shape: bf16[2,1024,256], index: 15, kind: input, shape index: {}]   ;;  %s9227_s16 = inlined_call_operand.vmem [shape: f32[2,1,256], index: 16, kind: input, shape index: {}]   ;;  %s9228_s17 = inlined_call_operand.vmem [shape: f32[1,256], index: 17, kind: input, shape index: {}]   ;;  %s9229_s18 = inlined_call_operand.vmem [shape: f32[1,256], index: 18, kind: input, shape index: {}]   ;;  %s9230_s19 = inlined_call_operand.vmem [shape: bf16[256,128], index: 19, kind: input, shape index: {}]   ;;  %s9231_s20 = inlined_call_operand.vmem [shape: f32[1,128], index: 20, kind: input, shape index: {}]   ;;  %s9232_s21 = inlined_call_operand.hbm [shape: f32[2,1,128], index: 21, kind: output, shape index: {}]  }
   0x1   :  { %9255 = sst [smem:[#allocation28_spill]] %s9211_s0 }
   0x2   :  { %9256 = sst [smem:[#allocation29_spill]] %s9212_s1 }
   0x3   :  { %9257 = sst [smem:[#allocation30_spill]] %s9213_s2 }
   0x4   :  { %9258 = sst [smem:[#allocation31_spill]] %s9214_s3 }
   0x5   :  { %9259 = sst [smem:[#allocation32_spill]] %s9215_s4 }
   0x6   :  { %9260 = sst [smem:[#allocation33_spill]] %s9216_s5 }
   0x7   :  { %9261 = sst [smem:[#allocation34_spill]] %s9218_s7 }
   0x8   :  { %9262 = sst [smem:[#allocation35_spill]] %s9219_s8 }
   0x9   :  { %9263 = sst [smem:[#allocation36_spill]] %s9220_s9 }
   0xa   :  { %9264 = sst [smem:[#allocation37_spill]] %s9224_s13 }
   0xb   :  { %9265 = sst [smem:[#allocation38_spill]] %s9225_s14 }
   0xc   :  { %9266 = sst [smem:[#allocation39_spill]] %s9226_s15 }
   0xd   :  { %9267 = sst [smem:[#allocation40_spill]] %s9227_s16 }
   0xe   :  { %9268 = sst [smem:[#allocation41_spill]] %s9228_s17 }
   0xf   :  { %9269 = sst [smem:[#allocation42_spill]] %s9229_s18 }
  0x10   :  { %9270 = sst [smem:[#allocation43_spill]] %s9230_s19 }
  0x11   :  { %9271 = sst [smem:[#allocation44_spill]] %s9231_s20 }
  0x12   :  { %9272 = sst [smem:[#allocation45_spill]] %s9232_s21 }
  0x13   :  { %26 = vsyncpa [#allocation5], 0 }
  0x14   :  { %28 = vsyncpa [#allocation5 + $0x1], 0 }
  0x15   :  { %29 = vsyncpa [#allocation8], 0 }
  0x16   :  { %31 = vsyncpa [#allocation8 + $0x1], 0 }
  0x17   :  { %32 = vsyncpa [#allocation6], 0 }
  0x18   :  { %34 = vsyncpa [#allocation6 + $0x1], 0  ;;  %s7824_s2 = smov 0   ;;  %s7826_s25 = smov 0  }
  0x19   :  { %s7828_s26 = smov 0   ;;  %s7830_s27 = smov 0  }
  0x1a   :  { %s7832_s3 = smov 0   ;;  %s7834_s28 = smov 0  }
  0x1b   :  { %s7836_s29 = smov 0   ;;  %s7838_s0 = smov 0  }
  0x1c   :  { %s7840_s4 = smov 0   ;;  %s7842_s30 = smov 0  }
  0x1d   :  { %s7844_s5 = smov 0  }
  0x1e LB: > { %9273 = sst [smem:[#allocation14_spill]] %s7658_s2  ;;  %s7878_s22 = sadd.s32 4294967295, %s7698_s5   ;;  %s7698_s5 = sphi %s7844_s5, %s40_s5   ;;  %s7694_s30 = sphi %s7842_s30, %s9343_s30   ;;  %s7690_s4 = sphi %s7840_s4, %s9342_s4   ;;  %s7686_s0 = sphi %s7838_s0, %s9347_s0   ;;  %s7682_s29 = sphi %s7836_s29, %s9340_s29   ;;  %s7678_s28 = sphi %s7834_s28, %s9339_s28   ;;  %s7674_s3 = sphi %s7832_s3, %s9338_s3   ;;  %s7670_s27 = sphi %s7830_s27, %s9337_s27   ;;  %s7666_s26 = sphi %s7828_s26, %s9346_s26   ;;  %s7662_s25 = sphi %s7826_s25, %s9345_s25   ;;  %s7658_s2 = sphi %s7824_s2, %s9344_s2  }
  0x1f   : > { %9274 = sst [smem:[#allocation15_spill]] %s7666_s26  ;;  %s6072_s23 = sadd.s32 4294967294, %s7698_s5  }
  0x20   : > { %9275 = sst [smem:[#allocation16_spill]] %s7674_s3  ;;  %s49_s1 = sadd.s32 1, %s7690_s4 }
  0x21   : > { %9276 = sst [smem:[#allocation17_spill]] %s7678_s28  ;;  %s52_s24 = sadd.s32 1, %s7694_s30 }
  0x22   : > { %9277 = sst [smem:[#allocation18_spill]] %s7686_s0  ;;  %p50_p0 = scmp.ge.s32.totalorder %s49_s1, 2 }
  0x23   : > { %9278 = sst [smem:[#allocation19_spill]] %s7690_s4  ;;  %s221_s21 = sadd.s32 1, %s7678_s28 }
  0x24   : > { %9279 = sst [smem:[#allocation20_spill]] %s7694_s30  ;;  %p228_p1 = scmp.ne.s32.totalorder %s7678_s28, %s7674_s3 }
  0x25   : > { %9280 = sst [smem:[#allocation21_spill]] %s7698_s5  ;;  %p229_p2 = scmp.eq.s32.totalorder %s7698_s5, 0 }
  0x26   : > { %s9349_s1 = smov (%p50_p0, %s49_s1), 0  ;;  %s9351_s24 = smov (!%p50_p0, %s52_s24), %s7694_s30 }
  0x27   : > { %9281 = sst [smem:[#allocation22_spill]] %s9349_s1  ;;  %s218_s20 = ssub.s32 %s7690_s4, %s9349_s1 }
  0x28   : > { %p7892_p3 = por %p229_p2, %p228_p1  ;;  %p54_p4 = scmp.ge.s32.totalorder %s9351_s24, 2 }
  0x29   : > { %p219_p5 = scmp.eq.s32.totalorder %s218_s20, 0  ;;  %p234_p6 = scmp.ne.s32.totalorder %s7674_s3, %s7670_s27 }
  0x2a   : > { %p235_p7 = scmp.eq.s32.totalorder %s7878_s22, 0  ;;  %s9353_s24 = smov (%p54_p4, %s9351_s24), 0 }
  0x2b   : > { %9283 = sst [smem:[#allocation23_spill]] %s9353_s24  ;;  %s562_s19 = ssub.s32 %s7694_s30, %s9353_s24 }
  0x2c   : > { %s7901_s17 = scalar_select %p219_p5, %s7678_s28, %s221_s21  }
  0x2d   : > { %p7903_p8 = por %p235_p7, %p234_p6  ;;  %p563_p9 = scmp.eq.s32.totalorder %s562_s19, 0 }
  0x2e   : > { %9284 = sst [smem:[#allocation24_spill]] %s7901_s17  ;;  %s565_s16 = sadd.s32 1, %s7666_s26 }
  0x2f   : > { %s9285_s1 = scalar_select %p7903_p8, 1, 0 }
  0x30   : > { %p575_p10 = scmp.ne.s32.totalorder %s7666_s26, %s7662_s25  ;;  %p576_p11 = scmp.eq.s32.totalorder %s7878_s22, 3 }
  0x31   : > { %s7914_s20 = scalar_select %p563_p9, %s7666_s26, %s565_s16  }
  0x32   : > { %p7916_p12 = por %p576_p11, %p575_p10  ;;  %p581_p13 = scmp.ne.s32.totalorder %s7662_s25, %s7658_s2 }
  0x33   : > { %9286 = sst [smem:[#allocation25_spill]] %s7914_s20  ;;  %p582_p0 = scmp.eq.s32.totalorder %s6072_s23, 3 }
  0x34   : > { %s9287_s27 = scalar_select %p7916_p12, 1, 0 }
  0x35   : > { %p6792_p1 = scmp.lt.s32.totalorder %s7698_s5, 4  ;;  %s7924_s21 = sand.u32 1, %s7678_s28  }
  0x36   : > { %9288 = sst [smem:[#allocation26_spill]] %s9287_s27  ;;  %p7926_p2 = por %p582_p0, %p581_p13 }
  0x37   : > { %s676_s19 = sand.u32 1, %s7698_s5   ;;  %p7933_p4 = pnand %p6792_p1, %p7892_p3 }
  0x38   : > { %s9289_s17 = scalar_select %p7926_p2, 1, 0 }
  0x39   : > { %s6076_s16 = sshll.u32 %s7924_s21, 8  ;;  %s6601_s30 = sshll.u32 %s7690_s4, 12 }
  0x3a   : > { %9290 = sst [smem:[#allocation27_spill]] %s9289_s17  ;;  %s9292_s9 = sld [smem:[#allocation36_spill]] }
  0x3b   : > { %s680_s28 = scalar_lea.vmem [#allocation7], %s6076_s16  ;;  %s7947_s18 = scalar_lea.sflag [#allocation8], %s676_s19 }
  0x3c   : > { %s687_s17 = sshll.u32 %s680_s28, 4  ;;  %p7953_p6 = pneg %p7933_p4  ;;  %s7944_s17 = int_to_ptr.vmem [resolvable:$true] %s687_s17 }
  0x40   : > { %s7942_s23 = scalar_lea.hbm %s9292_s9, %s6601_s30  ;;  %s7487_s28 = scalar_lea.hbm %s9292_s9, 8192 }
  0x41   : > { %s7482_s2 = scalar_lea.hbm %s7942_s23, 4096  ;;  %p7488_p10 = scmp.lt.u32.totalorder %s7942_s23, %s9292_s9 }
  0x42   : > { %p7483_p5 = scmp.ne.s32.totalorder %s7942_s23, %s7482_s2  ;;  %p7489_p11 = scmp.lt.u32.totalorder %s7487_s28, %s7482_s2 }
  0x43   : > { %p7491_p0 = scmp.lt.u32.totalorder %s7482_s2, %s7942_s23 }
  0x44   : > { %p7485_p7 = pnand %p7953_p6, %p7483_p5  ;;  %p7490_p13 = por %p7489_p11, %p7488_p10 }
  0x46   : > { %p7486_p9 = pneg %p7485_p7  ;;  %p7492_p1 = por %p7491_p0, %p7490_p13 }
  0x48   : > { %p7493_p3 = pnand %p7492_p1, %p7486_p9 }
  0x4a   : > { %7496 = shalt.err (!%p7493_p3)
}
  0x4b   : > { %s7497_s19 = scalar_lea.vmem %s7944_s17, 4096  ;;  %s7700_s26 = smov [#allocation7]  }
  0x4c   : > { %p7498_p5 = scmp.ne.s32.totalorder %s7944_s17, %s7497_s19  ;;  %s7502_s30 = sshll.u32 %s7700_s26, 4  ;;  %s7503_s30 = int_to_ptr.vmem [resolvable:$false] %s7502_s30 }
  0x4d   : > { %s7504_s20 = scalar_lea.vmem %s7503_s30, 8192  ;;  %p7505_p12 = scmp.lt.s32.totalorder %s7944_s17, %s7503_s30 }
  0x4e   : > { %p7500_p7 = pnand %p7498_p5, %p7953_p6  ;;  %p7506_p8 = scmp.lt.s32.totalorder %s7504_s20, %s7497_s19 }
  0x50   : > { %p7501_p2 = pneg %p7500_p7  ;;  %p7507_p10 = por %p7506_p8, %p7505_p12 }
  0x52   : > { %p7508_p11 = pnand %p7507_p10, %p7501_p2 }
  0x54   : > { %7511 = shalt.err (!%p7508_p11)
}
  0x55   : > { %s9248_s2 = smov 128   ;;  %s9249_s28 = smov 8  }
  0x56   : > { %6784 = dma.hbm_to_vmem [thread:$0]  (!%p7933_p4), %s7942_s23, 4096, %s7944_s17, %s7947_s18, %s9248_s2, %s9248_s2, %s9249_s28  }
  0x57   : > { %p759_p8 = scmp.lt.s32.totalorder %s7698_s5, 5  ;;  %p9294_p12 = scmp.ge.s32.totalorder %s7698_s5, 1 }
  0x58   : > { %s6765_s19 = smul.u32 768, %s7924_s21  ;;  %s9296_s7 = sld [smem:[#allocation34_spill]] }
  0x59   : > { %p7983_p2 = pnand %p9294_p12, %p759_p8  ;;  %s6766_s26 = smul.u32 12288, %s7690_s4 }
  0x5a   : > { %s652_s14 = scalar_lea.vmem [#allocation4], %s6765_s19  ;;  %s6079_s17 = sshll.u32 %s7924_s21, 10 }
  0x5b   : > { %s9295_s16 = scalar_select %p7983_p2, 1, 0 }
  0x5c   : > { %s659_s13 = sshll.u32 %s652_s14, 4  ;;  %s649_s23 = scalar_lea.sflag [#allocation5], %s7924_s21  ;;  %s7994_s13 = int_to_ptr.vmem [resolvable:$true] %s659_s13 }
  0x5e   : > { %s7992_s9 = scalar_lea.hbm %s9296_s7, %s6766_s26  ;;  %s7517_s26 = scalar_lea.hbm %s9296_s7, 24576 }
  0x5f   : > { %s7512_s2 = scalar_lea.hbm %s7992_s9, 12288  ;;  %p7518_p0 = scmp.lt.u32.totalorder %s7992_s9, %s9296_s7 }
  0x60   : > { %p7513_p3 = scmp.ne.s32.totalorder %s7992_s9, %s7512_s2  ;;  %p7519_p1 = scmp.lt.u32.totalorder %s7517_s26, %s7512_s2 }
  0x61   : > { %p7521_p7 = scmp.lt.u32.totalorder %s7512_s2, %s7992_s9 }
  0x62   : > { %p7515_p9 = pnand %p7513_p3, %p7953_p6  ;;  %p7520_p5 = por %p7519_p1, %p7518_p0 }
  0x64   : > { %p7516_p13 = pneg %p7515_p9  ;;  %p7522_p10 = por %p7521_p7, %p7520_p5 }
  0x66   : > { %p7523_p11 = pnand %p7522_p10, %p7516_p13 }
  0x68   : > { %7526 = shalt.err (!%p7523_p11)
}
  0x69   : > { %s7527_s14 = scalar_lea.vmem %s7994_s13, 12288  ;;  %s7703_s5 = smov [#allocation4]  }
  0x6a   : > { %p7528_p8 = scmp.ne.s32.totalorder %s7994_s13, %s7527_s14  ;;  %s7532_s28 = sshll.u32 %s7703_s5, 4  ;;  %s7533_s28 = int_to_ptr.vmem [resolvable:$false] %s7532_s28 }
  0x6b   : > { %s7534_s19 = scalar_lea.vmem %s7533_s28, 24576  ;;  %p7535_p9 = scmp.lt.s32.totalorder %s7994_s13, %s7533_s28 }
  0x6c   : > { %p7530_p12 = pnand %p7528_p8, %p7953_p6  ;;  %p7536_p2 = scmp.lt.s32.totalorder %s7534_s19, %s7527_s14 }
  0x6e   : > { %p7531_p3 = pneg %p7530_p12  ;;  %p7537_p0 = por %p7536_p2, %p7535_p9 }
  0x70   : > { %p7538_p1 = pnand %p7537_p0, %p7531_p3 }
  0x72   : > { %7541 = shalt.err (!%p7538_p1)
}
  0x73   : > { %s7704_s2 = smov 384   ;;  %s7705_s26 = smov 24  }
  0x74   : > { %6781 = dma.hbm_to_vmem [thread:$0]  (!%p7933_p4), %s7992_s9, 12288, %s7994_s13, %s649_s23, %s7704_s2, %s7704_s2, %s7705_s26  }
  0x75   : > { %s6602_s30 = sshll.u32 %s7690_s4, 14  ;;  %s9297_s15 = sld [smem:[#allocation39_spill]] }
  0x76   : > { %s737_s28 = scalar_lea.vmem [#allocation9], %s6079_s17 }
  0x77   : > { %s744_s19 = sshll.u32 %s737_s28, 4  ;;  %s8029_s19 = int_to_ptr.vmem [resolvable:$true] %s744_s19 }
  0x7b   : > { %s8025_s14 = scalar_lea.hbm %s9297_s15, %s6602_s30  ;;  %s7547_s23 = scalar_lea.hbm %s9297_s15, 32768 }
  0x7c   : > { %s7542_s7 = scalar_lea.hbm %s8025_s14, 16384  ;;  %p7548_p7 = scmp.lt.u32.totalorder %s8025_s14, %s9297_s15 }
  0x7d   : > { %p7543_p2 = scmp.ne.s32.totalorder %s8025_s14, %s7542_s7  ;;  %p7549_p10 = scmp.lt.u32.totalorder %s7547_s23, %s7542_s7 }
  0x7e   : > { %p7551_p8 = scmp.lt.u32.totalorder %s7542_s7, %s8025_s14 }
  0x7f   : > { %p7545_p13 = pnand %p7543_p2, %p7953_p6  ;;  %p7550_p11 = por %p7549_p10, %p7548_p7 }
  0x81   : > { %p7546_p5 = pneg %p7545_p13  ;;  %p7552_p12 = por %p7551_p8, %p7550_p11 }
  0x83   : > { %p7553_p3 = pnand %p7552_p12, %p7546_p5 }
  0x85   : > { %7556 = shalt.err (!%p7553_p3)
}
  0x86   : > { %s7557_s21 = scalar_lea.vmem %s8029_s19, 16384  ;;  %s7706_s17 = smov [#allocation9]  }
  0x87   : > { %p7558_p9 = scmp.ne.s32.totalorder %s8029_s19, %s7557_s21  ;;  %s7562_s30 = sshll.u32 %s7706_s17, 4  ;;  %s7563_s30 = int_to_ptr.vmem [resolvable:$false] %s7562_s30 }
  0x88   : > { %s7564_s20 = scalar_lea.vmem %s7563_s30, 32768  ;;  %p7565_p2 = scmp.lt.s32.totalorder %s8029_s19, %s7563_s30 }
  0x89   : > { %p7560_p0 = pnand %p7558_p9, %p7953_p6  ;;  %p7566_p13 = scmp.lt.s32.totalorder %s7564_s20, %s7557_s21 }
  0x8b   : > { %p7561_p1 = pneg %p7560_p0  ;;  %p7567_p7 = por %p7566_p13, %p7565_p2 }
  0x8d   : > { %p7568_p10 = pnand %p7567_p7, %p7561_p1 }
  0x8f   : > { %7571 = shalt.err (!%p7568_p10)
}
  0x90   : > { %s9298_s7 = smov 8   ;;  %s9299_s5 = smov 128  }
  0x91   : > { %6787 = dma.hbm_to_vmem [thread:$0]  (!%p7933_p4), %s8025_s14, 16384, %s8029_s19, %s7947_s18, %s9299_s5, %s9299_s5, %s9298_s7  }
  0x92   : > { %p9300_p6 = scmp.ne.s32.totalorder %s9295_s16, 0 }
  0x93   : > { %s8059_s27 = sand.u32 (!%p9300_p6), 1, %s7674_s3   ;;  %p9301_p5 = scmp.ne.s32.totalorder (!%p9300_p6), %s9285_s1, 0 }
  0x94   : > { %763 = sbr.rel (%p9300_p6) target bundleno = 7596 (0x1dac), region = 104  ;;  %s766_s9 = scalar_lea.sflag (!%p9300_p6), [#allocation5], %s8059_s27 }
  0x95   : > { %s6767_s28 = smul.u32 (!%p9300_p6), 768, %s8059_s27 }
  0x97   : > { %s8063_s13 = scalar_lea.vmem (!%p9300_p6), [#allocation4], %s6767_s28 }
  0x9b   : > { %7645 = dma.done.wait (%p9301_p5), %s766_s9, 12288  }
  0x9c   : > { %7647 = vsyncadd (%p9301_p5), %s766_s9, 4294955008  ;;  %s774_s24 = sand.u32 1, %s7878_s22   ;;  %s6083_s18 = sshll.u32 %s8059_s27, 8 }
  0x9d   : > { %s775_s16 = scalar_lea.sflag [#allocation8], %s774_s24  ;;  %s8071_s14 = scalar_lea.vmem [#allocation7], %s6083_s18 }
  0x9e   : > { %7649 = dma.done.wait (%p9301_p5), %s775_s16, 20480  }
  0x9f   : > { %7651 = vsyncadd (%p9301_p5), %s775_s16, 4294946816  ;;  %s6084_s19 = sshll.u32 %s8059_s27, 10  ;;  %p897_p4 = scmp.lt.s32.totalorder %s7686_s0, 1 }
  0xa0   : > { %p902_p11 = scmp.lt.s32.totalorder %s7682_s29, 1  ;;  %s9302_s20 = sld [smem:[#allocation28_spill]] }
  0xa1   : > { %s898_s22 = scalar_select %p897_p4, %s7686_s0, 1 }
  0xa2   : > { %s903_s2 = scalar_select %p902_p11, %s7682_s29, 1 }
  0xa3   : > { %s6768_s26 = smul.u32 40, %s898_s22  ;;  %s9304_s8 = sld [smem:[#allocation35_spill]] }
  0xa4   : > { %s8083_s21 = sshll.u32 %s903_s2, 1  ;;  %s6769_s1 = smul.u32 6, %s903_s2 }
  0xa5   : > { %s925_s27 = scalar_lea.vmem %s9223_s12, %s8083_s21  ;;  %s6603_s28 = sshll.u32 %s903_s2, 10 }
  0xa6   : > { %s8088_s7 = scalar_lea.vmem %s9302_s20, %s6768_s26  ;;  %s9305_s16 = sld [smem:[#allocation37_spill]] }
  0xa7   : > { %s6093_s23 = sshll.u32 %s903_s2, 3  ;;  %s9307_s17 = sld [smem:[#allocation40_spill]] }
  0xa8   : > { %s8129_s30 = scalar_lea.vmem [#allocation9], %s6084_s19  ;;  %s9308_s20 = sand.u32 1, %s7662_s25  }
  0xa9   : > { %s8101_s15 = scalar_lea.vmem %s9304_s8, %s6769_s1  ;;  %s9306_s8 = sld [smem:[#allocation38_spill]] }
  0xaa   : > { %s8133_s5 = scalar_lea.vmem [#allocation10], %s9308_s20  ;;  %p6095_p8 = scmp.ne.s32.totalorder %s7682_s29, 0 }
  0xab   : > { %s9309_s2 = sld [smem:[#allocation29_spill]] (!%p6095_p8)  ;;  %v947_v40 = vld [vmem:[%s8088_s7 + $0x18] sm:$0xff] (!%p6095_p8)  ;;  %v945_v52 = vld [vmem:[%s8088_s7 + $0x8] sm:$0xff] (!%p6095_p8)  ;;  %vm1402_vm0 = vcmask (!%p6095_p8), 1045504   ;;  %vm1398_vm1 = vcmask (!%p6095_p8), 621568   ;;  %s9312_s20 = sld [smem:[#allocation31_spill]] (!%p6095_p8) }
  0xac   : > { %s8118_s9 = scalar_lea.vmem %s9305_s16, %s6603_s28  ;;  %943 = sbr.rel (%p6095_p8) target bundleno = 793 (0x319), region = 120  ;;  %v1026_v42 = vpack.c.bf16 (!%p6095_p8), %v947_v40, %v947_v40  ;;  %v1024_v54 = vpack.c.bf16 (!%p6095_p8), %v945_v52, %v945_v52 }
  0xad   : > { %s938_s26 = scalar_lea.vmem %s9307_s17, %s8083_s21 }
  0xae   : > { %1482 = vmatprep.mubr.bf16.mxu0 (!%p6095_p8), %v1026_v42  ;;  %1441 = vmatprep.mubr.bf16.mxu1 (!%p6095_p8), %v1024_v54 }
  0xaf   : > { %s8123_s3 = scalar_lea.vmem %s9306_s8, %s6093_s23  ;;  %s9311_s23 = sld [smem:[#allocation30_spill]] (!%p6095_p8) }
  0xb1   : > { %s9310_s24 = smov (!%p6095_p8), %s9309_s2  ;;  %v6892_v0 = vld [vmem:[%s9309_s2 + $0x104] ss:$8 sps:$4 sm:$0xff] (!%p6095_p8)   ;;  %s9313_s2 = sld [smem:[#allocation32_spill]] (!%p6095_p8) }
  0xb2   : > { %v6894_v1 = vld [vmem:[%s9310_s24 + $0x100] ss:$8 sps:$4 sm:$0xff] (!%p6095_p8)   ;;  %1450 = vmatprep.subr.bf16.mxu0 (!%p6095_p8), %v6892_v0  ;;  %v6895_v2 = vld [vmem:[%s9310_s24 + $0x114] ss:$8 sps:$4 sm:$0xff] (!%p6095_p8)   ;;  %v6897_v3 = vld [vmem:[%s9310_s24 + $0x110] ss:$8 sps:$4 sm:$0xff] (!%p6095_p8)  }
  0xb3   : > { %1451 = vmatpush1.bf16.msra.mxu0 %v6894_v1  ;;  %v6898_v4 = vld [vmem:[%s9310_s24 + $0x124] ss:$8 sps:$4 sm:$0xff]   ;;  %v6906_v6 = vld [vmem:[%s9310_s24] ss:$8 sps:$4 sm:$0xff]   ;;  %v6901_v8 = vld [vmem:[%s9310_s24 + $0x134] ss:$8 sps:$4 sm:$0xff]  }
  0xb4   : > { %1452 = vmatprep.subr.bf16.mxu0 %v6895_v2  ;;  %v6904_v5 = vld [vmem:[%s9310_s24 + $0x4] ss:$8 sps:$4 sm:$0xff]   ;;  %v6900_v7 = vld [vmem:[%s9310_s24 + $0x120] ss:$8 sps:$4 sm:$0xff]   ;;  %v6910_v9 = vld [vmem:[%s9310_s24 + $0x14] ss:$8 sps:$4 sm:$0xff]  }
  0xb5   : > { %1409 = vmatprep.subr.bf16.mxu1 %v6904_v5  ;;  %v6912_v10 = vld [vmem:[%s9310_s24 + $0x10] ss:$8 sps:$4 sm:$0xff]   ;;  %v6916_v12 = vld [vmem:[%s9310_s24 + $0x24] ss:$8 sps:$4 sm:$0xff]   ;;  %v6918_v14 = vld [vmem:[%s9310_s24 + $0x20] ss:$8 sps:$4 sm:$0xff]  }
  0xb6   : > { %1410 = vmatpush1.bf16.msra.mxu1 %v6906_v6  ;;  %v6903_v11 = vld [vmem:[%s9310_s24 + $0x130] ss:$8 sps:$4 sm:$0xff]   ;;  %v6907_v13 = vld [vmem:[%s9310_s24 + $0x144] ss:$8 sps:$4 sm:$0xff]   ;;  %v6922_v15 = vld [vmem:[%s9310_s24 + $0x34] ss:$8 sps:$4 sm:$0xff]  }
  0xb7   : > { %1453 = vmatpush1.bf16.msra.mxu0 %v6897_v3  ;;  %1411 = vmatprep.subr.bf16.mxu1 %v6910_v9  ;;  %v6909_v16 = vld [vmem:[%s9310_s24 + $0x140] ss:$8 sps:$4 sm:$0xff]   ;;  %v6913_v17 = vld [vmem:[%s9310_s24 + $0x154] ss:$8 sps:$4 sm:$0xff]   ;;  %v6924_v18 = vld [vmem:[%s9310_s24 + $0x30] ss:$8 sps:$4 sm:$0xff]  }
  0xb8   : > { %1454 = vmatprep.subr.bf16.mxu0 %v6898_v4  ;;  %v6928_v19 = vld [vmem:[%s9310_s24 + $0x44] ss:$8 sps:$4 sm:$0xff]   ;;  %v6915_v20 = vld [vmem:[%s9310_s24 + $0x150] ss:$8 sps:$4 sm:$0xff]   ;;  %v6930_v22 = vld [vmem:[%s9310_s24 + $0x40] ss:$8 sps:$4 sm:$0xff]  }
  0xb9   : > { %v6919_v21 = vld [vmem:[%s9310_s24 + $0x164] ss:$8 sps:$4 sm:$0xff]   ;;  %v6934_v23 = vld [vmem:[%s9310_s24 + $0x54] ss:$8 sps:$4 sm:$0xff]   ;;  %v6921_v24 = vld [vmem:[%s9310_s24 + $0x160] ss:$8 sps:$4 sm:$0xff]  }
  0xba   : > { %1412 = vmatpush1.bf16.msra.mxu1 %v6912_v10  ;;  %v6925_v25 = vld [vmem:[%s9310_s24 + $0x174] ss:$8 sps:$4 sm:$0xff]   ;;  %v6936_v26 = vld [vmem:[%s9310_s24 + $0x50] ss:$8 sps:$4 sm:$0xff]   ;;  %v6940_v27 = vld [vmem:[%s9310_s24 + $0x64] ss:$8 sps:$4 sm:$0xff]  }
  0xbb   : > { %1455 = vmatpush1.bf16.msra.mxu0 %v6900_v7  ;;  %1413 = vmatprep.subr.bf16.mxu1 %v6916_v12  ;;  %v6927_v28 = vld [vmem:[%s9310_s24 + $0x170] ss:$8 sps:$4 sm:$0xff]   ;;  %v6931_v29 = vld [vmem:[%s9310_s24 + $0x184] ss:$8 sps:$4 sm:$0xff]   ;;  %v6942_v30 = vld [vmem:[%s9310_s24 + $0x60] ss:$8 sps:$4 sm:$0xff]  }
  0xbc   : > { %1456 = vmatprep.subr.bf16.mxu0 %v6901_v8  ;;  %v6946_v31 = vld [vmem:[%s9310_s24 + $0x74] ss:$8 sps:$4 sm:$0xff]   ;;  %v6933_v32 = vld [vmem:[%s9310_s24 + $0x180] ss:$8 sps:$4 sm:$0xff]   ;;  %v6948_v34 = vld [vmem:[%s9310_s24 + $0x70] ss:$8 sps:$4 sm:$0xff]  }
  0xbd   : > { %v6937_v33 = vld [vmem:[%s9310_s24 + $0x194] ss:$8 sps:$4 sm:$0xff]   ;;  %v6952_v35 = vld [vmem:[%s9310_s24 + $0x84] ss:$8 sps:$4 sm:$0xff]   ;;  %v6939_v36 = vld [vmem:[%s9310_s24 + $0x190] ss:$8 sps:$4 sm:$0xff]  }
  0xbe   : > { %1414 = vmatpush1.bf16.msra.mxu1 %v6918_v14  ;;  %v6943_v37 = vld [vmem:[%s9310_s24 + $0x1a4] ss:$8 sps:$4 sm:$0xff]   ;;  %v6954_v38 = vld [vmem:[%s9310_s24 + $0x80] ss:$8 sps:$4 sm:$0xff]   ;;  %v6958_v39 = vld [vmem:[%s9310_s24 + $0x94] ss:$8 sps:$4 sm:$0xff]  }
  0xbf   : > { %1457 = vmatpush1.bf16.msra.mxu0 %v6903_v11  ;;  %1415 = vmatprep.subr.bf16.mxu1 %v6922_v15  ;;  %v6945_v41 = vld [vmem:[%s9310_s24 + $0x1a0] ss:$8 sps:$4 sm:$0xff]   ;;  %v6949_v43 = vld [vmem:[%s9310_s24 + $0x1b4] ss:$8 sps:$4 sm:$0xff]   ;;  %v6960_v44 = vld [vmem:[%s9310_s24 + $0x90] ss:$8 sps:$4 sm:$0xff]  }
  0xc0   : > { %1458 = vmatprep.subr.bf16.mxu0 %v6907_v13  ;;  %v6964_v45 = vld [vmem:[%s9310_s24 + $0xa4] ss:$8 sps:$4 sm:$0xff]   ;;  %v6951_v46 = vld [vmem:[%s9310_s24 + $0x1b0] ss:$8 sps:$4 sm:$0xff]   ;;  %v6966_v48 = vld [vmem:[%s9310_s24 + $0xa0] ss:$8 sps:$4 sm:$0xff]  }
  0xc1   : > { %v6955_v47 = vld [vmem:[%s9310_s24 + $0x1c4] ss:$8 sps:$4 sm:$0xff]   ;;  %v6970_v49 = vld [vmem:[%s9310_s24 + $0xb4] ss:$8 sps:$4 sm:$0xff]   ;;  %v6957_v50 = vld [vmem:[%s9310_s24 + $0x1c0] ss:$8 sps:$4 sm:$0xff]  }
  0xc2   : > { %1416 = vmatpush1.bf16.msra.mxu1 %v6924_v18  ;;  %v6961_v51 = vld [vmem:[%s9310_s24 + $0x1d4] ss:$8 sps:$4 sm:$0xff]   ;;  %v6972_v53 = vld [vmem:[%s9310_s24 + $0xb0] ss:$8 sps:$4 sm:$0xff]   ;;  %v6976_v55 = vld [vmem:[%s9310_s24 + $0xc4] ss:$8 sps:$4 sm:$0xff]  }
  0xc3   : > { %1459 = vmatpush1.bf16.msra.mxu0 %v6909_v16  ;;  %1417 = vmatprep.subr.bf16.mxu1 %v6928_v19  ;;  %v6963_v56 = vld [vmem:[%s9310_s24 + $0x1d0] ss:$8 sps:$4 sm:$0xff]   ;;  %v6967_v57 = vld [vmem:[%s9310_s24 + $0x1e4] ss:$8 sps:$4 sm:$0xff]   ;;  %v6978_v58 = vld [vmem:[%s9310_s24 + $0xc0] ss:$8 sps:$4 sm:$0xff]  }
  0xc4   : > { %1460 = vmatprep.subr.bf16.mxu0 %v6913_v17  ;;  %v6982_v59 = vld [vmem:[%s9310_s24 + $0xd4] ss:$8 sps:$4 sm:$0xff]   ;;  %v6969_v60 = vld [vmem:[%s9310_s24 + $0x1e0] ss:$8 sps:$4 sm:$0xff]   ;;  %v6984_v62 = vld [vmem:[%s9310_s24 + $0xd0] ss:$8 sps:$4 sm:$0xff]  }
  0xc5   : > { %v6973_v61 = vld [vmem:[%s9310_s24 + $0x1f4] ss:$8 sps:$4 sm:$0xff]   ;;  %v6988_v63 = vld [vmem:[%s9310_s24 + $0xe4] ss:$8 sps:$4 sm:$0xff]   ;;  %v6975_v0 = vld [vmem:[%s9310_s24 + $0x1f0] ss:$8 sps:$4 sm:$0xff]  }
  0xc6   : > { %1418 = vmatpush1.bf16.msra.mxu1 %v6930_v22  ;;  %v946_v1 = vld [vmem:[%s8088_s7 + $0x10] sm:$0xff]  ;;  %v6981_v2 = vld [vmem:[%s9310_s24 + $0x204] ss:$8 sps:$4 sm:$0xff]   ;;  %v6990_v3 = vld [vmem:[%s9310_s24 + $0xe0] ss:$8 sps:$4 sm:$0xff]   ;;  %v7707_v11 = vmov 0  }
  0xc7   : > { %1461 = vmatpush1.bf16.msra.mxu0 %v6915_v20  ;;  %1419 = vmatprep.subr.bf16.mxu1 %v6934_v23  ;;  %v1025_v4 = vpack.c.bf16 %v946_v1, %v946_v1  ;;  %v6994_v5 = vld [vmem:[%s9310_s24 + $0xf4] ss:$8 sps:$4 sm:$0xff]   ;;  %v6979_v6 = vld [vmem:[%s9310_s24 + $0x200] ss:$8 sps:$4 sm:$0xff]   ;;  %v6996_v8 = vld [vmem:[%s9310_s24 + $0xf0] ss:$8 sps:$4 sm:$0xff]  }
  0xc8   : > { %1462 = vmatprep.subr.bf16.mxu0 %v6919_v21  ;;  %v6987_v7 = vld [vmem:[%s9310_s24 + $0x214] ss:$8 sps:$4 sm:$0xff]   ;;  %v944_v9 = vld [vmem:[%s8088_s7] sm:$0xff]  ;;  %v6985_v10 = vld [vmem:[%s9310_s24 + $0x210] ss:$8 sps:$4 sm:$0xff]  }
  0xc9   : > { %v6993_v12 = vld [vmem:[%s9310_s24 + $0x224] ss:$8 sps:$4 sm:$0xff]   ;;  %v1023_v13 = vpack.c.bf16 %v944_v9, %v944_v9  ;;  %v6991_v14 = vld [vmem:[%s9310_s24 + $0x220] ss:$8 sps:$4 sm:$0xff]   ;;  %v6999_v15 = vld [vmem:[%s9310_s24 + $0x234] ss:$8 sps:$4 sm:$0xff]  }
  0xca   : > { %1420 = vmatpush1.bf16.msra.mxu1 %v6936_v26  ;;  %v6997_v16 = vld [vmem:[%s9310_s24 + $0x230] ss:$8 sps:$4 sm:$0xff]   ;;  %v7000_v17 = vld [vmem:[%s9310_s24 + $0x244] ss:$8 sps:$4 sm:$0x3f]  }
  0xcb   : > { %1463 = vmatpush1.bf16.msra.mxu0 %v6921_v24  ;;  %1421 = vmatprep.subr.bf16.mxu1 %v6940_v27  ;;  %v7002_v18 = vld [vmem:[%s9310_s24 + $0x240] ss:$8 sps:$4 sm:$0x3f]  }
  0xcc   : > { %1464 = vmatprep.subr.bf16.mxu0 %v6925_v25  ;;  %v948_v19 = vld [vmem:[%s8088_s7 + $0x20] sm:$0xff]  ;;  %v1404_v20 = vsel %vm1402_vm0, %v7002_v18, 0  ;;  %v1029_v27 = vld [vmem:[%s9311_s23 + $0x8] sm:$0xff] }
  0xcd   : > { %v1027_v21 = vpack.c.bf16 %v948_v19, %v948_v19  ;;  %v1028_v26 = vld [vmem:[%s9311_s23] sm:$0xff] }
  0xce   : > { %1422 = vmatpush1.bf16.msra.mxu1 %v6942_v30  ;;  %v1533_v52 = vld [vmem:[%s9313_s2] sm:$0x3] }
  0xcf   : > { %1465 = vmatpush1.bf16.msra.mxu0 %v6927_v28  ;;  %1423 = vmatprep.subr.bf16.mxu1 %v6946_v31 }
  0xd0   : > { %1466 = vmatprep.subr.bf16.mxu0 %v6931_v29 }
  0xd2   : > { %1424 = vmatpush1.bf16.msra.mxu1 %v6948_v34 }
  0xd3   : > { %1467 = vmatpush1.bf16.msra.mxu0 %v6933_v32  ;;  %1425 = vmatprep.subr.bf16.mxu1 %v6952_v35 }
  0xd4   : > { %1468 = vmatprep.subr.bf16.mxu0 %v6937_v33 }
  0xd6   : > { %1426 = vmatpush1.bf16.msra.mxu1 %v6954_v38 }
  0xd7   : > { %1469 = vmatpush1.bf16.msra.mxu0 %v6939_v36  ;;  %1427 = vmatprep.subr.bf16.mxu1 %v6958_v39 }
  0xd8   : > { %1470 = vmatprep.subr.bf16.mxu0 %v6943_v37 }
  0xda   : > { %1428 = vmatpush1.bf16.msra.mxu1 %v6960_v44 }
  0xdb   : > { %1471 = vmatpush1.bf16.msra.mxu0 %v6945_v41  ;;  %1429 = vmatprep.subr.bf16.mxu1 %v6964_v45 }
  0xdc   : > { %1472 = vmatprep.subr.bf16.mxu0 %v6949_v43 }
  0xde   : > { %1430 = vmatpush1.bf16.msra.mxu1 %v6966_v48 }
  0xdf   : > { %1473 = vmatpush1.bf16.msra.mxu0 %v6951_v46  ;;  %1431 = vmatprep.subr.bf16.mxu1 %v6970_v49  ;;  %v1552_v46 = vlaneseq }
  0xe0   : > { %1474 = vmatprep.subr.bf16.mxu0 %v6955_v47 }
  0xe1   : > { %v1553_v48 = vshrl.u32 %v1552_v46, 7 }
  0xe2   : > { %1432 = vmatpush1.bf16.msra.mxu1 %v6972_v53 }
  0xe3   : > { %1475 = vmatpush1.bf16.msra.mxu0 %v6957_v50  ;;  %1433 = vmatprep.subr.bf16.mxu1 %v6976_v55  ;;  %v1554_v49 = vsub.s32 0, %v1553_v48  ;;  %v1558_v50 = vsub.s32 1, %v1553_v48 }
  0xe4   : > { %1476 = vmatprep.subr.bf16.mxu0 %v6961_v51  ;;  %v1532_v51 = vld [vmem:[%s9312_s20] sm:$0x3] }
  0xe5   : > { %v1555_v53 = vrot.slane %v1532_v51, %v1554_v49  ;;  %v1559_v54 = vrot.slane %v1532_v51, %v1558_v50 }
  0xe6   : > { %1434 = vmatpush1.bf16.msra.mxu1 %v6978_v58 }
  0xe7   : > { %1477 = vmatpush1.bf16.msra.mxu0 %v6963_v56  ;;  %1435 = vmatprep.subr.bf16.mxu1 %v6982_v59  ;;  %v1568_v56 = vrot.slane %v1533_v52, %v1554_v49 }
  0xe8   : > { %1478 = vmatprep.subr.bf16.mxu0 %v6967_v57  ;;  %v1572_v57 = vrot.slane %v1533_v52, %v1558_v50 }
  0xea   : > { %1436 = vmatpush1.bf16.msra.mxu1 %v6984_v62 }
  0xeb   : > { %1479 = vmatpush1.bf16.msra.mxu0 %v6969_v60  ;;  %1437 = vmatprep.subr.bf16.mxu1 %v6988_v63 }
  0xec   : > { %1480 = vmatprep.subr.bf16.mxu0 %v6973_v61 }
  0xee   : > { %1438 = vmatpush1.bf16.msra.mxu1 %v6990_v3 }
  0xef   : > { %1481 = vmatpush1.bf16.msra.mxu0 %v6975_v0  ;;  %1439 = vmatprep.subr.bf16.mxu1 %v6994_v5 }
  0xf0   : > { %1491 = vmatprep.subr.bf16.mxu0 %v6981_v2 }
  0xf2   : > { %1483 = vmatmul.mubr.bf16.vlgmr.msra.gmra.mrb[0].mxu0 %v1025_v4  ;;  %1440 = vmatpush1.bf16.msra.mxu1 %v6996_v8 }
  0xf3   : > { %1492 = vmatpush1.bf16.msra.mxu0 %v6979_v6  ;;  %1523 = vmatprep.mubr.bf16.mxu0 %v7707_v11 }
  0xf4   : > { %1493 = vmatprep.subr.bf16.mxu0 %v6987_v7 }
  0xf5   : > { %1442 = vmatmul.mubr.bf16.vlgmr.msra.gmra.mrb[0].mxu1 %v1023_v13 }
  0xf7   : > { %1494 = vmatpush1.bf16.msra.mxu0 %v6985_v10 }
  0xf8   : > { %1495 = vmatprep.subr.bf16.mxu0 %v6993_v12 }
  0xfb   : > { %1496 = vmatpush1.bf16.msra.mxu0 %v6991_v14 }
  0xfc   : > { %1497 = vmatprep.subr.bf16.mxu0 %v6999_v15 }
  0xff   : > { %1498 = vmatpush1.bf16.msra.mxu0 %v6997_v16 }
 0x100   : > { %6170 = vmatprep.subr.msk.bf16.mxu0 %vm1402_vm0, %v7000_v17 }
 0x103   : > { %1500 = vmatpush1.bf16.msra.mxu0 %v1404_v20 }
 0x106   : > { %6171 = vmatmul.mubr.msk.bf16.vlgmr.msra.gmra.mrb[0].mxu0 %vm1398_vm1, %v1027_v21 }
 0x1c8   : > { %v1443_v22 = vpop.f32.mrb[0].mxu1 }
 0x1c9   : > { %v1445_v23 = vpop.f32.mrb[1].mxu1  ;;  %v1444_v28 = vadd.f32 %v1443_v22, %v1028_v26 }
 0x1ca   : > { %v1447_v24 = vpop.f32.mrb[2].mxu1  ;;  %v1446_v29 = vadd.f32 %v1445_v23, %v1029_v27 }
 0x1cb   : > { %v1448_v25 = vpop.f32.mrb[3].mxu1 }
 0x1d9   : > { %v1525_v30 = vpop.f32.mrb[0].mxu0 }
 0x1da   : > { %v6758_v31 = vadd.f32 %v1525_v30, %v1444_v28  ;;  %v1527_v32 = vpop.f32.mrb[1].mxu0 }
 0x1db   : > { %v6760_v33 = vadd.f32 %v1527_v32, %v1446_v29  ;;  %v1529_v34 = vpop.f32.mrb[2].mxu0 }
 0x1dc   : > { %v1530_v35 = vpop.f32.mrb[3].mxu0 }
 0x1dd   : > { %v1534_v36 = vadd.f32 %v6760_v33, %v6758_v31 }
 0x1df   : > { %1535 = vadd.xlane.f32.xlu0 %v1534_v36 }
 0x26c   : > { %v1536_v37 = vpop.xlane.xlu0 %1535 }
 0x26d   : > { %v1538_v38 = vmul.f32 0.00390625, %v1536_v37 }
 0x26f   : > { %v1539_v39 = vsub.f32 %v6758_v31, %v1538_v38  ;;  %v1540_v40 = vsub.f32 %v6760_v33, %v1538_v38 }
 0x271   : > { %v1541_v41 = vmul.f32 %v1539_v39, %v1539_v39  ;;  %v1542_v42 = vmul.f32 %v1540_v40, %v1540_v40 }
 0x273   : > { %v1543_v43 = vadd.f32 %v1542_v42, %v1541_v41 }
 0x275   : > { %1544 = vadd.xlane.f32.xlu0 %v1543_v43 }
 0x302   : > { %v1545_v44 = vpop.xlane.xlu0 %1544 }
 0x303   : > { %v1546_v45 = vmul.f32 0.00390625, %v1545_v44 }
 0x305   : > { %v1547_v47 = vadd.f32 1e-06, %v1546_v45 }
 0x307   : > { %7003 = vrsqrt.f32 %v1547_v47 }
 0x311   : > { %v7004_v55 = vpop.eup %7003 }
 0x312   : > { %v1549_v58 = vmul.f32 %v7004_v55, %v1539_v39  ;;  %v1550_v59 = vmul.f32 %v7004_v55, %v1540_v40 }
 0x314   : > { %v1562_v60 = vmul.f32 %v1555_v53, %v1549_v58  ;;  %v1563_v61 = vmul.f32 %v1559_v54, %v1550_v59 }
 0x316   : > { %v1575_v62 = vadd.f32 %v1568_v56, %v1562_v60  ;;  %v1576_v63 = vadd.f32 %v1572_v57, %v1563_v61 }
 0x318   : > { %1577 = vst [vmem:[#allocation2] sm:$0xff] %v1575_v62  ;;  %1578 = vst [vmem:[#allocation2 + $0x8] sm:$0xff] %v1576_v63 }
 0x319 PF: > { %v7020_v3 = vld [vmem:[%s8063_s13 + $0x4] ss:$24 sps:$4 sm:$0xff]   ;;  %v7022_v4 = vld [vmem:[%s8063_s13] ss:$24 sps:$4 sm:$0xff]   ;;  %v7026_v7 = vld [vmem:[%s8063_s13 + $0x34] ss:$24 sps:$4 sm:$0xff]   ;;  %s9316_s4 = scalar_lea.vmem %s9217_s6, %s8083_s21  ;;  %s9317_s20 = scalar_lea.vmem %s9221_s10, %s8083_s21 }
 0x31a   : > { %v7023_v5 = vld [vmem:[%s8063_s13 + $0xc] ss:$24 sps:$4 sm:$0xff]   ;;  %v7025_v6 = vld [vmem:[%s8063_s13 + $0x8] ss:$24 sps:$4 sm:$0xff]   ;;  %2236 = vmatprep.subr.bf16.mxu0 %v7020_v3  ;;  %v7029_v8 = vld [vmem:[%s8063_s13 + $0x3c] ss:$24 sps:$4 sm:$0xff]   ;;  %s9318_s2 = scalar_lea.vmem %s9222_s11, %s8083_s21 }
 0x31b   : > { %2277 = vmatprep.subr.bf16.mxu1 %v7023_v5  ;;  %2237 = vmatpush1.bf16.msra.mxu0 %v7022_v4  ;;  %v7028_v9 = vld [vmem:[%s8063_s13 + $0x30] ss:$24 sps:$4 sm:$0xff]   ;;  %v7032_v11 = vld [vmem:[%s8063_s13 + $0x64] ss:$24 sps:$4 sm:$0xff]   ;;  %v7034_v13 = vld [vmem:[%s8063_s13 + $0x60] ss:$24 sps:$4 sm:$0xff]  }
 0x31c   : > { %2278 = vmatpush1.bf16.msra.mxu1 %v7025_v6  ;;  %v7031_v10 = vld [vmem:[%s8063_s13 + $0x38] ss:$24 sps:$4 sm:$0xff]   ;;  %2238 = vmatprep.subr.bf16.mxu0 %v7026_v7  ;;  %v7035_v12 = vld [vmem:[%s8063_s13 + $0x6c] ss:$24 sps:$4 sm:$0xff]   ;;  %v7037_v14 = vld [vmem:[%s8063_s13 + $0x68] ss:$24 sps:$4 sm:$0xff]  }
 0x31d   : > { %2279 = vmatprep.subr.bf16.mxu1 %v7029_v8  ;;  %v7038_v15 = vld [vmem:[%s8063_s13 + $0x94] ss:$24 sps:$4 sm:$0xff]   ;;  %v7040_v17 = vld [vmem:[%s8063_s13 + $0x90] ss:$24 sps:$4 sm:$0xff]   ;;  %v7044_v19 = vld [vmem:[%s8063_s13 + $0xc4] ss:$24 sps:$4 sm:$0xff]  }
 0x31e   : > { %v7041_v16 = vld [vmem:[%s8063_s13 + $0x9c] ss:$24 sps:$4 sm:$0xff]   ;;  %v7043_v18 = vld [vmem:[%s8063_s13 + $0x98] ss:$24 sps:$4 sm:$0xff]   ;;  %v7047_v20 = vld [vmem:[%s8063_s13 + $0xcc] ss:$24 sps:$4 sm:$0xff]  }
 0x31f   : > { %v8375_v0 = vld [vmem:[#allocation2] sm:$0xff]  ;;  %v8377_v1 = vld [vmem:[#allocation2 + $0x8] sm:$0xff]  ;;  %2239 = vmatpush1.bf16.msra.mxu0 %v7028_v9  ;;  %v7050_v23 = vld [vmem:[%s8063_s13 + $0xf4] ss:$24 sps:$4 sm:$0xff]   ;;  %s9314_s8 = sld [smem:[#allocation33_spill]]  ;;  %vm7709_vm2 = vmmov 0  }
 0x320   : > { %v1583_v2 = vadd.f32 %v8377_v1, %v8375_v0  ;;  %2280 = vmatpush1.bf16.msra.mxu1 %v7031_v10  ;;  %2240 = vmatprep.subr.bf16.mxu0 %v7032_v11  ;;  %v7046_v21 = vld [vmem:[%s8063_s13 + $0xc0] ss:$24 sps:$4 sm:$0xff]   ;;  %v7053_v24 = vld [vmem:[%s8063_s13 + $0xfc] ss:$24 sps:$4 sm:$0xff]   ;;  %v7052_v25 = vld [vmem:[%s8063_s13 + $0xf0] ss:$24 sps:$4 sm:$0xff]  }
 0x321   : > { %2281 = vmatprep.subr.bf16.mxu1 %v7035_v12  ;;  %v7049_v22 = vld [vmem:[%s8063_s13 + $0xc8] ss:$24 sps:$4 sm:$0xff]   ;;  %v7055_v26 = vld [vmem:[%s8063_s13 + $0xf8] ss:$24 sps:$4 sm:$0xff]   ;;  %v7056_v27 = vld [vmem:[%s8063_s13 + $0x124] ss:$24 sps:$4 sm:$0xff]  }
 0x322   : > { %1584 = vadd.xlane.f32.xlu0 %v1583_v2  ;;  %v7059_v28 = vld [vmem:[%s8063_s13 + $0x12c] ss:$24 sps:$4 sm:$0xff]   ;;  %v7058_v29 = vld [vmem:[%s8063_s13 + $0x120] ss:$24 sps:$4 sm:$0xff]   ;;  %v7065_v32 = vld [vmem:[%s8063_s13 + $0x15c] ss:$24 sps:$4 sm:$0xff]  }
 0x323   : > { %2241 = vmatpush1.bf16.msra.mxu0 %v7034_v13  ;;  %v7061_v30 = vld [vmem:[%s8063_s13 + $0x128] ss:$24 sps:$4 sm:$0xff]   ;;  %v7062_v31 = vld [vmem:[%s8063_s13 + $0x154] ss:$24 sps:$4 sm:$0xff]   ;;  %v7067_v34 = vld [vmem:[%s8063_s13 + $0x158] ss:$24 sps:$4 sm:$0xff]   ;;  %v1601_v13 = vlaneseq }
 0x324   : > { %2282 = vmatpush1.bf16.msra.mxu1 %v7037_v14  ;;  %2242 = vmatprep.subr.bf16.mxu0 %v7038_v15  ;;  %v7064_v33 = vld [vmem:[%s8063_s13 + $0x150] ss:$24 sps:$4 sm:$0xff]   ;;  %v7068_v35 = vld [vmem:[%s8063_s13 + $0x184] ss:$24 sps:$4 sm:$0xff]   ;;  %v7070_v37 = vld [vmem:[%s8063_s13 + $0x180] ss:$24 sps:$4 sm:$0xff]  }
 0x325   : > { %2283 = vmatprep.subr.bf16.mxu1 %v7041_v16  ;;  %v7071_v36 = vld [vmem:[%s8063_s13 + $0x18c] ss:$24 sps:$4 sm:$0xff]   ;;  %v7073_v38 = vld [vmem:[%s8063_s13 + $0x188] ss:$24 sps:$4 sm:$0xff]   ;;  %v7077_v40 = vld [vmem:[%s8063_s13 + $0x1bc] ss:$24 sps:$4 sm:$0xff]   ;;  %s9315_s0 = scalar_lea.vmem %s9314_s8, %s8083_s21 }
 0x326   : > { %v7074_v39 = vld [vmem:[%s8063_s13 + $0x1b4] ss:$24 sps:$4 sm:$0xff]   ;;  %v7076_v41 = vld [vmem:[%s8063_s13 + $0x1b0] ss:$24 sps:$4 sm:$0xff]   ;;  %v7080_v43 = vld [vmem:[%s8063_s13 + $0x1e4] ss:$24 sps:$4 sm:$0xff]  }
 0x327   : > { %2243 = vmatpush1.bf16.msra.mxu0 %v7040_v17  ;;  %v7079_v42 = vld [vmem:[%s8063_s13 + $0x1b8] ss:$24 sps:$4 sm:$0xff]   ;;  %v7083_v52 = vld [vmem:[%s8063_s13 + $0x1ec] ss:$24 sps:$4 sm:$0xff]   ;;  %v7085_v53 = vld [vmem:[%s8063_s13 + $0x1e8] ss:$24 sps:$4 sm:$0xff]  }
 0x328   : > { %2284 = vmatpush1.bf16.msra.mxu1 %v7043_v18  ;;  %2244 = vmatprep.subr.bf16.mxu0 %v7044_v19  ;;  %v7082_v51 = vld [vmem:[%s8063_s13 + $0x1e0] ss:$24 sps:$4 sm:$0xff]   ;;  %v7086_v54 = vld [vmem:[%s8063_s13 + $0x214] ss:$24 sps:$4 sm:$0xff]   ;;  %v7088_v55 = vld [vmem:[%s8063_s13 + $0x210] ss:$24 sps:$4 sm:$0xff]  }
 0x329   : > { %2285 = vmatprep.subr.bf16.mxu1 %v7047_v20  ;;  %v7089_v56 = vld [vmem:[%s8063_s13 + $0x21c] ss:$24 sps:$4 sm:$0xff]   ;;  %v7091_v57 = vld [vmem:[%s8063_s13 + $0x218] ss:$24 sps:$4 sm:$0xff]   ;;  %v7095_v60 = vld [vmem:[%s8063_s13 + $0x24c] ss:$24 sps:$4 sm:$0xff]  }
 0x32a   : > { %v7092_v58 = vld [vmem:[%s8063_s13 + $0x244] ss:$24 sps:$4 sm:$0xff]   ;;  %v7094_v59 = vld [vmem:[%s8063_s13 + $0x240] ss:$24 sps:$4 sm:$0xff]   ;;  %v7098_v62 = vld [vmem:[%s8063_s13 + $0x274] ss:$24 sps:$4 sm:$0xff]  }
 0x32b   : > { %2245 = vmatpush1.bf16.msra.mxu0 %v7046_v21  ;;  %v7097_v61 = vld [vmem:[%s8063_s13 + $0x248] ss:$24 sps:$4 sm:$0xff]   ;;  %v7101_v63 = vld [vmem:[%s8063_s13 + $0x27c] ss:$24 sps:$4 sm:$0xff]   ;;  %v7107_v3 = vld [vmem:[%s8063_s13 + $0x2ac] ss:$24 sps:$4 sm:$0xff]  }
 0x32c   : > { %2286 = vmatpush1.bf16.msra.mxu1 %v7049_v22  ;;  %2246 = vmatprep.subr.bf16.mxu0 %v7050_v23  ;;  %v7104_v2 = vld [vmem:[%s8063_s13 + $0x2a4] ss:$24 sps:$4 sm:$0xff]   ;;  %v7106_v4 = vld [vmem:[%s8063_s13 + $0x2a0] ss:$24 sps:$4 sm:$0xff]   ;;  %v7110_v6 = vld [vmem:[%s8063_s13 + $0x2d4] ss:$24 sps:$4 sm:$0xff]  }
 0x32d   : > { %2287 = vmatprep.subr.bf16.mxu1 %v7053_v24  ;;  %v7109_v5 = vld [vmem:[%s8063_s13 + $0x2a8] ss:$24 sps:$4 sm:$0xff]   ;;  %v7113_v7 = vld [vmem:[%s8063_s13 + $0x2dc] ss:$24 sps:$4 sm:$0xff]   ;;  %v7115_v9 = vld [vmem:[%s8063_s13 + $0x2d8] ss:$24 sps:$4 sm:$0xff]  }
 0x32e   : > { %v7112_v8 = vld [vmem:[%s8063_s13 + $0x2d0] ss:$24 sps:$4 sm:$0xff]   ;;  %v7118_v10 = vld [vmem:[%s8063_s13 + $0x14] ss:$24 sps:$4 sm:$0xff]   ;;  %v8457_v15 = vshrl.u32 %v1601_v13, 7  ;;  %vm2392_vm3 = vcmask 261120  }
 0x32f   : > { %2247 = vmatpush1.bf16.msra.mxu0 %v7052_v25  ;;  %v1581_v18 = vld [vmem:[%s9315_s0] sm:$0x3]  ;;  %vm2456_vm4 = vcmask 1043456   ;;  %vm2440_vm6 = vcmask 64512   ;;  %s7712_s7 = smov 32   ;;  %vm3317_vm7 = vcmask 523264  }
 0x330   : > { %2288 = vmatpush1.bf16.msra.mxu1 %v7055_v26  ;;  %2248 = vmatprep.subr.bf16.mxu0 %v7056_v27  ;;  %v8460_v16 = vsub.s32 1, %v8457_v15  ;;  %v8463_v17 = vsub.s32 0, %v8457_v15  ;;  %v1582_v19 = vld [vmem:[%s9316_s4] sm:$0x3]  ;;  %vm3319_vm8 = vcmask 785408   ;;  %p6581_p12 = scmp.ne.s32.totalorder %s7682_s29, 1 }
 0x331   : > { %2289 = vmatprep.subr.bf16.mxu1 %v7059_v28  ;;  %vm5599_vm9 = vcmask (!%p6581_p12), 1040384  }
 0x332   : > { %v1608_v20 = vrot.slane %v1581_v18, %v8460_v16  ;;  %v1604_v21 = vrot.slane %v1581_v18, %v8463_v17  ;;  %v1621_v24 = vrot.slane %v1582_v19, %v8460_v16  ;;  %v1617_v26 = vrot.slane %v1582_v19, %v8463_v17 }
 0x333   : > { %2249 = vmatpush1.bf16.msra.mxu0 %v7058_v29 }
 0x334   : > { %2290 = vmatpush1.bf16.msra.mxu1 %v7061_v30  ;;  %2250 = vmatprep.subr.bf16.mxu0 %v7062_v31 }
 0x335   : > { %2291 = vmatprep.subr.bf16.mxu1 %v7065_v32  ;;  %v7116_v32 = vld [vmem:[%s8063_s13 + $0x10] ss:$24 sps:$4 sm:$0xff]  }
 0x337   : > { %2251 = vmatpush1.bf16.msra.mxu0 %v7064_v33 }
 0x338   : > { %2292 = vmatpush1.bf16.msra.mxu1 %v7067_v34  ;;  %2252 = vmatprep.subr.bf16.mxu0 %v7068_v35  ;;  %v7121_v34 = vld [vmem:[%s8063_s13 + $0x44] ss:$24 sps:$4 sm:$0xff]   ;;  %v7119_v35 = vld [vmem:[%s8063_s13 + $0x40] ss:$24 sps:$4 sm:$0xff]  }
 0x339   : > { %2293 = vmatprep.subr.bf16.mxu1 %v7071_v36  ;;  %v7124_v36 = vld [vmem:[%s8063_s13 + $0x74] ss:$24 sps:$4 sm:$0xff]  }
 0x33b   : > { %2253 = vmatpush1.bf16.msra.mxu0 %v7070_v37  ;;  %v7122_v37 = vld [vmem:[%s8063_s13 + $0x70] ss:$24 sps:$4 sm:$0xff]  }
 0x33c   : > { %2294 = vmatpush1.bf16.msra.mxu1 %v7073_v38  ;;  %2254 = vmatprep.subr.bf16.mxu0 %v7074_v39  ;;  %v7127_v38 = vld [vmem:[%s8063_s13 + $0xa4] ss:$24 sps:$4 sm:$0xff]   ;;  %v7125_v39 = vld [vmem:[%s8063_s13 + $0xa0] ss:$24 sps:$4 sm:$0xff]  }
 0x33d   : > { %2295 = vmatprep.subr.bf16.mxu1 %v7077_v40  ;;  %v7130_v40 = vld [vmem:[%s8063_s13 + $0xd4] ss:$24 sps:$4 sm:$0xff]  }
 0x33f   : > { %2255 = vmatpush1.bf16.msra.mxu0 %v7076_v41  ;;  %v7128_v41 = vld [vmem:[%s8063_s13 + $0xd0] ss:$24 sps:$4 sm:$0xff]  }
 0x340   : > { %2296 = vmatpush1.bf16.msra.mxu1 %v7079_v42  ;;  %2256 = vmatprep.subr.bf16.mxu0 %v7080_v43  ;;  %v7133_v42 = vld [vmem:[%s8063_s13 + $0x104] ss:$24 sps:$4 sm:$0xff]   ;;  %v7131_v43 = vld [vmem:[%s8063_s13 + $0x100] ss:$24 sps:$4 sm:$0xff]  }
 0x341   : > { %2297 = vmatprep.subr.bf16.mxu1 %v7083_v52  ;;  %v7148_v52 = vld [vmem:[%s8063_s13 + $0x1f4] ss:$24 sps:$4 sm:$0xff]  }
 0x343   : > { %2257 = vmatpush1.bf16.msra.mxu0 %v7082_v51  ;;  %v7143_v51 = vld [vmem:[%s8063_s13 + $0x1c0] ss:$24 sps:$4 sm:$0xff]  }
 0x344   : > { %2298 = vmatpush1.bf16.msra.mxu1 %v7085_v53  ;;  %2258 = vmatprep.subr.bf16.mxu0 %v7086_v54  ;;  %v7146_v53 = vld [vmem:[%s8063_s13 + $0x1f0] ss:$24 sps:$4 sm:$0xff]   ;;  %v7151_v54 = vld [vmem:[%s8063_s13 + $0x224] ss:$24 sps:$4 sm:$0xff]  }
 0x345   : > { %2299 = vmatprep.subr.bf16.mxu1 %v7089_v56  ;;  %v7154_v56 = vld [vmem:[%s8063_s13 + $0x254] ss:$24 sps:$4 sm:$0xff]  }
 0x347   : > { %2259 = vmatpush1.bf16.msra.mxu0 %v7088_v55  ;;  %v7149_v55 = vld [vmem:[%s8063_s13 + $0x220] ss:$24 sps:$4 sm:$0xff]  }
 0x348   : > { %2300 = vmatpush1.bf16.msra.mxu1 %v7091_v57  ;;  %2260 = vmatprep.subr.bf16.mxu0 %v7092_v58  ;;  %v7152_v57 = vld [vmem:[%s8063_s13 + $0x250] ss:$24 sps:$4 sm:$0xff]   ;;  %v7157_v58 = vld [vmem:[%s8063_s13 + $0x284] ss:$24 sps:$4 sm:$0xff]  }
 0x349   : > { %2301 = vmatprep.subr.bf16.mxu1 %v7095_v60  ;;  %v7160_v60 = vld [vmem:[%s8063_s13 + $0x2b4] ss:$24 sps:$4 sm:$0xff]  }
 0x34b   : > { %2261 = vmatpush1.bf16.msra.mxu0 %v7094_v59  ;;  %v7155_v59 = vld [vmem:[%s8063_s13 + $0x280] ss:$24 sps:$4 sm:$0xff]  }
 0x34c   : > { %2302 = vmatpush1.bf16.msra.mxu1 %v7097_v61  ;;  %2262 = vmatprep.subr.bf16.mxu0 %v7098_v62  ;;  %v7158_v61 = vld [vmem:[%s8063_s13 + $0x2b0] ss:$24 sps:$4 sm:$0xff]   ;;  %v7163_v62 = vld [vmem:[%s8063_s13 + $0x2e4] ss:$24 sps:$4 sm:$0xff]  }
 0x34d   : > { %2303 = vmatprep.subr.bf16.mxu1 %v7101_v63  ;;  %v7161_v63 = vld [vmem:[%s8063_s13 + $0x2e0] ss:$24 sps:$4 sm:$0xff]  }
 0x3af   : > { %v1585_v44 = vpop.xlane.xlu0 %1584 }
 0x3b0   : > { %v1587_v45 = vmul.f32 0.00390625, %v1585_v44  ;;  %v7136_v44 = vld [vmem:[%s8063_s13 + $0x134] ss:$24 sps:$4 sm:$0xff]  }
 0x3b2   : > { %v8423_v46 = vsub.f32 %v8375_v0, %v1587_v45  ;;  %v8426_v47 = vsub.f32 %v8377_v1, %v1587_v45  ;;  %v7100_v0 = vld [vmem:[%s8063_s13 + $0x270] ss:$24 sps:$4 sm:$0xff]  }
 0x3b3   : > { %v7103_v1 = vld [vmem:[%s8063_s13 + $0x278] ss:$24 sps:$4 sm:$0xff]   ;;  %2263 = vmatpush1.bf16.msra.mxu0 %v7100_v0  ;;  %v7708_v0 = vmov 0.0  }
 0x3b4   : > { %v1590_v48 = vmul.f32 %v8423_v46, %v8423_v46  ;;  %v1591_v49 = vmul.f32 %v8426_v47, %v8426_v47  ;;  %2304 = vmatpush1.bf16.msra.mxu1 %v7103_v1  ;;  %2264 = vmatprep.subr.bf16.mxu0 %v7104_v2  ;;  %v7134_v45 = vld [vmem:[%s8063_s13 + $0x130] ss:$24 sps:$4 sm:$0xff]   ;;  %v1736_v1 = vsub.s32 2, %v8457_v15  ;;  %v1724_v2 = vld [vmem:[%s8101_s15] sm:$0x3f]  ;;  %s7710_s15 = smov 96  }
 0x3b5   : > { %2305 = vmatprep.subr.bf16.mxu1 %v7107_v3  ;;  %v1740_v3 = vsub.s32 3, %v8457_v15 }
 0x3b6   : > { %v1592_v50 = vadd.f32 %v1591_v49, %v1590_v48  ;;  %v7142_v48 = vld [vmem:[%s8063_s13 + $0x194] ss:$24 sps:$4 sm:$0xff]   ;;  %v7140_v49 = vld [vmem:[%s8063_s13 + $0x190] ss:$24 sps:$4 sm:$0xff]  }
 0x3b7   : > { %2265 = vmatpush1.bf16.msra.mxu0 %v7106_v4  ;;  %v1729_v4 = vrot.slane %v1724_v2, %v8463_v17 }
 0x3b8   : > { %1593 = vadd.xlane.f32.xlu0 %v1592_v50  ;;  %2306 = vmatpush1.bf16.msra.mxu1 %v7109_v5  ;;  %v7145_v50 = vld [vmem:[%s8063_s13 + $0x1c4] ss:$24 sps:$4 sm:$0xff]   ;;  %v1737_v5 = vrot.slane %v1724_v2, %v1736_v1 }
 0x3b9   : > { %2266 = vmatprep.subr.bf16.mxu0 %v7110_v6  ;;  %2307 = vmatprep.subr.bf16.mxu1 %v7113_v7  ;;  %v1733_v6 = vrot.slane %v1724_v2, %v8460_v16  ;;  %v1741_v7 = vrot.slane %v1724_v2, %v1740_v3 }
 0x3bb   : > { %2267 = vmatpush1.bf16.msra.mxu0 %v7112_v8 }
 0x3bc   : > { %2308 = vmatpush1.bf16.msra.mxu1 %v7115_v9  ;;  %2318 = vmatprep.subr.bf16.mxu0 %v7118_v10 }
 0x3bd   : > { %6661 = vmatprep.subr.bf16.mxu1 %v7708_v0 }
 0x445   : > { %v1594_v11 = vpop.xlane.xlu0 %1593 }
 0x446   : > { %v1595_v12 = vmul.f32 0.00390625, %v1594_v11 }
 0x448   : > { %v1596_v14 = vadd.f32 1e-06, %v1595_v12 }
 0x44a   : > { %7410 = vrsqrt.f32 %v1596_v14 }
 0x454   : > { %v7411_v22 = vpop.eup %7410 }
 0x455   : > { %v1599_v23 = vmul.f32 %v7411_v22, %v8426_v47  ;;  %v1598_v25 = vmul.f32 %v7411_v22, %v8423_v46  ;;  %v7139_v46 = vld [vmem:[%s8063_s13 + $0x164] ss:$24 sps:$4 sm:$0xff]   ;;  %v7137_v47 = vld [vmem:[%s8063_s13 + $0x160] ss:$24 sps:$4 sm:$0xff]   ;;  %s7711_s13 = smov 64  }
 0x457   : > { %v1612_v27 = vmul.f32 %v1608_v20, %v1599_v23  ;;  %v1611_v28 = vmul.f32 %v1604_v21, %v1598_v25 }
 0x459   : > { %v1625_v29 = vadd.f32 %v1621_v24, %v1612_v27  ;;  %v1624_v30 = vadd.f32 %v1617_v26, %v1611_v28 }
 0x45b   : > { %v1723_v31 = vpack.c.bf16 %v1625_v29, %v1625_v29  ;;  %v8482_v33 = vpack.c.bf16 %v1624_v30, %v1624_v30  ;;  %v1744_v30 = vsub.s32 4, %v8457_v15 }
 0x45d   : > { %2268 = vmatprep.mubr.bf16.mxu0 %v1723_v31  ;;  %2309 = vmatprep.mubr.bf16.mxu1 %v1723_v31 }
 0x45e   : > { %2269 = vmatmul.mubr.bf16.vlgmr.msra.gmra.mrb[0].mxu0 %v8482_v33  ;;  %2310 = vmatmul.mubr.bf16.vlgmr.msra.gmra.mrb[0].mxu1 %v8482_v33 }
 0x45f   : > { %2319 = vmatpush1.bf16.msra.mxu0 %v7116_v32  ;;  %2350 = vmatprep.mubr.bf16.mxu0 %v1723_v31  ;;  %v1748_v31 = vsub.s32 5, %v8457_v15  ;;  %v1745_v32 = vrot.slane %v1724_v2, %v1744_v30 }
 0x460   : > { %2320 = vmatprep.subr.bf16.mxu0 %v7121_v34  ;;  %6663 = vmatprep.mubr.msk.bf16.mxu1 %vm7709_vm2, %v7708_v0 }
 0x463   : > { %2321 = vmatpush1.bf16.msra.mxu0 %v7119_v35 }
 0x464   : > { %2322 = vmatprep.subr.bf16.mxu0 %v7124_v36 }
 0x467   : > { %2323 = vmatpush1.bf16.msra.mxu0 %v7122_v37 }
 0x468   : > { %2324 = vmatprep.subr.bf16.mxu0 %v7127_v38 }
 0x46b   : > { %2325 = vmatpush1.bf16.msra.mxu0 %v7125_v39 }
 0x46c   : > { %2326 = vmatprep.subr.bf16.mxu0 %v7130_v40 }
 0x46f   : > { %2327 = vmatpush1.bf16.msra.mxu0 %v7128_v41 }
 0x470   : > { %2328 = vmatprep.subr.bf16.mxu0 %v7133_v42 }
 0x473   : > { %2329 = vmatpush1.bf16.msra.mxu0 %v7131_v43  ;;  %v8547_v43 = vand.u32 127, %v1601_v13 }
 0x474   : > { %2330 = vmatprep.subr.bf16.mxu0 %v7136_v44 }
 0x475   : > { %vm2388_vm5 = vcmp.lt.s32.totalorder %v8547_v43, 5 }
 0x477   : > { %2331 = vmatpush1.bf16.msra.mxu0 %v7134_v45 }
 0x478   : > { %2332 = vmatprep.subr.bf16.mxu0 %v7139_v46 }
 0x47b   : > { %2333 = vmatpush1.bf16.msra.mxu0 %v7137_v47 }
 0x47c   : > { %2334 = vmatprep.subr.bf16.mxu0 %v7142_v48 }
 0x47f   : > { %2335 = vmatpush1.bf16.msra.mxu0 %v7140_v49 }
 0x480   : > { %2336 = vmatprep.subr.bf16.mxu0 %v7145_v50 }
 0x483   : > { %2337 = vmatpush1.bf16.msra.mxu0 %v7143_v51 }
 0x484   : > { %2338 = vmatprep.subr.bf16.mxu0 %v7148_v52 }
 0x487   : > { %2339 = vmatpush1.bf16.msra.mxu0 %v7146_v53 }
 0x488   : > { %2340 = vmatprep.subr.bf16.mxu0 %v7151_v54 }
 0x48b   : > { %2341 = vmatpush1.bf16.msra.mxu0 %v7149_v55 }
 0x48c   : > { %2342 = vmatprep.subr.bf16.mxu0 %v7154_v56 }
 0x48f   : > { %2343 = vmatpush1.bf16.msra.mxu0 %v7152_v57 }
 0x490   : > { %2344 = vmatprep.subr.bf16.mxu0 %v7157_v58 }
 0x493   : > { %2345 = vmatpush1.bf16.msra.mxu0 %v7155_v59 }
 0x494   : > { %2346 = vmatprep.subr.bf16.mxu0 %v7160_v60 }
 0x497   : > { %2347 = vmatpush1.bf16.msra.mxu0 %v7158_v61 }
 0x498   : > { %2348 = vmatprep.subr.bf16.mxu0 %v7163_v62 }
 0x49b   : > { %2349 = vmatpush1.bf16.msra.mxu0 %v7161_v63 }
 0x49e   : > { %2351 = vmatmul.mubr.bf16.vlgmr.msra.gmra.mrb[4].mxu0 %v8482_v33  ;;  %v1749_v33 = vrot.slane %v1724_v2, %v1748_v31 }
 0x531   : > { %v2270_v8 = vpop.f32.mrb[0].mxu0  ;;  %v2311_v9 = vpop.f32.mrb[0].mxu1 }
 0x532   : > { %v2271_v10 = vadd.f32 %v2270_v8, %v1729_v4  ;;  %v2312_v11 = vadd.f32 %v2311_v9, %v1737_v5  ;;  %v2272_v12 = vpop.f32.mrb[1].mxu0  ;;  %v2313_v14 = vpop.f32.mrb[1].mxu1 }
 0x533   : > { %v2273_v18 = vadd.f32 %v2272_v12, %v1733_v6  ;;  %v2314_v19 = vadd.f32 %v2313_v14, %v1741_v7  ;;  %v2274_v20 = vpop.f32.mrb[2].mxu0  ;;  %v2315_v21 = vpop.f32.mrb[2].mxu1 }
 0x534   : > { %v2275_v22 = vpop.f32.mrb[3].mxu0  ;;  %v2316_v23 = vpop.f32.mrb[3].mxu1 }
 0x535   : > { %v6604_v24 = vpack.c.bf16 %v2273_v18, %v2271_v10  ;;  %v6605_v25 = vpack.c.bf16 %v2314_v19, %v2312_v11 }
 0x537   : > { %2383 = vst [vmem:[#allocation3] sm:$0xff] %v6604_v24  ;;  %2384 = vst [vmem:[#allocation3 + $0x8] sm:$0xff] %v6605_v25 }
 0x53e   : > { %v2390_v26 = vld [vmem:[#allocation3 + $0x8] sm:$0xf]  ;;  %v2389_v29 = vld [vmem:[#allocation3] sm:$0xf] }
 0x53f   : > { %v2397_v27 = vsel %vm2392_vm3, %v2390_v26, 0  ;;  %v8530_v28 = vcombine.low %v2390_v26, %v2390_v26  ;;  %v8554_v54 = vcombine.low %v2389_v29, %v2389_v29 }
 0x540   : > { %6662 = vmatpush3.bf16.xpose.msra.mxu1 %v2397_v27 }
 0x541   : > { %2508 = vrot.lane.b32.xlu0 %v8530_v28, %s7710_s15  ;;  %6667 = vmatprep.subr.bf16.mxu1 %v7708_v0 }
 0x547   : > { %6664 = vmatmul.mubr.msk.bf16.vlgmr.msra.gmra.mrb[4].mxu1 %vm2392_vm3, %v2389_v29 }
 0x548   : > { %6669 = vmatprep.mubr.msk.bf16.mxu1 %vm7709_vm2, %v7708_v0 }
 0x571   : > { %v2352_v34 = vpop.f32.mrb[4].mxu0 }
 0x572   : > { %v2353_v35 = vadd.f32 %v2352_v34, %v1745_v32  ;;  %v2354_v36 = vpop.f32.mrb[5].mxu0 }
 0x573   : > { %v2355_v37 = vadd.f32 %v2354_v36, %v1749_v33  ;;  %v2356_v38 = vpop.f32.mrb[6].mxu0 }
 0x574   : > { %v2357_v39 = vpop.f32.mrb[7].mxu0 }
 0x575   : > { %v6606_v40 = vpack.c.bf16 %v2355_v37, %v2353_v35 }
 0x577   : > { %2385 = vst [vmem:[#allocation3 + $0x10] sm:$0xff] %v6606_v40 }
 0x57e   : > { %v2391_v41 = vld [vmem:[#allocation3 + $0x10] sm:$0xf] }
 0x57f   : > { %v2458_v42 = vsel %vm2456_vm4, %v2391_v41, 0  ;;  %v8576_v20 = vcombine.low %v2391_v41, %v2391_v41 }
 0x580   : > { %6668 = vmatpush3.bf16.msra.mxu1 %v2458_v42 }
 0x581   : > { %6673 = vmatprep.subr.bf16.mxu1 %v7708_v0 }
 0x5b3   : > { %v2509_v58 = vpop.permute.xlu0 %2508 }
 0x5b4   : > { %v2514_v60 = vsel %vm2392_vm3, %v2509_v58, 0 }
 0x61a   : > { %v2433_v44 = vpop.f32.mrb[4].mxu1 }
 0x61b   : > { %v2439_v45 = vsel %vm2388_vm5, %v2433_v44, -1e+30  ;;  %v6665_v46 = vpop.f32.mrb[5].mxu1 }
 0x61c   : > { %v2436_v47 = vpop.f32.mrb[6].mxu1  ;;  %v2441_v48 = vsel %vm2440_vm6, %v2439_v45, -inf }
 0x61d   : > { %2442 = vmax.xlane.f32.xlu1 %v2441_v48  ;;  %v6666_v49 = vpop.f32.mrb[7].mxu1 }
 0x6aa   : > { %v2443_v50 = vpop.xlane.xlu1 %2442 }
 0x6ab   : > { %v2444_v51 = vsub.f32 %v2439_v45, %v2443_v50 }
 0x6ad   : > { %v2445_v52 = vmul.f32 1.442695, %v2444_v51 }
 0x6af   : > { %7412 = vpow2.f32 %v2445_v52 }
 0x6b9   : > { %v7413_v53 = vpop.eup %7412 }
 0x6ba   : > { %v2447_v13 = vsel %vm2440_vm6, %v7413_v53, 0.0 }
 0x6bb   : > { %2448 = vadd.xlane.f32.xlu1 %v2447_v13 }
 0x6cc   : > { %2503 = vrot.lane.b32.xlu1 %v8554_v54, %s7710_s15 }
 0x748   : > { %v2449_v55 = vpop.xlane.xlu1 %2448 }
 0x749   : > { %7414 = vrcp.f32 %v2449_v55 }
 0x74c   : > { %v2504_v61 = vpop.permute.xlu1 %2503 }
 0x753   : > { %v7415_v56 = vpop.eup %7414 }
 0x754   : > { %v2451_v57 = vmul.f32 %v7415_v56, %v7413_v53 }
 0x756   : > { %v2452_v59 = vpack.c.bf16 %v2451_v57, %v2451_v57 }
 0x758   : > { %6670 = vmatmul.mubr.msk.bf16.vlgmr.msra.gmra.mrb[8].mxu1 %vm2440_vm6, %v2452_v59 }
 0x759   : > { %6674 = vmatpush3.bf16.xpose.msra.mxu1 %v2514_v60  ;;  %6675 = vmatprep.mubr.msk.bf16.mxu1 %vm7709_vm2, %v7708_v0 }
 0x75a   : > { %6679 = vmatprep.subr.bf16.mxu1 %v7708_v0 }
 0x760   : > { %6676 = vmatmul.mubr.msk.bf16.vlgmr.msra.gmra.mrb[12].mxu1 %vm2392_vm3, %v2504_v61 }
 0x761   : > { %6681 = vmatprep.mubr.msk.bf16.mxu1 %vm7709_vm2, %v7708_v0 }
 0x82b   : > { %v8566_v62 = vpop.f32.mrb[8].mxu1 }
 0x82c   : > { %v6671_v63 = vpop.f32.mrb[9].mxu1 }
 0x82d   : > { %v2497_v2 = vpop.f32.mrb[10].mxu1 }
 0x82e   : > { %v6672_v4 = vpop.f32.mrb[11].mxu1 }
 0x833   : > { %v2550_v5 = vpop.f32.mrb[12].mxu1 }
 0x834   : > { %v2556_v6 = vsel %vm2388_vm5, %v2550_v5, -1e+30  ;;  %v6677_v7 = vpop.f32.mrb[13].mxu1 }
 0x835   : > { %v2553_v8 = vpop.f32.mrb[14].mxu1  ;;  %v2557_v9 = vsel %vm2440_vm6, %v2556_v6, -inf }
 0x836   : > { %2558 = vmax.xlane.f32.xlu1 %v2557_v9  ;;  %v6678_v10 = vpop.f32.mrb[15].mxu1 }
 0x847   : > { %2622 = vrot.lane.b32.xlu1 %v8530_v28, %s7711_s13 }
 0x84b   : > { %2620 = vrot.lane.b32.xlu1 %v8554_v54, %s7711_s13 }
 0x8c3   : > { %v2559_v11 = vpop.xlane.xlu1 %2558 }
 0x8c4   : > { %v2560_v12 = vsub.f32 %v2556_v6, %v2559_v11  ;;  %v2842_v6 = vld [vmem:[#allocation3 + $0x4] sm:$0xf] }
 0x8c5   : > { %v8619_v7 = vcombine.low %v2842_v6, %v2842_v6 }
 0x8c6   : > { %v2561_v14 = vmul.f32 1.442695, %v2560_v12 }
 0x8c7   : > { %v2623_v26 = vpop.permute.xlu1 %2622 }
 0x8c8   : > { %7416 = vpow2.f32 %v2561_v14  ;;  %v2628_v29 = vsel %vm2392_vm3, %v2623_v26, 0 }
 0x8cb   : > { %v2621_v32 = vpop.permute.xlu1 %2620 }
 0x8d2   : > { %v7417_v18 = vpop.eup %7416 }
 0x8d3   : > { %v2563_v19 = vsel %vm2440_vm6, %v7417_v18, 0.0 }
 0x8d4   : > { %2564 = vadd.xlane.f32.xlu0 %v2563_v19 }
 0x8ea   : > { %2572 = vrot.lane.b32.xlu0 %v8576_v20, %s7710_s15 }
 0x961   : > { %v2565_v21 = vpop.xlane.xlu0 %2564 }
 0x962   : > { %7418 = vrcp.f32 %v2565_v21 }
 0x965   : > { %v2573_v22 = vpop.permute.xlu0 %2572 }
 0x966   : > { %v2578_v23 = vsel %vm2456_vm4, %v2573_v22, 0  ;;  %v2843_v22 = vld [vmem:[#allocation3 + $0xc] sm:$0xf] }
 0x967   : > { %6680 = vmatpush3.bf16.msra.mxu1 %v2578_v23 }
 0x968   : > { %6685 = vmatprep.subr.bf16.mxu1 %v7708_v0 }
 0x96c   : > { %v7419_v24 = vpop.eup %7418 }
 0x96d   : > { %v2567_v25 = vmul.f32 %v7419_v24, %v7417_v18  ;;  %v2849_v24 = vsel %vm2392_vm3, %v2843_v22, 0 }
 0x96f   : > { %v2568_v27 = vpack.c.bf16 %v2567_v25, %v2567_v25  ;;  %v2844_v25 = vld [vmem:[#allocation3 + $0x14] sm:$0xf] }
 0x970   : > { %v2908_v26 = vsel %vm2456_vm4, %v2844_v25, 0 }
 0x971   : > { %6682 = vmatmul.mubr.msk.bf16.vlgmr.msra.gmra.mrb[16].mxu1 %vm2440_vm6, %v2568_v27 }
 0x972   : > { %6686 = vmatpush3.bf16.xpose.msra.mxu1 %v2628_v29  ;;  %6687 = vmatprep.mubr.msk.bf16.mxu1 %vm7709_vm2, %v7708_v0 }
 0x973   : > { %6691 = vmatprep.subr.bf16.mxu1 %v7708_v0 }
 0x979   : > { %6688 = vmatmul.mubr.msk.bf16.vlgmr.msra.gmra.mrb[20].mxu1 %vm2392_vm3, %v2621_v32 }
 0x97a   : > { %6693 = vmatprep.mubr.msk.bf16.mxu1 %vm7709_vm2, %v7708_v0 }
 0xa44   : > { %v8590_v33 = vpop.f32.mrb[16].mxu1 }
 0xa45   : > { %v6683_v34 = vpop.f32.mrb[17].mxu1 }
 0xa46   : > { %v2617_v35 = vpop.f32.mrb[18].mxu1 }
 0xa47   : > { %v6684_v36 = vpop.f32.mrb[19].mxu1 }
 0xa4c   : > { %v2664_v37 = vpop.f32.mrb[20].mxu1 }
 0xa4d   : > { %v2670_v38 = vsel %vm2388_vm5, %v2664_v37, -1e+30  ;;  %v6689_v39 = vpop.f32.mrb[21].mxu1 }
 0xa4e   : > { %v2667_v40 = vpop.f32.mrb[22].mxu1  ;;  %v2671_v41 = vsel %vm2440_vm6, %v2670_v38, -inf }
 0xa4f   : > { %2672 = vmax.xlane.f32.xlu1 %v2671_v41  ;;  %v6690_v42 = vpop.f32.mrb[23].mxu1 }
 0xa60   : > { %2733 = vrot.lane.b32.xlu1 %v8530_v28, %s7712_s7 }
 0xa64   : > { %2731 = vrot.lane.b32.xlu1 %v8554_v54, %s7712_s7 }
 0xadc   : > { %v2673_v44 = vpop.xlane.xlu1 %2672 }
 0xadd   : > { %v2674_v45 = vsub.f32 %v2670_v38, %v2673_v44 }
 0xadf   : > { %v2675_v46 = vmul.f32 1.442695, %v2674_v45 }
 0xae0   : > { %v2734_v53 = vpop.permute.xlu1 %2733 }
 0xae1   : > { %7420 = vpow2.f32 %v2675_v46  ;;  %v2739_v54 = vsel %vm2392_vm3, %v2734_v53, 0 }
 0xae4   : > { %v2732_v55 = vpop.permute.xlu1 %2731 }
 0xaeb   : > { %v7421_v47 = vpop.eup %7420 }
 0xaec   : > { %v2677_v48 = vsel %vm2440_vm6, %v7421_v47, 0.0 }
 0xaed   : > { %2678 = vadd.xlane.f32.xlu0 %v2677_v48 }
 0xb03   : > { %2683 = vrot.lane.b32.xlu0 %v8576_v20, %s7711_s13 }
 0xb7a   : > { %v2679_v49 = vpop.xlane.xlu0 %2678 }
 0xb7b   : > { %7422 = vrcp.f32 %v2679_v49 }
 0xb7e   : > { %v2684_v50 = vpop.permute.xlu0 %2683 }
 0xb7f   : > { %v2689_v51 = vsel %vm2456_vm4, %v2684_v50, 0 }
 0xb80   : > { %6692 = vmatpush3.bf16.msra.mxu1 %v2689_v51 }
 0xb81   : > { %6697 = vmatprep.subr.bf16.mxu1 %v7708_v0 }
 0xb85   : > { %v7423_v28 = vpop.eup %7422 }
 0xb86   : > { %v2681_v52 = vmul.f32 %v7423_v28, %v7421_v47  ;;  %v8642_v47 = vcombine.low %v2843_v22, %v2843_v22 }
 0xb88   : > { %v2682_v13 = vpack.c.bf16 %v2681_v52, %v2681_v52 }
 0xb8a   : > { %6694 = vmatmul.mubr.msk.bf16.vlgmr.msra.gmra.mrb[24].mxu1 %vm2440_vm6, %v2682_v13 }
 0xb8b   : > { %6698 = vmatpush3.bf16.xpose.msra.mxu1 %v2739_v54  ;;  %6699 = vmatprep.mubr.msk.bf16.mxu1 %vm7709_vm2, %v7708_v0 }
 0xb8c   : > { %6703 = vmatprep.subr.bf16.mxu1 %v7708_v0 }
 0xb92   : > { %6700 = vmatmul.mubr.msk.bf16.vlgmr.msra.gmra.mrb[28].mxu1 %vm2392_vm3, %v2732_v55 }
 0xb93   : > { %6705 = vmatprep.mubr.msk.bf16.mxu1 %vm7709_vm2, %v7708_v0 }
 0xc5d   : > { %v8612_v56 = vpop.f32.mrb[24].mxu1 }
 0xc5e   : > { %v6695_v57 = vpop.f32.mrb[25].mxu1 }
 0xc5f   : > { %v2728_v58 = vpop.f32.mrb[26].mxu1 }
 0xc60   : > { %v6696_v59 = vpop.f32.mrb[27].mxu1 }
 0xc65   : > { %v2775_v60 = vpop.f32.mrb[28].mxu1 }
 0xc66   : > { %v2781_v61 = vsel %vm2388_vm5, %v2775_v60, -1e+30  ;;  %v6701_v63 = vpop.f32.mrb[29].mxu1 }
 0xc67   : > { %v2778_v2 = vpop.f32.mrb[30].mxu1  ;;  %v2782_v4 = vsel %vm2440_vm6, %v2781_v61, -inf }
 0xc68   : > { %2783 = vmax.xlane.f32.xlu0 %v2782_v4  ;;  %v6702_v5 = vpop.f32.mrb[31].mxu1  ;;  %v8659_v4 = vcombine.low %v2844_v25, %v2844_v25 }
 0xc7e   : > { %2794 = vrot.lane.b32.xlu0 %v8576_v20, %s7712_s7 }
 0xc82   : > { %2953 = vrot.lane.b32.xlu0 %v8619_v7, %s7710_s15 }
 0xcf5   : > { %v2784_v8 = vpop.xlane.xlu0 %2783 }
 0xcf6   : > { %v2785_v9 = vsub.f32 %v2781_v61, %v2784_v8 }
 0xcf8   : > { %v2786_v10 = vmul.f32 1.442695, %v2785_v9 }
 0xcf9   : > { %v2795_v11 = vpop.permute.xlu0 %2794 }
 0xcfa   : > { %7424 = vpow2.f32 %v2786_v10  ;;  %v2800_v12 = vsel %vm2456_vm4, %v2795_v11, 0 }
 0xcfb   : > { %6704 = vmatpush3.bf16.msra.mxu1 %v2800_v12 }
 0xcfc   : > { %6709 = vmatprep.subr.bf16.mxu1 %v7708_v0 }
 0xcfd   : > { %v2954_v53 = vpop.permute.xlu0 %2953 }
 0xd04   : > { %v7425_v14 = vpop.eup %7424 }
 0xd05   : > { %v2788_v18 = vsel %vm2440_vm6, %v7425_v14, 0.0 }
 0xd06   : > { %2789 = vadd.xlane.f32.xlu1 %v2788_v18 }
 0xd93   : > { %v2790_v19 = vpop.xlane.xlu1 %2789 }
 0xd94   : > { %7426 = vrcp.f32 %v2790_v19 }
 0xd9e   : > { %v7427_v20 = vpop.eup %7426 }
 0xd9f   : > { %v2792_v21 = vmul.f32 %v7427_v20, %v7425_v14 }
 0xda1   : > { %v2793_v23 = vpack.c.bf16 %v2792_v21, %v2792_v21 }
 0xda3   : > { %6706 = vmatmul.mubr.msk.bf16.vlgmr.msra.gmra.mrb[32].mxu1 %vm2440_vm6, %v2793_v23 }
 0xda4   : > { %6710 = vmatpush3.bf16.xpose.msra.mxu1 %v2849_v24  ;;  %6711 = vmatprep.mubr.msk.bf16.mxu1 %vm7709_vm2, %v7708_v0 }
 0xda5   : > { %6715 = vmatprep.subr.bf16.mxu1 %v7708_v0 }
 0xdab   : > { %6712 = vmatmul.mubr.msk.bf16.vlgmr.msra.gmra.mrb[36].mxu1 %vm2392_vm3, %v2842_v6 }
 0xdac   : > { %6716 = vmatpush3.bf16.msra.mxu1 %v2908_v26  ;;  %6717 = vmatprep.mubr.msk.bf16.mxu1 %vm7709_vm2, %v7708_v0 }
 0xdad   : > { %6721 = vmatprep.subr.bf16.mxu1 %v7708_v0 }
 0xe76   : > { %v8636_v27 = vpop.f32.mrb[32].mxu1 }
 0xe77   : > { %v6707_v29 = vpop.f32.mrb[33].mxu1 }
 0xe78   : > { %v2839_v32 = vpop.f32.mrb[34].mxu1 }
 0xe79   : > { %v6708_v34 = vpop.f32.mrb[35].mxu1 }
 0xe7e   : > { %v2885_v35 = vpop.f32.mrb[36].mxu1 }
 0xe7f   : > { %v2891_v36 = vsel %vm2388_vm5, %v2885_v35, -1e+30  ;;  %v6713_v37 = vpop.f32.mrb[37].mxu1 }
 0xe80   : > { %v2888_v38 = vpop.f32.mrb[38].mxu1  ;;  %v2892_v39 = vsel %vm2440_vm6, %v2891_v36, -inf }
 0xe81   : > { %2893 = vmax.xlane.f32.xlu1 %v2892_v39  ;;  %v6714_v40 = vpop.f32.mrb[39].mxu1 }
 0xf0e   : > { %v2894_v41 = vpop.xlane.xlu1 %2893 }
 0xf0f   : > { %v2895_v42 = vsub.f32 %v2891_v36, %v2894_v41 }
 0xf11   : > { %v2896_v44 = vmul.f32 1.442695, %v2895_v42 }
 0xf13   : > { %7428 = vpow2.f32 %v2896_v44 }
 0xf1d   : > { %v7429_v45 = vpop.eup %7428 }
 0xf1e   : > { %v2898_v46 = vsel %vm2440_vm6, %v7429_v45, 0.0 }
 0xf1f   : > { %2899 = vadd.xlane.f32.xlu1 %v2898_v46 }
 0xf30   : > { %2958 = vrot.lane.b32.xlu1 %v8642_v47, %s7710_s15 }
 0xfac   : > { %v2900_v48 = vpop.xlane.xlu1 %2899 }
 0xfad   : > { %7430 = vrcp.f32 %v2900_v48 }
 0xfb0   : > { %v2959_v51 = vpop.permute.xlu1 %2958 }
 0xfb1   : > { %v2964_v52 = vsel %vm2392_vm3, %v2959_v51, 0 }
 0xfb7   : > { %v7431_v49 = vpop.eup %7430 }
 0xfb8   : > { %v2902_v50 = vmul.f32 %v7431_v49, %v7429_v45 }
 0xfba   : > { %v2903_v28 = vpack.c.bf16 %v2902_v50, %v2902_v50 }
 0xfbc   : > { %6718 = vmatmul.mubr.msk.bf16.vlgmr.msra.gmra.mrb[40].mxu1 %vm2440_vm6, %v2903_v28 }
 0xfbd   : > { %6722 = vmatpush3.bf16.xpose.msra.mxu1 %v2964_v52  ;;  %6723 = vmatprep.mubr.msk.bf16.mxu1 %vm7709_vm2, %v7708_v0 }
 0xfbe   : > { %6727 = vmatprep.subr.bf16.mxu1 %v7708_v0 }
 0xfc4   : > { %6724 = vmatmul.mubr.msk.bf16.vlgmr.msra.gmra.mrb[44].mxu1 %vm2392_vm3, %v2954_v53 }
 0xfc5   : > { %6729 = vmatprep.mubr.msk.bf16.mxu1 %vm7709_vm2, %v7708_v0 }
0x108f   : > { %v8654_v13 = vpop.f32.mrb[40].mxu1 }
0x1090   : > { %v6719_v54 = vpop.f32.mrb[41].mxu1 }
0x1091   : > { %v2947_v55 = vpop.f32.mrb[42].mxu1 }
0x1092   : > { %v6720_v57 = vpop.f32.mrb[43].mxu1 }
0x1097   : > { %v3000_v58 = vpop.f32.mrb[44].mxu1 }
0x1098   : > { %v3006_v59 = vsel %vm2388_vm5, %v3000_v58, -1e+30  ;;  %v6725_v60 = vpop.f32.mrb[45].mxu1 }
0x1099   : > { %v3003_v61 = vpop.f32.mrb[46].mxu1  ;;  %v3007_v63 = vsel %vm2440_vm6, %v3006_v59, -inf }
0x109a   : > { %3008 = vmax.xlane.f32.xlu0 %v3007_v63  ;;  %v6726_v2 = vpop.f32.mrb[47].mxu1 }
0x10b0   : > { %3022 = vrot.lane.b32.xlu0 %v8659_v4, %s7710_s15 }
0x10b4   : > { %3070 = vrot.lane.b32.xlu0 %v8619_v7, %s7711_s13 }
0x1127   : > { %v3009_v5 = vpop.xlane.xlu0 %3008 }
0x1128   : > { %v3010_v6 = vsub.f32 %v3006_v59, %v3009_v5 }
0x112a   : > { %v3011_v8 = vmul.f32 1.442695, %v3010_v6 }
0x112b   : > { %v3023_v9 = vpop.permute.xlu0 %3022 }
0x112c   : > { %7432 = vpow2.f32 %v3011_v8  ;;  %v3028_v10 = vsel %vm2456_vm4, %v3023_v9, 0 }
0x112d   : > { %6728 = vmatpush3.bf16.msra.mxu1 %v3028_v10 }
0x112e   : > { %6733 = vmatprep.subr.bf16.mxu1 %v7708_v0 }
0x112f   : > { %v3071_v23 = vpop.permute.xlu0 %3070 }
0x1136   : > { %v7433_v11 = vpop.eup %7432 }
0x1137   : > { %v3013_v12 = vsel %vm2440_vm6, %v7433_v11, 0.0 }
0x1138   : > { %3014 = vadd.xlane.f32.xlu1 %v3013_v12 }
0x1149   : > { %3072 = vrot.lane.b32.xlu1 %v8642_v47, %s7711_s13 }
0x11c5   : > { %v3015_v14 = vpop.xlane.xlu1 %3014 }
0x11c6   : > { %7434 = vrcp.f32 %v3015_v14 }
0x11c9   : > { %v3073_v20 = vpop.permute.xlu1 %3072 }
0x11ca   : > { %v3078_v22 = vsel %vm2392_vm3, %v3073_v20, 0  ;;  %v7173_v20 = vld [vmem:[%s8071_s14 + $0x10] ss:$8 sps:$4 sm:$0xff]  }
0x11d0   : > { %v7435_v18 = vpop.eup %7434 }
0x11d1   : > { %v3017_v19 = vmul.f32 %v7435_v18, %v7433_v11  ;;  %v7170_v18 = vld [vmem:[%s8071_s14] ss:$8 sps:$4 sm:$0xff]  }
0x11d3   : > { %v3018_v21 = vpack.c.bf16 %v3017_v19, %v3017_v19  ;;  %v7172_v19 = vld [vmem:[%s8071_s14 + $0x4] ss:$8 sps:$4 sm:$0xff]  }
0x11d4   : > { %3518 = vmatprep.subr.bf16.mxu0 %v7172_v19  ;;  %v7462_v19 = vld [vmem:[#allocation2] sm:$0xff] }
0x11d5   : > { %6730 = vmatmul.mubr.msk.bf16.vlgmr.msra.gmra.mrb[48].mxu1 %vm2440_vm6, %v3018_v21  ;;  %3519 = vmatpush1.bf16.msra.mxu0 %v7170_v18  ;;  %v7178_v21 = vld [vmem:[%s8071_s14 + $0x24] ss:$8 sps:$4 sm:$0xff]  }
0x11d6   : > { %6734 = vmatpush3.bf16.xpose.msra.mxu1 %v3078_v22  ;;  %6735 = vmatprep.mubr.msk.bf16.mxu1 %vm7709_vm2, %v7708_v0  ;;  %v7176_v22 = vld [vmem:[%s8071_s14 + $0x20] ss:$8 sps:$4 sm:$0xff]  }
0x11d7   : > { %6739 = vmatprep.subr.bf16.mxu1 %v7708_v0 }
0x11dd   : > { %6736 = vmatmul.mubr.msk.bf16.vlgmr.msra.gmra.mrb[52].mxu1 %vm2392_vm3, %v3071_v23  ;;  %v7181_v23 = vld [vmem:[%s8071_s14 + $0x34] ss:$8 sps:$4 sm:$0xff]  }
0x11de   : > { %6741 = vmatprep.mubr.msk.bf16.mxu1 %vm7709_vm2, %v7708_v0 }
0x12a8   : > { %v3064_v24 = vpop.f32.mrb[48].mxu1 }
0x12a9   : > { %v7005_v25 = vpack.i.bf16 %v8590_v33, %v3064_v24  ;;  %v6731_v26 = vpop.f32.mrb[49].mxu1  ;;  %v7179_v24 = vld [vmem:[%s8071_s14 + $0x30] ss:$8 sps:$4 sm:$0xff]  }
0x12aa   : > { %v3067_v29 = vpop.f32.mrb[50].mxu1  ;;  %v7182_v26 = vld [vmem:[%s8071_s14 + $0x40] ss:$8 sps:$4 sm:$0xff]  }
0x12ab   : > { %v6732_v32 = vpop.f32.mrb[51].mxu1  ;;  %v7187_v29 = vld [vmem:[%s8071_s14 + $0x54] ss:$8 sps:$4 sm:$0xff]  }
0x12ac   : > { %v7185_v32 = vld [vmem:[%s8071_s14 + $0x50] ss:$8 sps:$4 sm:$0xff]  }
0x12b0   : > { %v3114_v34 = vpop.f32.mrb[52].mxu1 }
0x12b1   : > { %v3120_v35 = vsel %vm2388_vm5, %v3114_v34, -1e+30  ;;  %v6737_v36 = vpop.f32.mrb[53].mxu1  ;;  %v7190_v34 = vld [vmem:[%s8071_s14 + $0x64] ss:$8 sps:$4 sm:$0xff]  }
0x12b2   : > { %v3117_v37 = vpop.f32.mrb[54].mxu1  ;;  %v3121_v38 = vsel %vm2440_vm6, %v3120_v35, -inf  ;;  %v7193_v36 = vld [vmem:[%s8071_s14 + $0x74] ss:$8 sps:$4 sm:$0xff]  }
0x12b3   : > { %3122 = vmax.xlane.f32.xlu0 %v3121_v38  ;;  %v6738_v39 = vpop.f32.mrb[55].mxu1  ;;  %v7191_v37 = vld [vmem:[%s8071_s14 + $0x70] ss:$8 sps:$4 sm:$0xff]   ;;  %v7196_v38 = vld [vmem:[%s8071_s14 + $0x84] ss:$8 sps:$4 sm:$0xff]  }
0x12b4   : > { %v7194_v39 = vld [vmem:[%s8071_s14 + $0x80] ss:$8 sps:$4 sm:$0xff]  }
0x12c9   : > { %3133 = vrot.lane.b32.xlu0 %v8659_v4, %s7711_s13 }
0x12cd   : > { %3181 = vrot.lane.b32.xlu0 %v8619_v7, %s7712_s7 }
0x1340   : > { %v3123_v33 = vpop.xlane.xlu0 %3122 }
0x1341   : > { %v3124_v40 = vsub.f32 %v3120_v35, %v3123_v33  ;;  %v7188_v35 = vld [vmem:[%s8071_s14 + $0x60] ss:$8 sps:$4 sm:$0xff]   ;;  %v7199_v33 = vld [vmem:[%s8071_s14 + $0x94] ss:$8 sps:$4 sm:$0xff]  }
0x1343   : > { %v3125_v41 = vmul.f32 1.442695, %v3124_v40  ;;  %v7197_v40 = vld [vmem:[%s8071_s14 + $0x90] ss:$8 sps:$4 sm:$0xff]  }
0x1344   : > { %v3134_v42 = vpop.permute.xlu0 %3133 }
0x1345   : > { %7436 = vpow2.f32 %v3125_v41  ;;  %v3139_v44 = vsel %vm2456_vm4, %v3134_v42, 0  ;;  %v7202_v41 = vld [vmem:[%s8071_s14 + $0xa4] ss:$8 sps:$4 sm:$0xff]   ;;  %v7200_v42 = vld [vmem:[%s8071_s14 + $0xa0] ss:$8 sps:$4 sm:$0xff]  }
0x1346   : > { %6740 = vmatpush3.bf16.msra.mxu1 %v3139_v44  ;;  %v7205_v44 = vld [vmem:[%s8071_s14 + $0xb4] ss:$8 sps:$4 sm:$0xff]  }
0x1347   : > { %6745 = vmatprep.subr.bf16.mxu1 %v7708_v0 }
0x1348   : > { %v3182_v52 = vpop.permute.xlu0 %3181 }
0x134f   : > { %v7437_v45 = vpop.eup %7436 }
0x1350   : > { %v3127_v46 = vsel %vm2440_vm6, %v7437_v45, 0.0 }
0x1351   : > { %3128 = vadd.xlane.f32.xlu1 %v3127_v46  ;;  %v7208_v46 = vld [vmem:[%s8071_s14 + $0xc4] ss:$8 sps:$4 sm:$0xff]  }
0x1362   : > { %3183 = vrot.lane.b32.xlu1 %v8642_v47, %s7712_s7 }
0x13de   : > { %v3129_v48 = vpop.xlane.xlu1 %3128 }
0x13df   : > { %7438 = vrcp.f32 %v3129_v48  ;;  %v7206_v48 = vld [vmem:[%s8071_s14 + $0xc0] ss:$8 sps:$4 sm:$0xff]  }
0x13e2   : > { %v3184_v50 = vpop.permute.xlu1 %3183 }
0x13e3   : > { %v3189_v28 = vsel %vm2392_vm3, %v3184_v50, 0  ;;  %v7214_v50 = vld [vmem:[%s8071_s14 + $0xe4] ss:$8 sps:$4 sm:$0xff]  }
0x13e9   : > { %v7439_v7 = vpop.eup %7438 }
0x13ea   : > { %v3131_v49 = vmul.f32 %v7439_v7, %v7437_v45  ;;  %v7203_v45 = vld [vmem:[%s8071_s14 + $0xb0] ss:$8 sps:$4 sm:$0xff]   ;;  %v7211_v7 = vld [vmem:[%s8071_s14 + $0xd4] ss:$8 sps:$4 sm:$0xff]  }
0x13ec   : > { %v3132_v51 = vpack.c.bf16 %v3131_v49, %v3131_v49  ;;  %v7209_v49 = vld [vmem:[%s8071_s14 + $0xd0] ss:$8 sps:$4 sm:$0xff]  }
0x13ee   : > { %6742 = vmatmul.mubr.msk.bf16.vlgmr.msra.gmra.mrb[56].mxu1 %vm2440_vm6, %v3132_v51  ;;  %v7212_v51 = vld [vmem:[%s8071_s14 + $0xe0] ss:$8 sps:$4 sm:$0xff]  }
0x13ef   : > { %6746 = vmatpush3.bf16.xpose.msra.mxu1 %v3189_v28  ;;  %6747 = vmatprep.mubr.msk.bf16.mxu1 %vm7709_vm2, %v7708_v0  ;;  %v7217_v28 = vld [vmem:[%s8071_s14 + $0xf4] ss:$8 sps:$4 sm:$0xff]  }
0x13f0   : > { %6751 = vmatprep.subr.bf16.mxu1 %v7708_v0 }
0x13f6   : > { %6748 = vmatmul.mubr.msk.bf16.vlgmr.msra.gmra.mrb[60].mxu1 %vm2392_vm3, %v3182_v52  ;;  %v7215_v52 = vld [vmem:[%s8071_s14 + $0xf0] ss:$8 sps:$4 sm:$0xff]  }
0x13f7   : > { %6753 = vmatprep.mubr.msk.bf16.mxu1 %vm7709_vm2, %v7708_v0 }
0x14c1   : > { %v3175_v47 = vpop.f32.mrb[56].mxu1 }
0x14c2   : > { %v7010_v53 = vpack.i.bf16 %v8612_v56, %v3175_v47  ;;  %v6743_v54 = vpop.f32.mrb[57].mxu1 }
0x14c3   : > { %v3178_v55 = vpop.f32.mrb[58].mxu1 }
0x14c4   : > { %v6744_v57 = vpop.f32.mrb[59].mxu1 }
0x14c9   : > { %v3225_v58 = vpop.f32.mrb[60].mxu1 }
0x14ca   : > { %v3231_v59 = vsel %vm2388_vm5, %v3225_v58, -1e+30  ;;  %v6749_v60 = vpop.f32.mrb[61].mxu1 }
0x14cb   : > { %v3228_v61 = vpop.f32.mrb[62].mxu1  ;;  %v3232_v63 = vsel %vm2440_vm6, %v3231_v59, -inf }
0x14cc   : > { %3233 = vmax.xlane.f32.xlu1 %v3232_v63  ;;  %v6750_v2 = vpop.f32.mrb[63].mxu1 }
0x14dd   : > { %7006 = vrot.lane.b32.xlu1 %v7005_v25, %s7712_s7  ;;  %v7184_v25 = vld [vmem:[%s8071_s14 + $0x44] ss:$8 sps:$4 sm:$0xff]  }
0x14e1   : > { %7011 = vrot.lane.b32.xlu1 %v7010_v53, %s7711_s13 }
0x1559   : > { %v3234_v0 = vpop.xlane.xlu1 %3233 }
0x155a   : > { %v3235_v5 = vsub.f32 %v3231_v59, %v3234_v0 }
0x155c   : > { %v3236_v56 = vmul.f32 1.442695, %v3235_v5 }
0x155d   : > { %v7007_v58 = vpop.permute.xlu1 %7006 }
0x155e   : > { %7440 = vpow2.f32 %v3236_v56  ;;  %v7009_v60 = vunpack.i.h.bf16 %v7007_v58  ;;  %v7008_v61 = vunpack.i.l.bf16 %v7007_v58 }
0x1560   : > { %v3316_v5 = vsel %vm2392_vm3, %v8566_v62, %v7009_v60 }
0x1561   : > { %v7012_v59 = vpop.permute.xlu1 %7011 }
0x1562   : > { %v7014_v63 = vunpack.i.h.bf16 %v7012_v59  ;;  %v7013_v2 = vunpack.i.l.bf16 %v7012_v59 }
0x1568   : > { %v7441_v6 = vpop.eup %7440 }
0x1569   : > { %v3238_v43 = vsel %vm2440_vm6, %v7441_v6, 0.0 }
0x156a   : > { %3239 = vadd.xlane.f32.xlu0 %v3238_v43  ;;  %v3318_v43 = vsel %vm3317_vm7, %v3316_v5, %v7014_v63  ;;  %v3651_v63 = vld [vmem:[%s8118_s9 + $0x100] sm:$0xff]  ;;  %v3656_v5 = vld [vmem:[%s8118_s9 + $0x128] sm:$0xff] }
0x1580   : > { %3244 = vrot.lane.b32.xlu0 %v8659_v4, %s7712_s7  ;;  %v7175_v4 = vld [vmem:[%s8071_s14 + $0x14] ss:$8 sps:$4 sm:$0xff]  }
0x1581   : > { %3520 = vmatprep.subr.bf16.mxu0 %v7175_v4 }
0x1582   : > { %3521 = vmatpush1.bf16.msra.mxu0 %v7173_v20 }
0x1583   : > { %3522 = vmatprep.subr.bf16.mxu0 %v7178_v21  ;;  %v7463_v21 = vld [vmem:[#allocation2 + $0x8] sm:$0xff] }
0x1586   : > { %3523 = vmatpush1.bf16.msra.mxu0 %v7176_v22 }
0x1587   : > { %3524 = vmatprep.subr.bf16.mxu0 %v7181_v23 }
0x158a   : > { %3525 = vmatpush1.bf16.msra.mxu0 %v7179_v24 }
0x158b   : > { %3526 = vmatprep.subr.bf16.mxu0 %v7184_v25 }
0x158e   : > { %3527 = vmatpush1.bf16.msra.mxu0 %v7182_v26 }
0x158f   : > { %3528 = vmatprep.subr.bf16.mxu0 %v7187_v29 }
0x1592   : > { %3529 = vmatpush1.bf16.msra.mxu0 %v7185_v32  ;;  %v3619_v32 = vld [vmem:[%s8118_s9] sm:$0xff] }
0x1593   : > { %3530 = vmatprep.subr.bf16.mxu0 %v7190_v34  ;;  %v3623_v34 = vld [vmem:[%s8118_s9 + $0x20] sm:$0xff] }
0x1596   : > { %3531 = vmatpush1.bf16.msra.mxu0 %v7188_v35  ;;  %v3620_v35 = vld [vmem:[%s8118_s9 + $0x8] sm:$0xff] }
0x1597   : > { %3532 = vmatprep.subr.bf16.mxu0 %v7193_v36  ;;  %v6325_v36 = vcombine.low %v3619_v32, %v3623_v34 }
0x159a   : > { %3533 = vmatpush1.bf16.msra.mxu0 %v7191_v37  ;;  %v6326_v37 = vcombine.high %v3619_v32, %v3623_v34  ;;  %v3679_v32 = vld [vmem:[%s8118_s9 + $0x1e0] sm:$0xff]  ;;  %v3676_v34 = vld [vmem:[%s8118_s9 + $0x1c8] sm:$0xff] }
0x159b   : > { %3534 = vmatprep.subr.bf16.mxu0 %v7196_v38  ;;  %v3624_v38 = vld [vmem:[%s8118_s9 + $0x28] sm:$0xff] }
0x159e   : > { %3535 = vmatpush1.bf16.msra.mxu0 %v7194_v39  ;;  %v3627_v39 = vld [vmem:[%s8118_s9 + $0x40] sm:$0xff] }
0x159f   : > { %3536 = vmatprep.subr.bf16.mxu0 %v7199_v33  ;;  %v3631_v33 = vld [vmem:[%s8118_s9 + $0x60] sm:$0xff] }
0x15a2   : > { %3537 = vmatpush1.bf16.msra.mxu0 %v7197_v40  ;;  %v6327_v40 = vcombine.low %v3620_v35, %v3624_v38 }
0x15a3   : > { %3538 = vmatprep.subr.bf16.mxu0 %v7202_v41  ;;  %v6328_v41 = vcombine.high %v3620_v35, %v3624_v38  ;;  %v3680_v35 = vld [vmem:[%s8118_s9 + $0x1e8] sm:$0xff] }
0x15a6   : > { %3539 = vmatpush1.bf16.msra.mxu0 %v7200_v42  ;;  %v6334_v42 = vcombine.high %v3627_v39, %v3631_v33 }
0x15a7   : > { %3540 = vmatprep.subr.bf16.mxu0 %v7205_v44  ;;  %v3628_v44 = vld [vmem:[%s8118_s9 + $0x48] sm:$0xff] }
0x15aa   : > { %3541 = vmatpush1.bf16.msra.mxu0 %v7203_v45  ;;  %v3632_v45 = vld [vmem:[%s8118_s9 + $0x68] sm:$0xff] }
0x15ab   : > { %3542 = vmatprep.subr.bf16.mxu0 %v7208_v46  ;;  %v3635_v46 = vld [vmem:[%s8118_s9 + $0x80] sm:$0xff] }
0x15ae   : > { %3543 = vmatpush1.bf16.msra.mxu0 %v7206_v48  ;;  %v6336_v48 = vcombine.high %v3628_v44, %v3632_v45 }
0x15af   : > { %3544 = vmatprep.subr.bf16.mxu0 %v7211_v7  ;;  %v3639_v7 = vld [vmem:[%s8118_s9 + $0xa0] sm:$0xff] }
0x15b0   : > { %v6341_v58 = vcombine.low %v3635_v46, %v3639_v7 }
0x15b2   : > { %3545 = vmatpush1.bf16.msra.mxu0 %v7209_v49  ;;  %v3636_v49 = vld [vmem:[%s8118_s9 + $0x88] sm:$0xff] }
0x15b3   : > { %3546 = vmatprep.subr.bf16.mxu0 %v7214_v50  ;;  %v3640_v50 = vld [vmem:[%s8118_s9 + $0xa8] sm:$0xff] }
0x15b4   : > { %v6343_v59 = vcombine.low %v3636_v49, %v3640_v50 }
0x15b6   : > { %3547 = vmatpush1.bf16.msra.mxu0 %v7212_v51  ;;  %v6333_v51 = vcombine.low %v3627_v39, %v3631_v33  ;;  %v6384_v39 = vcombine.high %v3676_v34, %v3680_v35  ;;  %v3683_v33 = vld [vmem:[%s8118_s9 + $0x200] sm:$0xff] }
0x15b7   : > { %3548 = vmatprep.subr.bf16.mxu0 %v7217_v28  ;;  %v6335_v28 = vcombine.low %v3628_v44, %v3632_v45  ;;  %v6383_v45 = vcombine.low %v3676_v34, %v3680_v35  ;;  %v3723_v34 = vld [vmem:[%s8118_s9 + $0x340] sm:$0xff] }
0x15b8   : > { %v3727_v35 = vld [vmem:[%s8118_s9 + $0x360] sm:$0xff] }
0x15ba   : > { %3549 = vmatpush1.bf16.msra.mxu0 %v7215_v52  ;;  %v6342_v52 = vcombine.high %v3635_v46, %v3639_v7  ;;  %v3691_v7 = vld [vmem:[%s8118_s9 + $0x240] sm:$0xff] }
0x15bb   : > { %4472 = vmatprep.subr.bf16.mxu0 %v6328_v41  ;;  %v3684_v41 = vld [vmem:[%s8118_s9 + $0x208] sm:$0xff] }
0x15f7   : > { %v3240_v8 = vpop.xlane.xlu0 %3239 }
0x15f8   : > { %7442 = vrcp.f32 %v3240_v8 }
0x15fb   : > { %v3245_v9 = vpop.permute.xlu0 %3244 }
0x15fc   : > { %v3250_v10 = vsel %vm2456_vm4, %v3245_v9, 0 }
0x15fd   : > { %6752 = vmatpush3.bf16.msra.mxu1 %v3250_v10 }
0x15fe   : > { %4431 = vmatprep.subr.bf16.mxu1 %v6326_v37 }
0x1602   : > { %v7443_v11 = vpop.eup %7442 }
0x1603   : > { %v3242_v12 = vmul.f32 %v7443_v11, %v7441_v6 }
0x1605   : > { %v3243_v14 = vpack.c.bf16 %v3242_v12, %v3242_v12 }
0x1607   : > { %6754 = vmatmul.mubr.msk.bf16.vlgmr.msra.gmra.mrb[64].mxu1 %vm2440_vm6, %v3243_v14  ;;  %v3561_v14 = vld [vmem:[%s9317_s20] sm:$0x3]  ;;  %s9322_s20 = sld [smem:[#allocation41_spill]] (!%p6581_p12) }
0x1608   : > { %v3566_v62 = vrot.slane %v3561_v14, %v8463_v17  ;;  %v3570_v18 = vrot.slane %v3561_v14, %v8460_v16  ;;  %4432 = vmatpush1.bf16.msra.mxu1 %v6325_v36 }
0x1609   : > { %4433 = vmatprep.subr.bf16.mxu1 %v6334_v42  ;;  %v3688_v42 = vld [vmem:[%s8118_s9 + $0x228] sm:$0xff] }
0x160c   : > { %4434 = vmatpush1.bf16.msra.mxu1 %v6333_v51  ;;  %v3696_v51 = vld [vmem:[%s8118_s9 + $0x268] sm:$0xff] }
0x160d   : > { %4435 = vmatprep.subr.bf16.mxu1 %v6342_v52  ;;  %v6391_v52 = vcombine.low %v3684_v41, %v3688_v42 }
0x1610   : > { %4436 = vmatpush1.bf16.msra.mxu1 %v6341_v58  ;;  %v3704_v58 = vld [vmem:[%s8118_s9 + $0x2a8] sm:$0xff] }
0x16da   : > { %v3286_v47 = vpop.f32.mrb[64].mxu1 }
0x16db   : > { %v7015_v53 = vpack.i.bf16 %v8636_v27, %v3286_v47  ;;  %v6755_v54 = vpop.f32.mrb[65].mxu1  ;;  %v3321_v27 = vsel %vm2392_vm3, %v8654_v13, %v7008_v61  ;;  %v6344_v47 = vcombine.high %v3636_v49, %v3640_v50  ;;  %v3695_v49 = vld [vmem:[%s8118_s9 + $0x260] sm:$0xff]  ;;  %v3692_v50 = vld [vmem:[%s8118_s9 + $0x248] sm:$0xff] }
0x16dc   : > { %v3289_v55 = vpop.f32.mrb[66].mxu1  ;;  %v3322_v8 = vsel %vm3317_vm7, %v3321_v27, %v7013_v2  ;;  %v3647_v54 = vld [vmem:[%s8118_s9 + $0xe0] sm:$0xff] }
0x16dd   : > { %7016 = vrot.lane.b32.xlu0 %v7015_v53, %s7710_s15  ;;  %v6756_v57 = vpop.f32.mrb[67].mxu1  ;;  %v3643_v53 = vld [vmem:[%s8118_s9 + $0xc0] sm:$0xff]  ;;  %v3644_v55 = vld [vmem:[%s8118_s9 + $0xc8] sm:$0xff] }
0x16de   : > { %v3648_v57 = vld [vmem:[%s8118_s9 + $0xe8] sm:$0xff]  ;;  %v6350_v60 = vcombine.high %v3643_v53, %v3647_v54  ;;  %v3655_v2 = vld [vmem:[%s8118_s9 + $0x120] sm:$0xff]  ;;  %v6349_v27 = vcombine.low %v3643_v53, %v3647_v54  ;;  %v6400_v53 = vcombine.high %v3692_v50, %v3696_v51 }
0x16df   : > { %v6352_v61 = vcombine.high %v3644_v55, %v3648_v57  ;;  %v3699_v54 = vld [vmem:[%s8118_s9 + $0x280] sm:$0xff] }
0x16e0   : > { %4437 = vmatprep.subr.bf16.mxu1 %v6350_v60  ;;  %v6399_v60 = vcombine.low %v3692_v50, %v3696_v51  ;;  %v3739_v50 = vld [vmem:[%s8118_s9 + $0x3c0] sm:$0xff] }
0x16e1   : > { %4438 = vmatpush1.bf16.msra.mxu1 %v6349_v27  ;;  %v3743_v51 = vld [vmem:[%s8118_s9 + $0x3e0] sm:$0xff] }
0x174f   : > { %v7017_v0 = vpop.permute.xlu0 %7016 }
0x1750   : > { %v7019_v56 = vunpack.i.h.bf16 %v7017_v0  ;;  %v7018_v6 = vunpack.i.l.bf16 %v7017_v0  ;;  %v3652_v0 = vld [vmem:[%s8118_s9 + $0x108] sm:$0xff] }
0x1751   : > { %v6359_v14 = vcombine.low %v3652_v0, %v3656_v5 }
0x1752   : > { %v3320_v9 = vsel %vm3319_vm8, %v3318_v43, %v7019_v56  ;;  %v3323_v10 = vsel %vm3319_vm8, %v3322_v8, %v7018_v6  ;;  %v6351_v56 = vcombine.low %v3644_v55, %v3648_v57  ;;  %v6358_v6 = vcombine.high %v3651_v63, %v3655_v2  ;;  %v3659_v8 = vld [vmem:[%s8118_s9 + $0x140] sm:$0xff]  ;;  %v3700_v57 = vld [vmem:[%s8118_s9 + $0x288] sm:$0xff] }
0x1753   : > { %v3356_v11 = vpack.c.bf16 %v3320_v9, %v3320_v9  ;;  %v3357_v12 = vpack.c.bf16 %v3323_v10, %v3323_v10  ;;  %v6360_v43 = vcombine.high %v3652_v0, %v3656_v5  ;;  %v3663_v9 = vld [vmem:[%s8118_s9 + $0x160] sm:$0xff]  ;;  %v3660_v10 = vld [vmem:[%s8118_s9 + $0x148] sm:$0xff]  ;;  %v6407_v0 = vcombine.low %v3700_v57, %v3704_v58 }
0x1754   : > { %4439 = vmatprep.subr.bf16.mxu1 %v6358_v6  ;;  %v3703_v55 = vld [vmem:[%s8118_s9 + $0x2a0] sm:$0xff] }
0x1755   : > { %3550 = vmatprep.mubr.bf16.mxu0 %v3357_v12  ;;  %v6357_v12 = vcombine.low %v3651_v63, %v3655_v2  ;;  %v6408_v63 = vcombine.high %v3700_v57, %v3704_v58  ;;  %v6405_v2 = vcombine.low %v3699_v54, %v3703_v55  ;;  %v3621_v57 = vld [vmem:[%s8118_s9 + $0x10] sm:$0xff] }
0x1756   : > { %3551 = vmatmul.mubr.bf16.vlgmr.msra.gmra.mrb[8].mxu0 %v3356_v11  ;;  %v3664_v11 = vld [vmem:[%s8118_s9 + $0x168] sm:$0xff]  ;;  %v3625_v58 = vld [vmem:[%s8118_s9 + $0x30] sm:$0xff] }
0x1757   : > { %4473 = vmatpush1.bf16.msra.mxu0 %v6327_v40  ;;  %4440 = vmatpush1.bf16.msra.mxu1 %v6357_v12  ;;  %v3687_v40 = vld [vmem:[%s8118_s9 + $0x220] sm:$0xff]  ;;  %v3708_v12 = vld [vmem:[%s8118_s9 + $0x2c8] sm:$0xff] }
0x1758   : > { %4474 = vmatprep.subr.bf16.mxu0 %v6336_v48  ;;  %v6390_v46 = vcombine.high %v3683_v33, %v3687_v40  ;;  %v6392_v48 = vcombine.high %v3684_v41, %v3688_v42  ;;  %v3731_v41 = vld [vmem:[%s8118_s9 + $0x380] sm:$0xff] }
0x1759   : > { %v3735_v42 = vld [vmem:[%s8118_s9 + $0x3a0] sm:$0xff] }
0x175b   : > { %4475 = vmatpush1.bf16.msra.mxu0 %v6335_v28  ;;  %v6389_v28 = vcombine.low %v3683_v33, %v3687_v40 }
0x175c   : > { %4476 = vmatprep.subr.bf16.mxu0 %v6344_v47  ;;  %v6398_v47 = vcombine.high %v3691_v7, %v3695_v49 }
0x175f   : > { %4477 = vmatpush1.bf16.msra.mxu0 %v6343_v59  ;;  %v6397_v59 = vcombine.low %v3691_v7, %v3695_v49 }
0x1760   : > { %4478 = vmatprep.subr.bf16.mxu0 %v6352_v61  ;;  %v6406_v61 = vcombine.high %v3699_v54, %v3703_v55 }
0x1763   : > { %4479 = vmatpush1.bf16.msra.mxu0 %v6351_v56 }
0x1764   : > { %4480 = vmatprep.subr.bf16.mxu0 %v6360_v43 }
0x1767   : > { %4481 = vmatpush1.bf16.msra.mxu0 %v6359_v14 }
0x1829   : > { %v3552_v13 = vpop.f32.mrb[8].mxu0 }
0x182a   : > { %v3559_v4 = vadd.f32 %v7462_v19, %v3552_v13  ;;  %v3554_v20 = vpop.f32.mrb[9].mxu0  ;;  %v6368_v13 = vcombine.high %v3660_v10, %v3664_v11  ;;  %v3671_v19 = vld [vmem:[%s8118_s9 + $0x1a0] sm:$0xff] }
0x182b   : > { %v3560_v22 = vadd.f32 %v7463_v21, %v3554_v20  ;;  %v3556_v23 = vpop.f32.mrb[10].mxu0  ;;  %v3672_v20 = vld [vmem:[%s8118_s9 + $0x1a8] sm:$0xff]  ;;  %v6365_v21 = vcombine.low %v3659_v8, %v3663_v9 }
0x182c   : > { %v8755_v24 = vadd.f32 %v3566_v62, %v3559_v4  ;;  %v3557_v25 = vpop.f32.mrb[11].mxu0  ;;  %v6366_v62 = vcombine.high %v3659_v8, %v3663_v9  ;;  %v3668_v4 = vld [vmem:[%s8118_s9 + $0x188] sm:$0xff]  ;;  %4482 = vmatprep.subr.bf16.mxu0 %v6368_v13 }
0x182d   : > { %v8757_v26 = vadd.f32 %v3570_v18, %v3560_v22  ;;  %v3667_v18 = vld [vmem:[%s8118_s9 + $0x180] sm:$0xff]  ;;  %v6367_v22 = vcombine.low %v3660_v10, %v3664_v11  ;;  %v6376_v25 = vcombine.high %v3668_v4, %v3672_v20  ;;  %v6375_v37 = vcombine.low %v3668_v4, %v3672_v20 }
0x182e   : > { %4441 = vmatprep.subr.bf16.mxu1 %v6366_v62  ;;  %v6374_v23 = vcombine.high %v3667_v18, %v3671_v19  ;;  %v6373_v36 = vcombine.low %v3667_v18, %v3671_v19  ;;  %v3707_v10 = vld [vmem:[%s8118_s9 + $0x2c0] sm:$0xff]  ;;  %v3712_v62 = vld [vmem:[%s8118_s9 + $0x2e8] sm:$0xff] }
0x182f   : > { %v3577_v29 = vadd.f32 %v8757_v26, %v8755_v24  ;;  %4442 = vmatpush1.bf16.msra.mxu1 %v6365_v21  ;;  %4483 = vmatpush1.bf16.msra.mxu0 %v6367_v22  ;;  %v3711_v11 = vld [vmem:[%s8118_s9 + $0x2e0] sm:$0xff]  ;;  %v6415_v18 = vcombine.low %v3708_v12, %v3712_v62  ;;  %v6416_v19 = vcombine.high %v3708_v12, %v3712_v62  ;;  %v3716_v21 = vld [vmem:[%s8118_s9 + $0x308] sm:$0xff] }
0x1830   : > { %4443 = vmatprep.subr.bf16.mxu1 %v6374_v23  ;;  %4484 = vmatprep.subr.bf16.mxu0 %v6376_v25  ;;  %v6414_v14 = vcombine.high %v3707_v10, %v3711_v11  ;;  %v6413_v13 = vcombine.low %v3707_v10, %v3711_v11  ;;  %v3715_v4 = vld [vmem:[%s8118_s9 + $0x300] sm:$0xff]  ;;  %v3720_v23 = vld [vmem:[%s8118_s9 + $0x328] sm:$0xff] }
0x1831   : > { %3578 = vadd.xlane.f32.xlu1 %v3577_v29  ;;  %v3675_v29 = vld [vmem:[%s8118_s9 + $0x1c0] sm:$0xff] }
0x1832   : > { %v6382_v38 = vcombine.high %v3675_v29, %v3679_v32  ;;  %v6381_v44 = vcombine.low %v3675_v29, %v3679_v32  ;;  %v3719_v20 = vld [vmem:[%s8118_s9 + $0x320] sm:$0xff]  ;;  %v6423_v29 = vcombine.low %v3716_v21, %v3720_v23  ;;  %v6424_v32 = vcombine.high %v3716_v21, %v3720_v23  ;;  %v3633_v23 = vld [vmem:[%s8118_s9 + $0x70] sm:$0xff] }
0x1833   : > { %4444 = vmatpush1.bf16.msra.mxu1 %v6373_v36  ;;  %4485 = vmatpush1.bf16.msra.mxu0 %v6375_v37  ;;  %v6422_v22 = vcombine.high %v3715_v4, %v3719_v20  ;;  %v6421_v25 = vcombine.low %v3715_v4, %v3719_v20  ;;  %v3724_v36 = vld [vmem:[%s8118_s9 + $0x348] sm:$0xff]  ;;  %v6430_v37 = vcombine.high %v3723_v34, %v3727_v35 }
0x1834   : > { %4445 = vmatprep.subr.bf16.mxu1 %v6382_v38  ;;  %4486 = vmatprep.subr.bf16.mxu0 %v6384_v39  ;;  %v3728_v38 = vld [vmem:[%s8118_s9 + $0x368] sm:$0xff]  ;;  %v6429_v39 = vcombine.low %v3723_v34, %v3727_v35 }
0x1835   : > { %v6431_v33 = vcombine.low %v3724_v36, %v3728_v38  ;;  %v6432_v40 = vcombine.high %v3724_v36, %v3728_v38  ;;  %v3641_v36 = vld [vmem:[%s8118_s9 + $0xb0] sm:$0xff]  ;;  %v3642_v38 = vld [vmem:[%s8118_s9 + $0xb8] sm:$0xff] }
0x1837   : > { %4446 = vmatpush1.bf16.msra.mxu1 %v6381_v44  ;;  %4487 = vmatpush1.bf16.msra.mxu0 %v6383_v45  ;;  %v3732_v44 = vld [vmem:[%s8118_s9 + $0x388] sm:$0xff]  ;;  %v6438_v45 = vcombine.high %v3731_v41, %v3735_v42 }
0x1838   : > { %4447 = vmatprep.subr.bf16.mxu1 %v6390_v46  ;;  %4488 = vmatprep.subr.bf16.mxu0 %v6392_v48  ;;  %v3736_v46 = vld [vmem:[%s8118_s9 + $0x3a8] sm:$0xff]  ;;  %v6437_v48 = vcombine.low %v3731_v41, %v3735_v42  ;;  %v3645_v42 = vld [vmem:[%s8118_s9 + $0xd0] sm:$0xff] }
0x1839   : > { %v6439_v7 = vcombine.low %v3732_v44, %v3736_v46  ;;  %v6440_v49 = vcombine.high %v3732_v44, %v3736_v46  ;;  %v3649_v44 = vld [vmem:[%s8118_s9 + $0xf0] sm:$0xff]  ;;  %v3650_v46 = vld [vmem:[%s8118_s9 + $0xf8] sm:$0xff] }
0x183b   : > { %4448 = vmatpush1.bf16.msra.mxu1 %v6389_v28  ;;  %4489 = vmatpush1.bf16.msra.mxu0 %v6391_v52  ;;  %v3740_v28 = vld [vmem:[%s8118_s9 + $0x3c8] sm:$0xff]  ;;  %v6446_v52 = vcombine.high %v3739_v50, %v3743_v51 }
0x183c   : > { %4449 = vmatprep.subr.bf16.mxu1 %v6398_v47  ;;  %4490 = vmatprep.subr.bf16.mxu0 %v6400_v53  ;;  %v3744_v47 = vld [vmem:[%s8118_s9 + $0x3e8] sm:$0xff]  ;;  %v6445_v53 = vcombine.low %v3739_v50, %v3743_v51  ;;  %v3653_v51 = vld [vmem:[%s8118_s9 + $0x110] sm:$0xff] }
0x183d   : > { %v6448_v54 = vcombine.high %v3740_v28, %v3744_v47  ;;  %v6447_v55 = vcombine.low %v3740_v28, %v3744_v47  ;;  %v3657_v28 = vld [vmem:[%s8118_s9 + $0x130] sm:$0xff]  ;;  %v3658_v47 = vld [vmem:[%s8118_s9 + $0x138] sm:$0xff] }
0x183f   : > { %4450 = vmatpush1.bf16.msra.mxu1 %v6397_v59  ;;  %4491 = vmatpush1.bf16.msra.mxu0 %v6399_v60  ;;  %v3622_v59 = vld [vmem:[%s8118_s9 + $0x18] sm:$0xff]  ;;  %v6330_v60 = vcombine.high %v3621_v57, %v3625_v58 }
0x1840   : > { %4451 = vmatprep.subr.bf16.mxu1 %v6406_v61  ;;  %4492 = vmatprep.subr.bf16.mxu0 %v6408_v63  ;;  %v3626_v61 = vld [vmem:[%s8118_s9 + $0x38] sm:$0xff]  ;;  %v6329_v63 = vcombine.low %v3621_v57, %v3625_v58  ;;  %v3661_v58 = vld [vmem:[%s8118_s9 + $0x150] sm:$0xff] }
0x1843   : > { %4452 = vmatpush1.bf16.msra.mxu1 %v6405_v2  ;;  %4493 = vmatpush1.bf16.msra.mxu0 %v6407_v0  ;;  %v6331_v2 = vcombine.low %v3622_v59, %v3626_v61  ;;  %v6332_v0 = vcombine.high %v3622_v59, %v3626_v61  ;;  %v3665_v59 = vld [vmem:[%s8118_s9 + $0x170] sm:$0xff]  ;;  %v3666_v61 = vld [vmem:[%s8118_s9 + $0x178] sm:$0xff] }
0x1844   : > { %4453 = vmatprep.subr.bf16.mxu1 %v6414_v14  ;;  %4494 = vmatprep.subr.bf16.mxu0 %v6416_v19 }
0x1847   : > { %4454 = vmatpush1.bf16.msra.mxu1 %v6413_v13  ;;  %4495 = vmatpush1.bf16.msra.mxu0 %v6415_v18 }
0x1848   : > { %4455 = vmatprep.subr.bf16.mxu1 %v6422_v22  ;;  %4496 = vmatprep.subr.bf16.mxu0 %v6424_v32  ;;  %v3629_v22 = vld [vmem:[%s8118_s9 + $0x50] sm:$0xff] }
0x184b   : > { %4456 = vmatpush1.bf16.msra.mxu1 %v6421_v25  ;;  %4497 = vmatpush1.bf16.msra.mxu0 %v6423_v29  ;;  %v3630_v25 = vld [vmem:[%s8118_s9 + $0x58] sm:$0xff] }
0x184c   : > { %4457 = vmatprep.subr.bf16.mxu1 %v6430_v37  ;;  %4498 = vmatprep.subr.bf16.mxu0 %v6432_v40  ;;  %v3634_v29 = vld [vmem:[%s8118_s9 + $0x78] sm:$0xff] }
0x184d   : > { %v6340_v35 = vcombine.high %v3630_v25, %v3634_v29  ;;  %v3638_v37 = vld [vmem:[%s8118_s9 + $0x98] sm:$0xff] }
0x184e   : > { %v6348_v41 = vcombine.high %v3638_v37, %v3642_v38 }
0x184f   : > { %4458 = vmatpush1.bf16.msra.mxu1 %v6429_v39  ;;  %4499 = vmatpush1.bf16.msra.mxu0 %v6431_v33  ;;  %v6337_v39 = vcombine.low %v3629_v22, %v3633_v23  ;;  %v6339_v33 = vcombine.low %v3630_v25, %v3634_v29  ;;  %v3689_v25 = vld [vmem:[%s8118_s9 + $0x230] sm:$0xff]  ;;  %v3686_v29 = vld [vmem:[%s8118_s9 + $0x218] sm:$0xff] }
0x1850   : > { %4459 = vmatprep.subr.bf16.mxu1 %v6438_v45  ;;  %4500 = vmatprep.subr.bf16.mxu0 %v6440_v49  ;;  %v3646_v45 = vld [vmem:[%s8118_s9 + $0xd8] sm:$0xff]  ;;  %v6354_v49 = vcombine.high %v3645_v42, %v3649_v44 }
0x1851   : > { %v6356_v50 = vcombine.high %v3646_v45, %v3650_v46 }
0x1853   : > { %4460 = vmatpush1.bf16.msra.mxu1 %v6437_v48  ;;  %4501 = vmatpush1.bf16.msra.mxu0 %v6439_v7  ;;  %v6347_v7 = vcombine.low %v3638_v37, %v3642_v38  ;;  %v3693_v37 = vld [vmem:[%s8118_s9 + $0x250] sm:$0xff] }
0x1854   : > { %4461 = vmatprep.subr.bf16.mxu1 %v6446_v52  ;;  %4502 = vmatprep.subr.bf16.mxu0 %v6448_v54  ;;  %v3654_v52 = vld [vmem:[%s8118_s9 + $0x118] sm:$0xff]  ;;  %v6355_v54 = vcombine.low %v3646_v45, %v3650_v46  ;;  %v3697_v38 = vld [vmem:[%s8118_s9 + $0x270] sm:$0xff] }
0x1855   : > { %v6364_v57 = vcombine.high %v3654_v52, %v3658_v47  ;;  %v3701_v45 = vld [vmem:[%s8118_s9 + $0x290] sm:$0xff] }
0x1856   : > { %v3705_v46 = vld [vmem:[%s8118_s9 + $0x2b0] sm:$0xff] }
0x1857   : > { %4462 = vmatpush1.bf16.msra.mxu1 %v6445_v53  ;;  %4503 = vmatpush1.bf16.msra.mxu0 %v6447_v55  ;;  %v6353_v53 = vcombine.low %v3645_v42, %v3649_v44  ;;  %v6362_v55 = vcombine.high %v3653_v51, %v3657_v28  ;;  %v6402_v42 = vcombine.high %v3693_v37, %v3697_v38 }
0x1858   : > { %4513 = vmatprep.subr.bf16.mxu1 %v6330_v60  ;;  %4554 = vmatprep.subr.bf16.mxu0 %v6332_v0  ;;  %v3662_v60 = vld [vmem:[%s8118_s9 + $0x158] sm:$0xff]  ;;  %v6370_v0 = vcombine.high %v3661_v58, %v3665_v59 }
0x18be   : > { %v3579_v5 = vpop.xlane.xlu1 %3578 }
0x18bf   : > { %v3580_v27 = vmul.f32 0.00390625, %v3579_v5 }
0x18c1   : > { %v8806_v56 = vsub.f32 %v8755_v24, %v3580_v27  ;;  %v8809_v6 = vsub.f32 %v8757_v26, %v3580_v27 }
0x18c3   : > { %v3583_v43 = vmul.f32 %v8806_v56, %v8806_v56  ;;  %v3584_v8 = vmul.f32 %v8809_v6, %v8809_v6 }
0x18c5   : > { %v3585_v9 = vadd.f32 %v3584_v8, %v3583_v43  ;;  %v3575_v8 = vld [vmem:[%s9318_s2] sm:$0x3]  ;;  %s9323_s2 = sld [smem:[#allocation42_spill]] (!%p6581_p12) }
0x18c6   : > { %v3601_v10 = vrot.slane %v3575_v8, %v8460_v16  ;;  %v3597_v11 = vrot.slane %v3575_v8, %v8463_v17  ;;  %v3670_v8 = vld [vmem:[%s8118_s9 + $0x198] sm:$0xff] }
0x18c7   : > { %3586 = vadd.xlane.f32.xlu0 %v3585_v9  ;;  %v3576_v9 = vld [vmem:[%s925_s27] sm:$0x3] }
0x18c8   : > { %v3614_v13 = vrot.slane %v3576_v9, %v8460_v16  ;;  %v3610_v18 = vrot.slane %v3576_v9, %v8463_v17  ;;  %v3674_v9 = vld [vmem:[%s8118_s9 + $0x1b8] sm:$0xff] }
0x1954   : > { %v3587_v5 = vpop.xlane.xlu0 %3586 }
0x1955   : > { %v3588_v27 = vmul.f32 0.00390625, %v3587_v5  ;;  %v6372_v5 = vcombine.high %v3662_v60, %v3666_v61 }
0x1957   : > { %v3589_v43 = vadd.f32 1e-06, %v3588_v27  ;;  %v3669_v27 = vld [vmem:[%s8118_s9 + $0x190] sm:$0xff] }
0x1959   : > { %7444 = vrsqrt.f32 %v3589_v43  ;;  %v3673_v43 = vld [vmem:[%s8118_s9 + $0x1b0] sm:$0xff] }
0x1963   : > { %v7445_v12 = vpop.eup %7444 }
0x1964   : > { %v3591_v14 = vmul.f32 %v7445_v12, %v8806_v56  ;;  %v3592_v62 = vmul.f32 %v7445_v12, %v8809_v6  ;;  %v3637_v56 = vld [vmem:[%s8118_s9 + $0x90] sm:$0xff]  ;;  %v6338_v6 = vcombine.high %v3629_v22, %v3633_v23  ;;  %v6378_v12 = vcombine.high %v3669_v27, %v3673_v43 }
0x1965   : > { %v6346_v40 = vcombine.high %v3637_v56, %v3641_v36  ;;  %v6345_v48 = vcombine.low %v3637_v56, %v3641_v36  ;;  %v3685_v23 = vld [vmem:[%s8118_s9 + $0x210] sm:$0xff] }
0x1966   : > { %v3605_v19 = vmul.f32 %v3601_v10, %v3592_v62  ;;  %v3604_v4 = vmul.f32 %v3597_v11, %v3591_v14  ;;  %v6369_v10 = vcombine.low %v3661_v58, %v3665_v59  ;;  %v6371_v11 = vcombine.low %v3662_v60, %v3666_v61  ;;  %v3677_v62 = vld [vmem:[%s8118_s9 + $0x1d0] sm:$0xff] }
0x1967   : > { %v6380_v14 = vcombine.high %v3670_v8, %v3674_v9  ;;  %v3717_v60 = vld [vmem:[%s8118_s9 + $0x310] sm:$0xff] }
0x1968   : > { %v3618_v20 = vadd.f32 %v3614_v13, %v3605_v19  ;;  %v3617_v21 = vadd.f32 %v3610_v18, %v3604_v4  ;;  %v3681_v13 = vld [vmem:[%s8118_s9 + $0x1f0] sm:$0xff]  ;;  %v3678_v18 = vld [vmem:[%s8118_s9 + $0x1d8] sm:$0xff]  ;;  %v6377_v4 = vcombine.low %v3669_v27, %v3673_v43 }
0x1969   : > { %v3682_v19 = vld [vmem:[%s8118_s9 + $0x1f8] sm:$0xff]  ;;  %v6385_v56 = vcombine.low %v3677_v62, %v3681_v13  ;;  %v3721_v61 = vld [vmem:[%s8118_s9 + $0x330] sm:$0xff] }
0x196a   : > { %v3748_v32 = vpack.c.bf16 %v3618_v20, %v3618_v20  ;;  %v8859_v34 = vpack.c.bf16 %v3617_v21, %v3617_v21  ;;  %v6379_v20 = vcombine.low %v3670_v8, %v3674_v9  ;;  %v6386_v21 = vcombine.high %v3677_v62, %v3681_v13  ;;  %v3725_v8 = vld [vmem:[%s8118_s9 + $0x350] sm:$0xff] }
0x196b   : > { %v6388_v22 = vcombine.high %v3678_v18, %v3682_v19  ;;  %v6426_v27 = vcombine.high %v3717_v60, %v3721_v61  ;;  %v3729_v9 = vld [vmem:[%s8118_s9 + $0x370] sm:$0xff] }
0x196c   : > { %4463 = vmatprep.mubr.bf16.mxu1 %v3748_v32  ;;  %4504 = vmatprep.mubr.bf16.mxu0 %v3748_v32  ;;  %v6434_v62 = vcombine.high %v3725_v8, %v3729_v9 }
0x196d   : > { %4464 = vmatmul.mubr.bf16.vlgmr.msra.gmra.mrb[68].mxu1 %v8859_v34  ;;  %4505 = vmatmul.mubr.bf16.vlgmr.msra.gmra.mrb[12].mxu0 %v8859_v34 }
0x196e   : > { %4514 = vmatpush1.bf16.msra.mxu1 %v6329_v63  ;;  %4555 = vmatpush1.bf16.msra.mxu0 %v6331_v2  ;;  %v6361_v63 = vcombine.low %v3653_v51, %v3657_v28  ;;  %v6363_v2 = vcombine.low %v3654_v52, %v3658_v47  ;;  %v6410_v51 = vcombine.high %v3701_v45, %v3705_v46  ;;  %v3709_v52 = vld [vmem:[%s8118_s9 + $0x2d0] sm:$0xff] }
0x196f   : > { %4545 = vmatprep.mubr.bf16.mxu1 %v3748_v32  ;;  %4586 = vmatprep.mubr.bf16.mxu0 %v3748_v32  ;;  %v3690_v32 = vld [vmem:[%s8118_s9 + $0x238] sm:$0xff]  ;;  %v3713_v47 = vld [vmem:[%s8118_s9 + $0x2f0] sm:$0xff] }
0x1970   : > { %4515 = vmatprep.subr.bf16.mxu1 %v6338_v6  ;;  %4556 = vmatprep.subr.bf16.mxu0 %v6340_v35  ;;  %v6387_v6 = vcombine.low %v3678_v18, %v3682_v19  ;;  %v6394_v35 = vcombine.high %v3685_v23, %v3689_v25  ;;  %v6396_v36 = vcombine.high %v3686_v29, %v3690_v32  ;;  %v3733_v18 = vld [vmem:[%s8118_s9 + $0x390] sm:$0xff] }
0x1971   : > { %v6418_v58 = vcombine.high %v3709_v52, %v3713_v47  ;;  %v3737_v19 = vld [vmem:[%s8118_s9 + $0x3b0] sm:$0xff] }
0x1972   : > { %4516 = vmatpush1.bf16.msra.mxu1 %v6337_v39  ;;  %4557 = vmatpush1.bf16.msra.mxu0 %v6339_v33  ;;  %v3694_v39 = vld [vmem:[%s8118_s9 + $0x258] sm:$0xff] }
0x1973   : > { %4517 = vmatprep.subr.bf16.mxu1 %v6346_v40  ;;  %4558 = vmatprep.subr.bf16.mxu0 %v6348_v41  ;;  %v3698_v33 = vld [vmem:[%s8118_s9 + $0x278] sm:$0xff]  ;;  %v6393_v40 = vcombine.low %v3685_v23, %v3689_v25  ;;  %v6395_v41 = vcombine.low %v3686_v29, %v3690_v32  ;;  %v6442_v23 = vcombine.high %v3733_v18, %v3737_v19  ;;  %v3741_v29 = vld [vmem:[%s8118_s9 + $0x3d0] sm:$0xff] }
0x1974   : > { %v6404_v44 = vcombine.high %v3694_v39, %v3698_v33  ;;  %v3745_v32 = vld [vmem:[%s8118_s9 + $0x3f0] sm:$0xff] }
0x1976   : > { %4518 = vmatpush1.bf16.msra.mxu1 %v6345_v48  ;;  %4559 = vmatpush1.bf16.msra.mxu0 %v6347_v7  ;;  %v3702_v48 = vld [vmem:[%s8118_s9 + $0x298] sm:$0xff] }
0x1977   : > { %4519 = vmatprep.subr.bf16.mxu1 %v6354_v49  ;;  %4560 = vmatprep.subr.bf16.mxu0 %v6356_v50  ;;  %v3706_v7 = vld [vmem:[%s8118_s9 + $0x2b8] sm:$0xff]  ;;  %v6401_v49 = vcombine.low %v3693_v37, %v3697_v38  ;;  %v6403_v50 = vcombine.low %v3694_v39, %v3698_v33  ;;  %v6450_v37 = vcombine.high %v3741_v29, %v3745_v32 }
0x1978   : > { %v6412_v28 = vcombine.high %v3702_v48, %v3706_v7  ;;  %v6449_v39 = vcombine.low %v3741_v29, %v3745_v32  ;;  %v7289_v29 = vld [vmem:[%s8129_s30 + $0x1b4] ss:$8 sps:$4 sm:$0xff]   ;;  %v7284_v32 = vld [vmem:[%s8129_s30 + $0xb0] ss:$8 sps:$4 sm:$0xff]  }
0x197a   : > { %4520 = vmatpush1.bf16.msra.mxu1 %v6353_v53  ;;  %4561 = vmatpush1.bf16.msra.mxu0 %v6355_v54  ;;  %v3710_v53 = vld [vmem:[%s8118_s9 + $0x2d8] sm:$0xff] }
0x197b   : > { %4521 = vmatprep.subr.bf16.mxu1 %v6362_v55  ;;  %4562 = vmatprep.subr.bf16.mxu0 %v6364_v57  ;;  %v3714_v54 = vld [vmem:[%s8118_s9 + $0x2f8] sm:$0xff]  ;;  %v6409_v55 = vcombine.low %v3701_v45, %v3705_v46  ;;  %v6411_v57 = vcombine.low %v3702_v48, %v3706_v7 }
0x197c   : > { %v6420_v59 = vcombine.high %v3710_v53, %v3714_v54  ;;  %v7226_v45 = vld [vmem:[%s8129_s30 + $0x14] ss:$8 sps:$4 sm:$0xff]   ;;  %v7224_v48 = vld [vmem:[%s8129_s30 + $0x10] ss:$8 sps:$4 sm:$0xff]  }
0x197d   : > { %v7229_v46 = vld [vmem:[%s8129_s30 + $0x114] ss:$8 sps:$4 sm:$0xff]   ;;  %v7227_v7 = vld [vmem:[%s8129_s30 + $0x110] ss:$8 sps:$4 sm:$0xff]  }
0x197e   : > { %4522 = vmatpush1.bf16.msra.mxu1 %v6361_v63  ;;  %4563 = vmatpush1.bf16.msra.mxu0 %v6363_v2  ;;  %v3718_v63 = vld [vmem:[%s8118_s9 + $0x318] sm:$0xff] }
0x197f   : > { %4523 = vmatprep.subr.bf16.mxu1 %v6370_v0  ;;  %4564 = vmatprep.subr.bf16.mxu0 %v6372_v5  ;;  %v3722_v2 = vld [vmem:[%s8118_s9 + $0x338] sm:$0xff]  ;;  %v6417_v0 = vcombine.low %v3709_v52, %v3713_v47  ;;  %v6419_v5 = vcombine.low %v3710_v53, %v3714_v54  ;;  %v7244_v54 = vld [vmem:[%s8129_s30 + $0x44] ss:$8 sps:$4 sm:$0xff]  }
0x1980   : > { %v6428_v43 = vcombine.high %v3718_v63, %v3722_v2  ;;  %v7241_v52 = vld [vmem:[%s8129_s30 + $0x134] ss:$8 sps:$4 sm:$0xff]   ;;  %v7236_v47 = vld [vmem:[%s8129_s30 + $0x30] ss:$8 sps:$4 sm:$0xff]  }
0x1981   : > { %v7239_v53 = vld [vmem:[%s8129_s30 + $0x130] ss:$8 sps:$4 sm:$0xff]  }
0x1982   : > { %4524 = vmatpush1.bf16.msra.mxu1 %v6369_v10  ;;  %4565 = vmatpush1.bf16.msra.mxu0 %v6371_v11  ;;  %v3726_v10 = vld [vmem:[%s8118_s9 + $0x358] sm:$0xff] }
0x1983   : > { %4525 = vmatprep.subr.bf16.mxu1 %v6378_v12  ;;  %4566 = vmatprep.subr.bf16.mxu0 %v6380_v14  ;;  %v3730_v11 = vld [vmem:[%s8118_s9 + $0x378] sm:$0xff]  ;;  %v6425_v12 = vcombine.low %v3717_v60, %v3721_v61  ;;  %v6427_v14 = vcombine.low %v3718_v63, %v3722_v2  ;;  %v7256_v2 = vld [vmem:[%s8129_s30 + $0x64] ss:$8 sps:$4 sm:$0xff]  }
0x1984   : > { %v6436_v13 = vcombine.high %v3726_v10, %v3730_v11  ;;  %v7253_v60 = vld [vmem:[%s8129_s30 + $0x154] ss:$8 sps:$4 sm:$0xff]   ;;  %v7248_v61 = vld [vmem:[%s8129_s30 + $0x50] ss:$8 sps:$4 sm:$0xff]  }
0x1985   : > { %v7251_v63 = vld [vmem:[%s8129_s30 + $0x150] ss:$8 sps:$4 sm:$0xff]  }
0x1986   : > { %4526 = vmatpush1.bf16.msra.mxu1 %v6377_v4  ;;  %4567 = vmatpush1.bf16.msra.mxu0 %v6379_v20  ;;  %v3734_v4 = vld [vmem:[%s8118_s9 + $0x398] sm:$0xff] }
0x1987   : > { %4527 = vmatprep.subr.bf16.mxu1 %v6386_v21  ;;  %4568 = vmatprep.subr.bf16.mxu0 %v6388_v22  ;;  %v3738_v20 = vld [vmem:[%s8118_s9 + $0x3b8] sm:$0xff]  ;;  %v6433_v21 = vcombine.low %v3725_v8, %v3729_v9  ;;  %v6435_v22 = vcombine.low %v3726_v10, %v3730_v11  ;;  %v7268_v11 = vld [vmem:[%s8129_s30 + $0x84] ss:$8 sps:$4 sm:$0xff]  }
0x1988   : > { %v6444_v25 = vcombine.high %v3734_v4, %v3738_v20  ;;  %v7265_v8 = vld [vmem:[%s8129_s30 + $0x174] ss:$8 sps:$4 sm:$0xff]   ;;  %v7260_v9 = vld [vmem:[%s8129_s30 + $0x70] ss:$8 sps:$4 sm:$0xff]  }
0x1989   : > { %v7263_v10 = vld [vmem:[%s8129_s30 + $0x170] ss:$8 sps:$4 sm:$0xff]  }
0x198a   : > { %4528 = vmatpush1.bf16.msra.mxu1 %v6385_v56  ;;  %4569 = vmatpush1.bf16.msra.mxu0 %v6387_v6  ;;  %v3742_v56 = vld [vmem:[%s8118_s9 + $0x3d8] sm:$0xff] }
0x198b   : > { %4529 = vmatprep.subr.bf16.mxu1 %v6394_v35  ;;  %4570 = vmatprep.subr.bf16.mxu0 %v6396_v36  ;;  %v3746_v6 = vld [vmem:[%s8118_s9 + $0x3f8] sm:$0xff]  ;;  %v6441_v35 = vcombine.low %v3733_v18, %v3737_v19  ;;  %v6443_v36 = vcombine.low %v3734_v4, %v3738_v20  ;;  %v7280_v20 = vld [vmem:[%s8129_s30 + $0xa4] ss:$8 sps:$4 sm:$0xff]   ;;  %s9324_s9 = sld [smem:[#allocation44_spill]] (!%p6581_p12) }
0x198c   : > { %v6452_v38 = vcombine.high %v3742_v56, %v3746_v6  ;;  %v6451_v33 = vcombine.low %v3742_v56, %v3746_v6  ;;  %v7277_v18 = vld [vmem:[%s8129_s30 + $0x194] ss:$8 sps:$4 sm:$0xff]   ;;  %v7272_v19 = vld [vmem:[%s8129_s30 + $0x90] ss:$8 sps:$4 sm:$0xff]   ;;  %v7292_v6 = vld [vmem:[%s8129_s30 + $0xc4] ss:$8 sps:$4 sm:$0xff]  }
0x198d   : > { %v7275_v4 = vld [vmem:[%s8129_s30 + $0x190] ss:$8 sps:$4 sm:$0xff]  }
0x198e   : > { %4530 = vmatpush1.bf16.msra.mxu1 %v6393_v40  ;;  %4571 = vmatpush1.bf16.msra.mxu0 %v6395_v41  ;;  %v7220_v40 = vld [vmem:[%s8129_s30 + $0x4] ss:$8 sps:$4 sm:$0xff]   ;;  %v7287_v56 = vld [vmem:[%s8129_s30 + $0x1b0] ss:$8 sps:$4 sm:$0xff]  }
0x198f   : > { %4531 = vmatprep.subr.bf16.mxu1 %v6402_v42  ;;  %4572 = vmatprep.subr.bf16.mxu0 %v6404_v44  ;;  %v7223_v41 = vld [vmem:[%s8129_s30 + $0x104] ss:$8 sps:$4 sm:$0xff]   ;;  %v7218_v42 = vld [vmem:[%s8129_s30] ss:$8 sps:$4 sm:$0xff]  }
0x1990   : > { %v7221_v44 = vld [vmem:[%s8129_s30 + $0x100] ss:$8 sps:$4 sm:$0xff]  }
0x1992   : > { %4532 = vmatpush1.bf16.msra.mxu1 %v6401_v49  ;;  %4573 = vmatpush1.bf16.msra.mxu0 %v6403_v50  ;;  %v7232_v49 = vld [vmem:[%s8129_s30 + $0x24] ss:$8 sps:$4 sm:$0xff]  }
0x1993   : > { %4533 = vmatprep.subr.bf16.mxu1 %v6410_v51  ;;  %4574 = vmatprep.subr.bf16.mxu0 %v6412_v28  ;;  %v7235_v50 = vld [vmem:[%s8129_s30 + $0x124] ss:$8 sps:$4 sm:$0xff]   ;;  %v7230_v51 = vld [vmem:[%s8129_s30 + $0x20] ss:$8 sps:$4 sm:$0xff]  }
0x1994   : > { %v7233_v28 = vld [vmem:[%s8129_s30 + $0x120] ss:$8 sps:$4 sm:$0xff]  }
0x1996   : > { %4534 = vmatpush1.bf16.msra.mxu1 %v6409_v55  ;;  %4575 = vmatpush1.bf16.msra.mxu0 %v6411_v57  ;;  %v7247_v55 = vld [vmem:[%s8129_s30 + $0x144] ss:$8 sps:$4 sm:$0xff]   ;;  %v7242_v57 = vld [vmem:[%s8129_s30 + $0x40] ss:$8 sps:$4 sm:$0xff]  }
0x1997   : > { %4535 = vmatprep.subr.bf16.mxu1 %v6418_v58  ;;  %4576 = vmatprep.subr.bf16.mxu0 %v6420_v59  ;;  %v7245_v58 = vld [vmem:[%s8129_s30 + $0x140] ss:$8 sps:$4 sm:$0xff]   ;;  %v7250_v59 = vld [vmem:[%s8129_s30 + $0x54] ss:$8 sps:$4 sm:$0xff]  }
0x199a   : > { %4536 = vmatpush1.bf16.msra.mxu1 %v6417_v0  ;;  %4577 = vmatpush1.bf16.msra.mxu0 %v6419_v5  ;;  %v7259_v0 = vld [vmem:[%s8129_s30 + $0x164] ss:$8 sps:$4 sm:$0xff]   ;;  %v7254_v5 = vld [vmem:[%s8129_s30 + $0x60] ss:$8 sps:$4 sm:$0xff]  }
0x199b   : > { %4537 = vmatprep.subr.bf16.mxu1 %v6426_v27  ;;  %4578 = vmatprep.subr.bf16.mxu0 %v6428_v43  ;;  %v7257_v27 = vld [vmem:[%s8129_s30 + $0x160] ss:$8 sps:$4 sm:$0xff]   ;;  %v7262_v43 = vld [vmem:[%s8129_s30 + $0x74] ss:$8 sps:$4 sm:$0xff]  }
0x199e   : > { %4538 = vmatpush1.bf16.msra.mxu1 %v6425_v12  ;;  %4579 = vmatpush1.bf16.msra.mxu0 %v6427_v14  ;;  %v7271_v12 = vld [vmem:[%s8129_s30 + $0x184] ss:$8 sps:$4 sm:$0xff]   ;;  %v7266_v14 = vld [vmem:[%s8129_s30 + $0x80] ss:$8 sps:$4 sm:$0xff]  }
0x199f   : > { %4539 = vmatprep.subr.bf16.mxu1 %v6434_v62  ;;  %4580 = vmatprep.subr.bf16.mxu0 %v6436_v13  ;;  %v7269_v62 = vld [vmem:[%s8129_s30 + $0x180] ss:$8 sps:$4 sm:$0xff]   ;;  %v7274_v13 = vld [vmem:[%s8129_s30 + $0x94] ss:$8 sps:$4 sm:$0xff]  }
0x19a2   : > { %4540 = vmatpush1.bf16.msra.mxu1 %v6433_v21  ;;  %4581 = vmatpush1.bf16.msra.mxu0 %v6435_v22  ;;  %v7283_v21 = vld [vmem:[%s8129_s30 + $0x1a4] ss:$8 sps:$4 sm:$0xff]   ;;  %v7278_v22 = vld [vmem:[%s8129_s30 + $0xa0] ss:$8 sps:$4 sm:$0xff]  }
0x19a3   : > { %4541 = vmatprep.subr.bf16.mxu1 %v6442_v23  ;;  %4582 = vmatprep.subr.bf16.mxu0 %v6444_v25  ;;  %v7281_v23 = vld [vmem:[%s8129_s30 + $0x1a0] ss:$8 sps:$4 sm:$0xff]   ;;  %v7286_v25 = vld [vmem:[%s8129_s30 + $0xb4] ss:$8 sps:$4 sm:$0xff]  }
0x19a6   : > { %4542 = vmatpush1.bf16.msra.mxu1 %v6441_v35  ;;  %4583 = vmatpush1.bf16.msra.mxu0 %v6443_v36  ;;  %v7295_v35 = vld [vmem:[%s8129_s30 + $0x1c4] ss:$8 sps:$4 sm:$0xff]   ;;  %v7290_v36 = vld [vmem:[%s8129_s30 + $0xc0] ss:$8 sps:$4 sm:$0xff]  }
0x19a7   : > { %4543 = vmatprep.subr.bf16.mxu1 %v6450_v37  ;;  %4584 = vmatprep.subr.bf16.mxu0 %v6452_v38  ;;  %v7293_v37 = vld [vmem:[%s8129_s30 + $0x1c0] ss:$8 sps:$4 sm:$0xff]   ;;  %v7298_v38 = vld [vmem:[%s8129_s30 + $0xd4] ss:$8 sps:$4 sm:$0xff]  }
0x19aa   : > { %4544 = vmatpush1.bf16.msra.mxu1 %v6449_v39  ;;  %4585 = vmatpush1.bf16.msra.mxu0 %v6451_v33  ;;  %v7301_v39 = vld [vmem:[%s8129_s30 + $0x1d4] ss:$8 sps:$4 sm:$0xff]   ;;  %v7296_v33 = vld [vmem:[%s8129_s30 + $0xd0] ss:$8 sps:$4 sm:$0xff]  }
0x19ab   : > { %5411 = vmatprep.subr.bf16.mxu1 %v7220_v40  ;;  %5452 = vmatprep.subr.bf16.mxu0 %v7223_v41  ;;  %v7299_v40 = vld [vmem:[%s8129_s30 + $0x1d0] ss:$8 sps:$4 sm:$0xff]   ;;  %v7304_v41 = vld [vmem:[%s8129_s30 + $0xe4] ss:$8 sps:$4 sm:$0xff]  }
0x19ad   : > { %4546 = vmatmul.mubr.bf16.vlgmr.msra.gmra.mrb[72].mxu1 %v8859_v34  ;;  %4587 = vmatmul.mubr.bf16.vlgmr.msra.gmra.mrb[16].mxu0 %v8859_v34  ;;  %v7238_v34 = vld [vmem:[%s8129_s30 + $0x34] ss:$8 sps:$4 sm:$0xff]  }
0x19ae   : > { %5412 = vmatpush1.bf16.msra.mxu1 %v7218_v42  ;;  %5453 = vmatpush1.bf16.msra.mxu0 %v7221_v44  ;;  %v7307_v42 = vld [vmem:[%s8129_s30 + $0x1e4] ss:$8 sps:$4 sm:$0xff]   ;;  %v7302_v44 = vld [vmem:[%s8129_s30 + $0xe0] ss:$8 sps:$4 sm:$0xff]  }
0x19af   : > { %5413 = vmatprep.subr.bf16.mxu1 %v7226_v45  ;;  %5454 = vmatprep.subr.bf16.mxu0 %v7229_v46  ;;  %v7305_v45 = vld [vmem:[%s8129_s30 + $0x1e0] ss:$8 sps:$4 sm:$0xff]   ;;  %v7310_v46 = vld [vmem:[%s8129_s30 + $0xf4] ss:$8 sps:$4 sm:$0xff]  }
0x19b2   : > { %5414 = vmatpush1.bf16.msra.mxu1 %v7224_v48  ;;  %5455 = vmatpush1.bf16.msra.mxu0 %v7227_v7  ;;  %v7313_v48 = vld [vmem:[%s8129_s30 + $0x1f4] ss:$8 sps:$4 sm:$0xff]   ;;  %v7308_v7 = vld [vmem:[%s8129_s30 + $0xf0] ss:$8 sps:$4 sm:$0xff]  }
0x19b3   : > { %5415 = vmatprep.subr.bf16.mxu1 %v7232_v49  ;;  %5456 = vmatprep.subr.bf16.mxu0 %v7235_v50  ;;  %v7311_v49 = vld [vmem:[%s8129_s30 + $0x1f0] ss:$8 sps:$4 sm:$0xff]   ;;  %v7316_v50 = vld [vmem:[%s8129_s30 + $0x204] ss:$8 sps:$4 sm:$0xff]  }
0x19b6   : > { %5416 = vmatpush1.bf16.msra.mxu1 %v7230_v51  ;;  %5457 = vmatpush1.bf16.msra.mxu0 %v7233_v28  ;;  %v7319_v51 = vld [vmem:[%s8129_s30 + $0x304] ss:$8 sps:$4 sm:$0xff]   ;;  %v8988_v28 = vld [vmem:[%s8123_s3] sm:$0xff] }
0x19b7   : > { %5417 = vmatprep.subr.bf16.mxu1 %v7238_v34  ;;  %5458 = vmatprep.subr.bf16.mxu0 %v7241_v52  ;;  %v3754_v34 = vrot.slane %v8988_v28, %v8463_v17  ;;  %v3762_v52 = vrot.slane %v8988_v28, %v1736_v1 }
0x19ba   : > { %5418 = vmatpush1.bf16.msra.mxu1 %v7236_v47  ;;  %5459 = vmatpush1.bf16.msra.mxu0 %v7239_v53  ;;  %v3758_v47 = vrot.slane %v8988_v28, %v8460_v16  ;;  %v3766_v53 = vrot.slane %v8988_v28, %v1740_v3 }
0x19bb   : > { %5419 = vmatprep.subr.bf16.mxu1 %v7244_v54  ;;  %5460 = vmatprep.subr.bf16.mxu0 %v7247_v55 }
0x19be   : > { %5420 = vmatpush1.bf16.msra.mxu1 %v7242_v57  ;;  %5461 = vmatpush1.bf16.msra.mxu0 %v7245_v58 }
0x19bf   : > { %5421 = vmatprep.subr.bf16.mxu1 %v7250_v59  ;;  %5462 = vmatprep.subr.bf16.mxu0 %v7253_v60 }
0x19c2   : > { %5422 = vmatpush1.bf16.msra.mxu1 %v7248_v61  ;;  %5463 = vmatpush1.bf16.msra.mxu0 %v7251_v63 }
0x19c3   : > { %5423 = vmatprep.subr.bf16.mxu1 %v7256_v2  ;;  %5464 = vmatprep.subr.bf16.mxu0 %v7259_v0 }
0x19c6   : > { %5424 = vmatpush1.bf16.msra.mxu1 %v7254_v5  ;;  %5465 = vmatpush1.bf16.msra.mxu0 %v7257_v27 }
0x19c7   : > { %5425 = vmatprep.subr.bf16.mxu1 %v7262_v43  ;;  %5466 = vmatprep.subr.bf16.mxu0 %v7265_v8 }
0x19ca   : > { %5426 = vmatpush1.bf16.msra.mxu1 %v7260_v9  ;;  %5467 = vmatpush1.bf16.msra.mxu0 %v7263_v10 }
0x19cb   : > { %5427 = vmatprep.subr.bf16.mxu1 %v7268_v11  ;;  %5468 = vmatprep.subr.bf16.mxu0 %v7271_v12 }
0x19ce   : > { %5428 = vmatpush1.bf16.msra.mxu1 %v7266_v14  ;;  %5469 = vmatpush1.bf16.msra.mxu0 %v7269_v62 }
0x19cf   : > { %5429 = vmatprep.subr.bf16.mxu1 %v7274_v13  ;;  %5470 = vmatprep.subr.bf16.mxu0 %v7277_v18 }
0x19d2   : > { %5430 = vmatpush1.bf16.msra.mxu1 %v7272_v19  ;;  %5471 = vmatpush1.bf16.msra.mxu0 %v7275_v4 }
0x19d3   : > { %5431 = vmatprep.subr.bf16.mxu1 %v7280_v20  ;;  %5472 = vmatprep.subr.bf16.mxu0 %v7283_v21 }
0x19d6   : > { %5432 = vmatpush1.bf16.msra.mxu1 %v7278_v22  ;;  %5473 = vmatpush1.bf16.msra.mxu0 %v7281_v23 }
0x19d7   : > { %5433 = vmatprep.subr.bf16.mxu1 %v7286_v25  ;;  %5474 = vmatprep.subr.bf16.mxu0 %v7289_v29 }
0x19da   : > { %5434 = vmatpush1.bf16.msra.mxu1 %v7284_v32  ;;  %5475 = vmatpush1.bf16.msra.mxu0 %v7287_v56  ;;  %v7314_v56 = vld [vmem:[%s8129_s30 + $0x200] ss:$8 sps:$4 sm:$0xff]  }
0x19db   : > { %5435 = vmatprep.subr.bf16.mxu1 %v7292_v6  ;;  %5476 = vmatprep.subr.bf16.mxu0 %v7295_v35 }
0x19de   : > { %5436 = vmatpush1.bf16.msra.mxu1 %v7290_v36  ;;  %5477 = vmatpush1.bf16.msra.mxu0 %v7293_v37  ;;  %v7317_v36 = vld [vmem:[%s8129_s30 + $0x300] ss:$8 sps:$4 sm:$0xff]   ;;  %v7322_v37 = vld [vmem:[%s8129_s30 + $0x214] ss:$8 sps:$4 sm:$0xff]  }
0x19df   : > { %5437 = vmatprep.subr.bf16.mxu1 %v7298_v38  ;;  %5478 = vmatprep.subr.bf16.mxu0 %v7301_v39  ;;  %v7325_v39 = vld [vmem:[%s8129_s30 + $0x314] ss:$8 sps:$4 sm:$0xff]  }
0x19e2   : > { %5438 = vmatpush1.bf16.msra.mxu1 %v7296_v33  ;;  %5479 = vmatpush1.bf16.msra.mxu0 %v7299_v40  ;;  %v7320_v33 = vld [vmem:[%s8129_s30 + $0x210] ss:$8 sps:$4 sm:$0xff]  }
0x19e3   : > { %5439 = vmatprep.subr.bf16.mxu1 %v7304_v41  ;;  %5480 = vmatprep.subr.bf16.mxu0 %v7307_v42  ;;  %v7323_v40 = vld [vmem:[%s8129_s30 + $0x310] ss:$8 sps:$4 sm:$0xff]   ;;  %v7328_v41 = vld [vmem:[%s8129_s30 + $0x224] ss:$8 sps:$4 sm:$0xff]  }
0x19e4   : > { %v7331_v42 = vld [vmem:[%s8129_s30 + $0x324] ss:$8 sps:$4 sm:$0xff]  }
0x19e6   : > { %5440 = vmatpush1.bf16.msra.mxu1 %v7302_v44  ;;  %5481 = vmatpush1.bf16.msra.mxu0 %v7305_v45  ;;  %v7326_v44 = vld [vmem:[%s8129_s30 + $0x220] ss:$8 sps:$4 sm:$0xff]  }
0x19e7   : > { %5441 = vmatprep.subr.bf16.mxu1 %v7310_v46  ;;  %5482 = vmatprep.subr.bf16.mxu0 %v7313_v48  ;;  %v7329_v45 = vld [vmem:[%s8129_s30 + $0x320] ss:$8 sps:$4 sm:$0xff]   ;;  %v7334_v46 = vld [vmem:[%s8129_s30 + $0x234] ss:$8 sps:$4 sm:$0xff]  }
0x19e8   : > { %v7337_v48 = vld [vmem:[%s8129_s30 + $0x334] ss:$8 sps:$4 sm:$0xff]  }
0x19ea   : > { %5442 = vmatpush1.bf16.msra.mxu1 %v7308_v7  ;;  %5483 = vmatpush1.bf16.msra.mxu0 %v7311_v49  ;;  %v7332_v7 = vld [vmem:[%s8129_s30 + $0x230] ss:$8 sps:$4 sm:$0xff]  }
0x19eb   : > { %5493 = vmatprep.subr.bf16.mxu1 %v7316_v50  ;;  %5534 = vmatprep.subr.bf16.mxu0 %v7319_v51  ;;  %v7335_v49 = vld [vmem:[%s8129_s30 + $0x330] ss:$8 sps:$4 sm:$0xff]   ;;  %v7340_v50 = vld [vmem:[%s8129_s30 + $0x244] ss:$8 sps:$4 sm:$0xff]  }
0x19ec   : > { %v7343_v51 = vld [vmem:[%s8129_s30 + $0x344] ss:$8 sps:$4 sm:$0xff]  }
0x1a40   : > { %v4465_v54 = vpop.f32.mrb[68].mxu1  ;;  %v4506_v55 = vpop.f32.mrb[12].mxu0 }
0x1a41   : > { %v4466_v57 = vadd.f32 %v4465_v54, %v3754_v34  ;;  %v4507_v58 = vadd.f32 %v4506_v55, %v3762_v52  ;;  %v4467_v59 = vpop.f32.mrb[69].mxu1  ;;  %v4508_v60 = vpop.f32.mrb[13].mxu0  ;;  %v7338_v34 = vld [vmem:[%s8129_s30 + $0x240] ss:$8 sps:$4 sm:$0xff]   ;;  %v7344_v54 = vld [vmem:[%s8129_s30 + $0x250] ss:$8 sps:$4 sm:$0xff]  }
0x1a42   : > { %v4468_v61 = vadd.f32 %v4467_v59, %v3758_v47  ;;  %v4509_v63 = vadd.f32 %v4508_v60, %v3766_v53  ;;  %v4469_v2 = vpop.f32.mrb[70].mxu1  ;;  %v4510_v0 = vpop.f32.mrb[14].mxu0  ;;  %v7341_v52 = vld [vmem:[%s8129_s30 + $0x340] ss:$8 sps:$4 sm:$0xff]   ;;  %v7346_v47 = vld [vmem:[%s8129_s30 + $0x254] ss:$8 sps:$4 sm:$0xff]  }
0x1a43   : > { %v4603_v5 = vmul.f32 0.70710677, %v4466_v57  ;;  %v4605_v27 = vmul.f32 0.70710677, %v4507_v58  ;;  %v4470_v8 = vpop.f32.mrb[71].mxu1  ;;  %v4511_v9 = vpop.f32.mrb[15].mxu0 }
0x1a44   : > { %v4604_v1 = vmul.f32 0.70710677, %v4468_v61  ;;  %v4606_v43 = vmul.f32 0.70710677, %v4509_v63  ;;  %v4595_v14 = vmul.f32 0.5, %v4466_v57  ;;  %v4597_v18 = vmul.f32 0.5, %v4507_v58 }
0x1a45   : > { %7446 = verf.f32 %v4603_v5  ;;  %v4596_v19 = vmul.f32 0.5, %v4468_v61  ;;  %v4598_v21 = vmul.f32 0.5, %v4509_v63  ;;  %v7349_v53 = vld [vmem:[%s8129_s30 + $0x354] ss:$8 sps:$4 sm:$0xff]   ;;  %v7347_v55 = vld [vmem:[%s8129_s30 + $0x350] ss:$8 sps:$4 sm:$0xff]  }
0x1a46   : > { %7448 = verf.f32 %v4605_v27  ;;  %v7352_v57 = vld [vmem:[%s8129_s30 + $0x264] ss:$8 sps:$4 sm:$0xff]   ;;  %v7350_v59 = vld [vmem:[%s8129_s30 + $0x260] ss:$8 sps:$4 sm:$0xff]   ;;  %v7358_v61 = vld [vmem:[%s8129_s30 + $0x274] ss:$8 sps:$4 sm:$0xff]  }
0x1a47   : > { %7450 = verf.f32 %v4604_v1  ;;  %v7355_v58 = vld [vmem:[%s8129_s30 + $0x364] ss:$8 sps:$4 sm:$0xff]   ;;  %v7353_v60 = vld [vmem:[%s8129_s30 + $0x360] ss:$8 sps:$4 sm:$0xff]   ;;  %v7361_v63 = vld [vmem:[%s8129_s30 + $0x374] ss:$8 sps:$4 sm:$0xff]  }
0x1a48   : > { %7452 = verf.f32 %v4606_v43  ;;  %v7356_v2 = vld [vmem:[%s8129_s30 + $0x270] ss:$8 sps:$4 sm:$0xff]   ;;  %v7364_v5 = vld [vmem:[%s8129_s30 + $0x284] ss:$8 sps:$4 sm:$0xff]   ;;  %v7362_v1 = vld [vmem:[%s8129_s30 + $0x280] ss:$8 sps:$4 sm:$0xff]  }
0x1a49   : > { %v7359_v0 = vld [vmem:[%s8129_s30 + $0x370] ss:$8 sps:$4 sm:$0xff]   ;;  %v7367_v27 = vld [vmem:[%s8129_s30 + $0x384] ss:$8 sps:$4 sm:$0xff]   ;;  %v7365_v43 = vld [vmem:[%s8129_s30 + $0x380] ss:$8 sps:$4 sm:$0xff]  }
0x1a4a   : > { %v7370_v8 = vld [vmem:[%s8129_s30 + $0x294] ss:$8 sps:$4 sm:$0xff]  }
0x1a4b   : > { %v7373_v9 = vld [vmem:[%s8129_s30 + $0x394] ss:$8 sps:$4 sm:$0xff]  }
0x1a4f   : > { %v7447_v3 = vpop.eup %7446 }
0x1a50   : > { %v7449_v10 = vpop.eup %7448  ;;  %v4619_v11 = vadd.f32 1.0, %v7447_v3  ;;  %v3777_v3 = vsub.s32 6, %v8457_v15 }
0x1a51   : > { %v7451_v12 = vpop.eup %7450  ;;  %v4621_v62 = vadd.f32 1.0, %v7449_v10  ;;  %v7368_v10 = vld [vmem:[%s8129_s30 + $0x290] ss:$8 sps:$4 sm:$0xff]  }
0x1a52   : > { %v7453_v13 = vpop.eup %7452  ;;  %v4620_v4 = vadd.f32 1.0, %v7451_v12  ;;  %v4627_v20 = vmul.f32 %v4619_v11, %v4595_v14  ;;  %v3781_v11 = vsub.s32 7, %v8457_v15  ;;  %v7371_v12 = vld [vmem:[%s8129_s30 + $0x390] ss:$8 sps:$4 sm:$0xff]   ;;  %v7376_v14 = vld [vmem:[%s8129_s30 + $0x2a4] ss:$8 sps:$4 sm:$0xff]  }
0x1a53   : > { %v4622_v22 = vadd.f32 1.0, %v7453_v13  ;;  %v4629_v23 = vmul.f32 %v4621_v62, %v4597_v18  ;;  %v7379_v62 = vld [vmem:[%s8129_s30 + $0x3a4] ss:$8 sps:$4 sm:$0xff]   ;;  %v3770_v13 = vrot.slane %v8988_v28, %v1744_v30  ;;  %v3778_v18 = vrot.slane %v8988_v28, %v3777_v3  ;;  %v7385_v30 = vld [vmem:[%s8129_s30 + $0x3b4] ss:$8 sps:$4 sm:$0xff]  }
0x1a54   : > { %v4628_v25 = vmul.f32 %v4620_v4, %v4596_v19  ;;  %v4763_v6 = vpack.c.bf16 %v4627_v20, %v4627_v20  ;;  %v7374_v19 = vld [vmem:[%s8129_s30 + $0x2a0] ss:$8 sps:$4 sm:$0xff]   ;;  %v3774_v4 = vrot.slane %v8988_v28, %v1748_v31  ;;  %v3782_v20 = vrot.slane %v8988_v28, %v3781_v11  ;;  %v7407_v3 = vld [vmem:[%s8129_s30 + $0x3f0] ss:$8 sps:$4 sm:$0xff]  }
0x1a55   : > { %v4630_v29 = vmul.f32 %v4622_v22, %v4598_v21  ;;  %v4765_v38 = vpack.c.bf16 %v4629_v23, %v4629_v23  ;;  %v7377_v21 = vld [vmem:[%s8129_s30 + $0x3a0] ss:$8 sps:$4 sm:$0xff]   ;;  %v7382_v22 = vld [vmem:[%s8129_s30 + $0x2b4] ss:$8 sps:$4 sm:$0xff]  }
0x1a56   : > { %v4764_v32 = vpack.c.bf16 %v4628_v25, %v4628_v25 }
0x1a57   : > { %v4766_v35 = vpack.c.bf16 %v4630_v29, %v4630_v29 }
0x1a58   : > { %5443 = vmatprep.mubr.bf16.mxu1 %v4764_v32 }
0x1a59   : > { %5484 = vmatprep.mubr.bf16.mxu0 %v4766_v35  ;;  %5444 = vmatmul.mubr.bf16.vlgmr.msra.gmra.mrb[76].mxu1 %v4763_v6 }
0x1a5a   : > { %5485 = vmatmul.mubr.bf16.vlgmr.msra.gmra.mrb[20].mxu0 %v4765_v38  ;;  %5494 = vmatpush1.bf16.msra.mxu1 %v7314_v56 }
0x1a5b   : > { %5535 = vmatpush1.bf16.msra.mxu0 %v7317_v36  ;;  %5495 = vmatprep.subr.bf16.mxu1 %v7322_v37  ;;  %v7380_v36 = vld [vmem:[%s8129_s30 + $0x2b0] ss:$8 sps:$4 sm:$0xff]  }
0x1a5c   : > { %5536 = vmatprep.subr.bf16.mxu0 %v7325_v39  ;;  %v7383_v37 = vld [vmem:[%s8129_s30 + $0x3b0] ss:$8 sps:$4 sm:$0xff]  }
0x1a5e   : > { %5496 = vmatpush1.bf16.msra.mxu1 %v7320_v33  ;;  %v7388_v33 = vld [vmem:[%s8129_s30 + $0x2c4] ss:$8 sps:$4 sm:$0xff]  }
0x1a5f   : > { %5537 = vmatpush1.bf16.msra.mxu0 %v7323_v40  ;;  %5497 = vmatprep.subr.bf16.mxu1 %v7328_v41 }
0x1a60   : > { %5538 = vmatprep.subr.bf16.mxu0 %v7331_v42  ;;  %v7391_v42 = vld [vmem:[%s8129_s30 + $0x3c4] ss:$8 sps:$4 sm:$0xff]  }
0x1a62   : > { %5498 = vmatpush1.bf16.msra.mxu1 %v7326_v44 }
0x1a63   : > { %5539 = vmatpush1.bf16.msra.mxu0 %v7329_v45  ;;  %5499 = vmatprep.subr.bf16.mxu1 %v7334_v46  ;;  %v7386_v46 = vld [vmem:[%s8129_s30 + $0x2c0] ss:$8 sps:$4 sm:$0xff]  }
0x1a64   : > { %5540 = vmatprep.subr.bf16.mxu0 %v7337_v48  ;;  %v7389_v48 = vld [vmem:[%s8129_s30 + $0x3c0] ss:$8 sps:$4 sm:$0xff]  }
0x1a66   : > { %5500 = vmatpush1.bf16.msra.mxu1 %v7332_v7  ;;  %v7394_v7 = vld [vmem:[%s8129_s30 + $0x2d4] ss:$8 sps:$4 sm:$0xff]  }
0x1a67   : > { %5541 = vmatpush1.bf16.msra.mxu0 %v7335_v49  ;;  %5501 = vmatprep.subr.bf16.mxu1 %v7340_v50  ;;  %v7397_v49 = vld [vmem:[%s8129_s30 + $0x3d4] ss:$8 sps:$4 sm:$0xff]   ;;  %v7392_v50 = vld [vmem:[%s8129_s30 + $0x2d0] ss:$8 sps:$4 sm:$0xff]  }
0x1a68   : > { %5542 = vmatprep.subr.bf16.mxu0 %v7343_v51  ;;  %v7395_v51 = vld [vmem:[%s8129_s30 + $0x3d0] ss:$8 sps:$4 sm:$0xff]  }
0x1a6a   : > { %5502 = vmatpush1.bf16.msra.mxu1 %v7338_v34  ;;  %v7400_v34 = vld [vmem:[%s8129_s30 + $0x2e4] ss:$8 sps:$4 sm:$0xff]  }
0x1a6b   : > { %5543 = vmatpush1.bf16.msra.mxu0 %v7341_v52  ;;  %5503 = vmatprep.subr.bf16.mxu1 %v7346_v47  ;;  %v7403_v52 = vld [vmem:[%s8129_s30 + $0x3e4] ss:$8 sps:$4 sm:$0xff]   ;;  %v7398_v47 = vld [vmem:[%s8129_s30 + $0x2e0] ss:$8 sps:$4 sm:$0xff]  }
0x1a6c   : > { %5544 = vmatprep.subr.bf16.mxu0 %v7349_v53 }
0x1a6e   : > { %5504 = vmatpush1.bf16.msra.mxu1 %v7344_v54  ;;  %v7401_v54 = vld [vmem:[%s8129_s30 + $0x3e0] ss:$8 sps:$4 sm:$0xff]  }
0x1a6f   : > { %5545 = vmatpush1.bf16.msra.mxu0 %v7347_v55  ;;  %5505 = vmatprep.subr.bf16.mxu1 %v7352_v57  ;;  %v7406_v55 = vld [vmem:[%s8129_s30 + $0x2f4] ss:$8 sps:$4 sm:$0xff]  }
0x1a70   : > { %5546 = vmatprep.subr.bf16.mxu0 %v7355_v58 }
0x1a72   : > { %5506 = vmatpush1.bf16.msra.mxu1 %v7350_v59  ;;  %v7409_v59 = vld [vmem:[%s8129_s30 + $0x3f4] ss:$8 sps:$4 sm:$0xff]  }
0x1a73   : > { %5547 = vmatpush1.bf16.msra.mxu0 %v7353_v60  ;;  %5507 = vmatprep.subr.bf16.mxu1 %v7358_v61 }
0x1a74   : > { %5548 = vmatprep.subr.bf16.mxu0 %v7361_v63 }
0x1a76   : > { %5508 = vmatpush1.bf16.msra.mxu1 %v7356_v2 }
0x1a77   : > { %5549 = vmatpush1.bf16.msra.mxu0 %v7359_v0  ;;  %5509 = vmatprep.subr.bf16.mxu1 %v7364_v5 }
0x1a78   : > { %5550 = vmatprep.subr.bf16.mxu0 %v7367_v27 }
0x1a7a   : > { %5510 = vmatpush1.bf16.msra.mxu1 %v7362_v1  ;;  %v7404_v1 = vld [vmem:[%s8129_s30 + $0x2f0] ss:$8 sps:$4 sm:$0xff]  }
0x1a7b   : > { %5551 = vmatpush1.bf16.msra.mxu0 %v7365_v43  ;;  %5511 = vmatprep.subr.bf16.mxu1 %v7370_v8 }
0x1a7c   : > { %5552 = vmatprep.subr.bf16.mxu0 %v7373_v9 }
0x1a7e   : > { %5512 = vmatpush1.bf16.msra.mxu1 %v7368_v10 }
0x1a7f   : > { %5553 = vmatpush1.bf16.msra.mxu0 %v7371_v12  ;;  %5513 = vmatprep.subr.bf16.mxu1 %v7376_v14 }
0x1a80   : > { %v4547_v23 = vpop.f32.mrb[72].mxu1  ;;  %v4588_v25 = vpop.f32.mrb[16].mxu0  ;;  %5554 = vmatprep.subr.bf16.mxu0 %v7379_v62 }
0x1a81   : > { %v4548_v29 = vadd.f32 %v4547_v23, %v3770_v13  ;;  %v4589_v32 = vadd.f32 %v4588_v25, %v3778_v18  ;;  %v4549_v56 = vpop.f32.mrb[73].mxu1  ;;  %v4590_v6 = vpop.f32.mrb[17].mxu0 }
0x1a82   : > { %v4550_v15 = vadd.f32 %v4549_v56, %v3774_v4  ;;  %v4591_v31 = vadd.f32 %v4590_v6, %v3782_v20  ;;  %5514 = vmatpush1.bf16.msra.mxu1 %v7374_v19  ;;  %v4551_v28 = vpop.f32.mrb[74].mxu1  ;;  %v4592_v35 = vpop.f32.mrb[18].mxu0  ;;  %v5577_v6 = vld [vmem:[%s938_s26] sm:$0x3]  ;;  %s9320_s26 = sld [smem:[#allocation43_spill]] (!%p6581_p12) }
0x1a83   : > { %v4607_v38 = vmul.f32 0.70710677, %v4548_v29  ;;  %v4609_v39 = vmul.f32 0.70710677, %v4589_v32  ;;  %5555 = vmatpush1.bf16.msra.mxu0 %v7377_v21  ;;  %5515 = vmatprep.subr.bf16.mxu1 %v7382_v22  ;;  %v4552_v44 = vpop.f32.mrb[75].mxu1  ;;  %v4593_v45 = vpop.f32.mrb[19].mxu0 }
0x1a84   : > { %v4608_v40 = vmul.f32 0.70710677, %v4550_v15  ;;  %v4610_v41 = vmul.f32 0.70710677, %v4591_v31  ;;  %5556 = vmatprep.subr.bf16.mxu0 %v7385_v30  ;;  %v4599_v61 = vmul.f32 0.5, %v4548_v29  ;;  %v4601_v0 = vmul.f32 0.5, %v4589_v32 }
0x1a85   : > { %7454 = verf.f32 %v4607_v38  ;;  %v4600_v5 = vmul.f32 0.5, %v4550_v15  ;;  %v4602_v8 = vmul.f32 0.5, %v4591_v31 }
0x1a86   : > { %7456 = verf.f32 %v4609_v39  ;;  %5516 = vmatpush1.bf16.msra.mxu1 %v7380_v36  ;;  %v5582_v39 = vrot.slane %v5577_v6, %v8463_v17 }
0x1a87   : > { %7458 = verf.f32 %v4608_v40  ;;  %5557 = vmatpush1.bf16.msra.mxu0 %v7383_v37  ;;  %5517 = vmatprep.subr.bf16.mxu1 %v7388_v33 }
0x1a88   : > { %7460 = verf.f32 %v4610_v41  ;;  %5558 = vmatprep.subr.bf16.mxu0 %v7391_v42  ;;  %v5586_v42 = vrot.slane %v5577_v6, %v8460_v16  ;;  %s9321_s8 = smov (!%p6581_p12), %s9320_s26 }
0x1a8a   : > { %5518 = vmatpush1.bf16.msra.mxu1 %v7386_v46 }
0x1a8b   : > { %5559 = vmatpush1.bf16.msra.mxu0 %v7389_v48  ;;  %5519 = vmatprep.subr.bf16.mxu1 %v7394_v7 }
0x1a8c   : > { %5560 = vmatprep.subr.bf16.mxu0 %v7397_v49 }
0x1a8e   : > { %5520 = vmatpush1.bf16.msra.mxu1 %v7392_v50 }
0x1a8f   : > { %v7455_v53 = vpop.eup %7454  ;;  %5561 = vmatpush1.bf16.msra.mxu0 %v7395_v51  ;;  %5521 = vmatprep.subr.bf16.mxu1 %v7400_v34  ;;  %v7466_v34 = vld [vmem:[%s9321_s8 + $0x48] sm:$0xff] (!%p6581_p12)  }
0x1a90   : > { %v7457_v57 = vpop.eup %7456  ;;  %v4623_v58 = vadd.f32 1.0, %v7455_v53  ;;  %5562 = vmatprep.subr.bf16.mxu0 %v7403_v52  ;;  %v7467_v52 = vld [vmem:[%s9321_s8 + $0x8] sm:$0xff] (!%p6581_p12)  }
0x1a91   : > { %v7459_v60 = vpop.eup %7458  ;;  %v4625_v63 = vadd.f32 1.0, %v7457_v57 }
0x1a92   : > { %v7461_v2 = vpop.eup %7460  ;;  %v4624_v27 = vadd.f32 1.0, %v7459_v60  ;;  %5522 = vmatpush1.bf16.msra.mxu1 %v7398_v47  ;;  %v4631_v43 = vmul.f32 %v4623_v58, %v4599_v61 }
0x1a93   : > { %v4626_v9 = vadd.f32 1.0, %v7461_v2  ;;  %5563 = vmatpush1.bf16.msra.mxu0 %v7401_v54  ;;  %5523 = vmatprep.subr.bf16.mxu1 %v7406_v55  ;;  %v4633_v10 = vmul.f32 %v4625_v63, %v4601_v0  ;;  %v7468_v63 = vld [vmem:[%s9321_s8 + $0x50] sm:$0xff] (!%p6581_p12)   ;;  %v7470_v0 = vld [vmem:[%s9321_s8 + $0x58] sm:$0xff] (!%p6581_p12)  }
0x1a94   : > { %5564 = vmatprep.subr.bf16.mxu0 %v7409_v59  ;;  %v4632_v11 = vmul.f32 %v4624_v27, %v4600_v5  ;;  %v4767_v62 = vpack.c.bf16 %v4631_v43, %v4631_v43  ;;  %v7469_v2 = vld [vmem:[%s9321_s8 + $0x10] sm:$0xff] (!%p6581_p12)   ;;  %v7471_v5 = vld [vmem:[%s9321_s8 + $0x18] sm:$0xff] (!%p6581_p12)   ;;  %v7472_v27 = vld [vmem:[%s9321_s8 + $0x60] sm:$0xff] (!%p6581_p12)  }
0x1a95   : > { %v4634_v12 = vmul.f32 %v4626_v9, %v4602_v8  ;;  %v4769_v18 = vpack.c.bf16 %v4633_v10, %v4633_v10  ;;  %v7474_v43 = vld [vmem:[%s9321_s8 + $0x68] sm:$0xff] (!%p6581_p12)   ;;  %v7476_v9 = vld [vmem:[%s9321_s8 + $0x70] sm:$0xff] (!%p6581_p12)   ;;  %v7478_v10 = vld [vmem:[%s9321_s8 + $0x78] sm:$0xff] (!%p6581_p12)  }
0x1a96   : > { %5524 = vmatpush1.bf16.msra.mxu1 %v7404_v1  ;;  %v4768_v14 = vpack.c.bf16 %v4632_v11, %v4632_v11  ;;  %v7473_v1 = vld [vmem:[%s9321_s8 + $0x20] sm:$0xff] (!%p6581_p12)   ;;  %v7475_v8 = vld [vmem:[%s9321_s8 + $0x28] sm:$0xff] (!%p6581_p12)   ;;  %v7479_v11 = vld [vmem:[%s9321_s8 + $0x38] sm:$0xff] (!%p6581_p12)  }
0x1a97   : > { %5565 = vmatpush1.bf16.msra.mxu0 %v7407_v3  ;;  %v4770_v13 = vpack.c.bf16 %v4634_v12, %v4634_v12  ;;  %v7477_v3 = vld [vmem:[%s9321_s8 + $0x30] sm:$0xff] (!%p6581_p12)  }
0x1a98   : > { %5525 = vmatprep.mubr.bf16.mxu1 %v4768_v14 }
0x1a99   : > { %5566 = vmatprep.mubr.bf16.mxu0 %v4770_v13  ;;  %5526 = vmatmul.mubr.bf16.vlgmr.msra.gmra.mrb[80].mxu1 %v4767_v62  ;;  %v5597_v13 = vld [vmem:[%s9322_s20] sm:$0x3] (!%p6581_p12) }
0x1a9a   : > { %5567 = vmatmul.mubr.bf16.vlgmr.msra.gmra.mrb[24].mxu0 %v4769_v18  ;;  %v5598_v18 = vld [vmem:[%s9323_s2] sm:$0x3] (!%p6581_p12) }
0x1b2c   : > { %v5445_v19 = vpop.f32.mrb[76].mxu1 }
0x1b2d   : > { %v5486_v4 = vpop.f32.mrb[20].mxu0  ;;  %v5447_v20 = vpop.f32.mrb[77].mxu1 }
0x1b2e   : > { %v5487_v21 = vadd.f32 %v5486_v4, %v5445_v19  ;;  %v5488_v22 = vpop.f32.mrb[21].mxu0  ;;  %v5449_v23 = vpop.f32.mrb[78].mxu1  ;;  %v5624_v19 = vrot.slane (!%p6581_p12), %v5597_v13, %v8463_v17  ;;  %v5628_v4 = vrot.slane (!%p6581_p12), %v5597_v13, %v8460_v16 }
0x1b2f   : > { %v5489_v25 = vadd.f32 %v5488_v22, %v5447_v20  ;;  %v5490_v30 = vpop.f32.mrb[22].mxu0  ;;  %v5450_v29 = vpop.f32.mrb[79].mxu1  ;;  %v5637_v22 = vrot.slane (!%p6581_p12), %v5598_v18, %v8463_v17  ;;  %v5641_v23 = vrot.slane (!%p6581_p12), %v5598_v18, %v8460_v16 }
0x1b30   : > { %v5491_v32 = vpop.f32.mrb[23].mxu0 }
0x1b6c   : > { %v5527_v56 = vpop.f32.mrb[80].mxu1 }
0x1b6d   : > { %v5528_v15 = vadd.f32 %v5527_v56, %v5487_v21  ;;  %v5568_v31 = vpop.f32.mrb[24].mxu0  ;;  %v5529_v28 = vpop.f32.mrb[81].mxu1 }
0x1b6e   : > { %v5530_v35 = vadd.f32 %v5529_v28, %v5489_v25  ;;  %v5570_v36 = vpop.f32.mrb[25].mxu0  ;;  %v5531_v37 = vpop.f32.mrb[82].mxu1  ;;  %v5680_v28 = vld [vmem:[%s9324_s9] sm:$0x1] (!%p6581_p12) }
0x1b6f   : > { %v5569_v38 = vadd.f32 %v5568_v31, %v5528_v15  ;;  %v5572_v33 = vpop.f32.mrb[26].mxu0  ;;  %v5532_v40 = vpop.f32.mrb[83].mxu1 }
0x1b70   : > { %v5571_v41 = vadd.f32 %v5570_v36, %v5530_v35  ;;  %v5573_v44 = vpop.f32.mrb[27].mxu0  ;;  %5596 = sbr.rel (%p6581_p12) target bundleno = 7568 (0x1d90), region = 124 }
0x1b71   : > { %v5575_v45 = vadd.f32 %v5569_v38, %v8755_v24  ;;  %v7464_v24 = vld [vmem:[%s9320_s26 + $0x40] sm:$0xff] (!%p6581_p12)  }
0x1b72   : > { %v5576_v46 = vadd.f32 %v5571_v41, %v8757_v26  ;;  %v7465_v26 = vld [vmem:[%s9321_s8] sm:$0xff] (!%p6581_p12)   ;;  %6639 = vmatprep.subr.bf16.mxu0 (!%p6581_p12), %v7464_v24 }
0x1b73   : > { %v5589_v48 = vadd.f32 %v5582_v39, %v5575_v45  ;;  %6640 = vmatpush3.bf16.msra.mxu0 (!%p6581_p12), %v7465_v26 }
0x1b74   : > { %v5590_v7 = vadd.f32 %v5586_v42, %v5576_v46  ;;  %6641 = vmatprep.subr.bf16.mxu0 (!%p6581_p12), %v7466_v34 }
0x1b75   : > { %5591 = vst [vmem:[#allocation2] sm:$0xff] %v5589_v48  ;;  %v5600_v49 = vsel (!%p6581_p12), %vm5599_vm9, %v5589_v48, 0.0 }
0x1b76   : > { %5592 = vst [vmem:[#allocation2 + $0x8] sm:$0xff] %v5590_v7  ;;  %v5601_v50 = vsel (!%p6581_p12), %vm5599_vm9, %v5590_v7, 0.0 }
0x1b77   : > { %v5602_v51 = vadd.f32 %v5601_v50, %v5600_v49  ;;  %6642 = vmatpush3.bf16.msra.mxu0 %v7467_v52 }
0x1b78   : > { %6643 = vmatprep.subr.bf16.mxu0 %v7468_v63 }
0x1b79   : > { %5603 = vadd.xlane.f32.xlu0 %v5602_v51 }
0x1b7b   : > { %6644 = vmatpush3.bf16.msra.mxu0 %v7469_v2 }
0x1b7c   : > { %6645 = vmatprep.subr.bf16.mxu0 %v7470_v0 }
0x1b7f   : > { %6646 = vmatpush3.bf16.msra.mxu0 %v7471_v5 }
0x1b80   : > { %6647 = vmatprep.subr.bf16.mxu0 %v7472_v27 }
0x1b83   : > { %6648 = vmatpush3.bf16.msra.mxu0 %v7473_v1 }
0x1b84   : > { %6649 = vmatprep.subr.bf16.mxu0 %v7474_v43 }
0x1b87   : > { %6650 = vmatpush3.bf16.msra.mxu0 %v7475_v8 }
0x1b88   : > { %6651 = vmatprep.subr.bf16.mxu0 %v7476_v9 }
0x1b8b   : > { %6652 = vmatpush3.bf16.msra.mxu0 %v7477_v3 }
0x1b8c   : > { %6653 = vmatprep.subr.bf16.mxu0 %v7478_v10 }
0x1b8f   : > { %6654 = vmatpush3.bf16.msra.mxu0 %v7479_v11 }
0x1c06   : > { %v5604_v47 = vpop.xlane.xlu0 %5603 }
0x1c07   : > { %v5605_v53 = vmul.f32 0.00390625, %v5604_v47 }
0x1c09   : > { %v5606_v54 = vsub.f32 %v5589_v48, %v5605_v53  ;;  %v5607_v55 = vsub.f32 %v5590_v7, %v5605_v53 }
0x1c0b   : > { %v5608_v57 = vmul.f32 %v5606_v54, %v5606_v54  ;;  %v5609_v58 = vmul.f32 %v5607_v55, %v5607_v55 }
0x1c0d   : > { %v5610_v59 = vsel %vm5599_vm9, %v5608_v57, 0.0  ;;  %v5611_v60 = vsel %vm5599_vm9, %v5609_v58, 0.0 }
0x1c0e   : > { %v5612_v61 = vadd.f32 %v5611_v60, %v5610_v59 }
0x1c10   : > { %5613 = vadd.xlane.f32.xlu0 %v5612_v61 }
0x1c9d   : > { %v5614_v12 = vpop.xlane.xlu0 %5613 }
0x1c9e   : > { %v5615_v14 = vmul.f32 0.00390625, %v5614_v12 }
0x1ca0   : > { %v5616_v62 = vadd.f32 1e-06, %v5615_v14 }
0x1ca2   : > { %7480 = vrsqrt.f32 %v5616_v62 }
0x1cac   : > { %v7481_v20 = vpop.eup %7480 }
0x1cad   : > { %v5619_v21 = vmul.f32 %v7481_v20, %v5607_v55  ;;  %v5618_v25 = vmul.f32 %v7481_v20, %v5606_v54 }
0x1caf   : > { %v5632_v30 = vmul.f32 %v5628_v4, %v5619_v21  ;;  %v5631_v29 = vmul.f32 %v5624_v19, %v5618_v25 }
0x1cb1   : > { %v5645_v32 = vadd.f32 %v5641_v23, %v5632_v30  ;;  %v5644_v56 = vadd.f32 %v5637_v22, %v5631_v29 }
0x1cb3   : > { %v5679_v6 = vpack.c.bf16 %v5645_v32, %v5645_v32  ;;  %v5678_v15 = vpack.c.bf16 %v5644_v56, %v5644_v56 }
0x1cb5   : > { %5809 = vmatprep.mubr.bf16.mxu0 %v5679_v6 }
0x1cb6   : > { %5810 = vmatmul.mubr.bf16.vlgmr.msra.gmra.mrb[0].mxu0 %v5678_v15 }
0x1d89   : > { %v6655_v31 = vpop.f32.mrb[0].mxu0 }
0x1d8a   : > { %v6656_v35 = vpop.f32.mrb[1].mxu0 }
0x1d8b   : > { %v6657_v36 = vadd.f32 %v6656_v35, %v6655_v31  ;;  %v6658_v17 = vpop.f32.mrb[2].mxu0 }
0x1d8c   : > { %v6659_v37 = vpop.f32.mrb[3].mxu0 }
0x1d8d   : > { %v5812_v16 = vadd.f32 %v6657_v36, %v5680_v28 }
0x1d8f   : > { %5817 = vst [vmem:[%s8133_s5] sm:$0x1] %v5812_v16 }
0x1d90 PF: > { %s9325_s30 = sld [smem:[#allocation18_spill]]  ;;  %s9326_s27 = sld [smem:[#allocation26_spill]] }
0x1d91   : > { %s9327_s0 = sld [smem:[#allocation45_spill]]  ;;  %s5831_s4 = sshll.u32 %s8133_s5, 4  ;;  %s5832_s4 = int_to_ptr.vmem [resolvable:$true] %s5831_s4 }
0x1d92   : > { %s9329_s29 = sand.u32 1, %s7662_s25   ;;  %s7572_s13 = scalar_lea.vmem %s5832_s4, 16 }
0x1d93   : > { %s5819_s15 = scalar_lea.sflag [#allocation6], %s9329_s29  ;;  %p7573_p3 = scmp.ne.s32.totalorder %s5832_s4, %s7572_s13 }
0x1d94   : > { %s7713_s7 = smov [#allocation10]  }
0x1d95   : > { %s7576_s14 = sshll.u32 %s7713_s7, 4  ;;  %s7577_s14 = int_to_ptr.vmem [resolvable:$false] %s7576_s14 }
0x1d96   : > { %s6598_s21 = sshll.u32 %s9325_s30, 4  ;;  %p9330_p9 = scmp.ne.s32.totalorder %s9326_s27, 0 }
0x1d97   : > { %s9328_s19 = smov %s9327_s0  ;;  %s9152_s22 = scalar_lea.hbm %s9327_s0, %s6598_s21 }
0x1d98   : > { %p7574_p0 = pnand %p7573_p3, %p9330_p9  ;;  %s7578_s17 = scalar_lea.vmem %s7577_s14, 32 }
0x1d99   : > { %p7579_p2 = scmp.lt.s32.totalorder %s5832_s4, %s7577_s14  ;;  %p7580_p13 = scmp.lt.s32.totalorder %s7578_s17, %s7572_s13 }
0x1d9a   : > { %p7575_p1 = pneg %p7574_p0 }
0x1d9b   : > { %p7581_p7 = por %p7580_p13, %p7579_p2 }
0x1d9d   : > { %p7582_p10 = pnand %p7581_p7, %p7575_p1 }
0x1d9f   : > { %7585 = shalt.err (!%p7582_p10)
}
0x1da0   : > { %s7586_s5 = scalar_lea.hbm %s9152_s22, 16  ;;  %s7590_s28 = scalar_lea.hbm %s9328_s19, 32 }
0x1da1   : > { %p7587_p6 = scmp.ne.s32.totalorder %s9152_s22, %s7586_s5  ;;  %p7591_p11 = scmp.lt.u32.totalorder %s9152_s22, %s9328_s19 }
0x1da2   : > { %p7592_p8 = scmp.lt.u32.totalorder %s7590_s28, %s7586_s5  ;;  %p7594_p3 = scmp.lt.u32.totalorder %s7586_s5, %s9152_s22 }
0x1da3   : > { %p7588_p5 = pnand %p7587_p6, %p9330_p9 }
0x1da4   : > { %p7593_p12 = por %p7592_p8, %p7591_p11 }
0x1da5   : > { %p7589_p4 = pneg %p7588_p5 }
0x1da6   : > { %p7595_p0 = por %p7594_p3, %p7593_p12 }
0x1da8   : > { %p7596_p1 = pnand %p7595_p0, %p7589_p4 }
0x1daa   : > { %7599 = shalt.err (!%p7596_p1)
}
0x1dab   : > { %6776 = dma.vmem_to_hbm [thread:$0]  (%p9330_p9), %s5832_s4, 16, %s9152_s22, %s5819_s15  }
0x1dac PF: > { %s9331_s1 = sld [smem:[#allocation21_spill]]  ;;  %s9332_s9 = sld [smem:[#allocation14_spill]] }
0x1dad   : > { %s9333_s30 = sld [smem:[#allocation27_spill]] }
0x1db2   : > { %p6793_p2 = scmp.ge.s32.totalorder %s9331_s1, 2  ;;  %s5843_s21 = sand.u32 1, %s9332_s9  }
0x1db3   : > { %p9334_p13 = scmp.ne.s32.totalorder %s9333_s30, 0  ;;  %s5844_s3 = scalar_lea.sflag [#allocation6], %s5843_s21 }
0x1db5   : > { %p6789_p7 = pnand %p6793_p2, %p9334_p13 }
0x1db7   : > { %7653 = dma.done.wait (!%p6789_p7), %s5844_s3, 16  }
0x1db8   : > { %7655 = vsyncadd (!%p6789_p7), %s5844_s3, 4294967280  ;;  %s40_s5 = sadd.s32 1, %s9331_s1   ;;  %s9335_s26 = sld [smem:[#allocation15_spill]] }
0x1db9   : > { %p37_p10 = scmp.ge.s32.totalorder %s40_s5, 6   ;;  %s9336_s0 = sld [smem:[#allocation25_spill]] }
0x1dba   : > { %s9337_s27 = sld [smem:[#allocation16_spill]]  ;;  %s9338_s3 = sld [smem:[#allocation17_spill]] }
0x1dbb   : > { %s9339_s28 = sld [smem:[#allocation24_spill]]  ;;  %s9340_s29 = sld [smem:[#allocation19_spill]] }
0x1dbc   : > { %s9341_s22 = sld [smem:[#allocation20_spill]]  ;;  %s9342_s4 = sld [smem:[#allocation22_spill]] }
0x1dbd   : > { %s9343_s30 = sld [smem:[#allocation23_spill]]  ;;  %s9344_s2 = smov %s7662_s25 }
0x1dbe   : > { %s9345_s25 = smov %s9335_s26  ;;  %39 = sbr.rel (!%p37_p10) target bundleno = 30 (0x1e), region = 211 }
0x1dbf   : > { %s9346_s26 = smov %s9336_s0 }
0x1dc2   : > { %s9347_s0 = smov %s9341_s22 }
0x1dc5   :  { %5848 = vsyncpa [#allocation5], 1 }
0x1dc6   :  { %5850 = vsyncpa [#allocation5 + $0x1], 1 }
0x1dc7   :  { %5851 = vsyncpa [#allocation8], 1 }
0x1dc8   :  { %5853 = vsyncpa [#allocation8 + $0x1], 1 }
0x1dc9   :  { %5854 = vsyncpa [#allocation6], 1 }
0x1dca   :  { %5856 = vsyncpa [#allocation6 + $0x1], 1 }

</bundles_post_ra>
